<compile_context>
chip_gen: v7x
topology: tpu7x:2x2x1
jax: 0.10.0
libtpu: 0.0.40
codegen_flags: <defaults>
</compile_context>

<pallas_src>
import functools

import jax
import jax.numpy as jnp
from jax import lax
from jax.experimental import pallas as pl
from jax.experimental.pallas import tpu as pltpu

SELU_ALPHA = 1.6732632423543772
SELU_SCALE = 1.0507009873554805


def _selu(x):
    return SELU_SCALE * jnp.where(x > 0, x, SELU_ALPHA * (jnp.exp(x) - 1.0))


def _softmax(x, axis):
    m = jnp.max(x, axis=axis, keepdims=True)
    e = jnp.exp(x - m)
    s = jnp.sum(e, axis=axis, keepdims=True)
    return e * pl.reciprocal(s, approx=True)      # divide on the EUP slot


def trans_attention_kernel(x_ref, v_ref, w_ref, b_ref, mask_ref, out_ref, *,
                           S, groups):
    """One grid step: 2*Bt*S rows = [pseudo block ; valid block].

    x_ref / v_ref / out_ref: (2L, C) channels-last rows; v_ref is x with the
    two stream halves swapped (V operand of the second bmm).
    w_ref: (2, C, C) collapsed fc1 weights in x@W layout; b_ref: (2, 1, C).
    mask_ref: (2L, 2L) cross-stream block mask with 1/dn folded in.
    """
    C = x_ref.shape[-1]
    L2 = x_ref.shape[0]

    X = x_ref[...]                                               # (2L, C)

    def fc1(y):
        # 7-layer MLP collapsed to: affine(0..3) -> SELU -> affine(4..6).
        y = jnp.dot(y, w_ref[0], preferred_element_type=jnp.float32) + b_ref[0]
        y = _selu(y)                       # Dropout(p=0.1) == identity (eval)
        return jnp.dot(y, w_ref[1], preferred_element_type=jnp.float32) + b_ref[1]

    # Q and K share the same fc1 features (fc1 is one shared module).
    F = fc1(X)                                                   # (2L, C)
    Q = _softmax(F.reshape(groups, S, C), axis=1).reshape(L2, C)  # over points
    K = _softmax(F, axis=-1)                                     # over channels

    # One dense (2L,C)x(C,2L) matmul + mask instead of 2*Bt tiny batched bmms.
    E = lax.dot_general(Q, K, (((1,), (1,)), ((), ())),
                        preferred_element_type=jnp.float32)      # (2L, 2L)
    Y = jnp.dot(E * mask_ref[...], v_ref[...],
                preferred_element_type=jnp.float32)              # (2L, C)

    G3 = fc1(Y).reshape(groups, S, C)

    # F.normalize(dim=-1) of the (B, C, S) output == L2-normalize over S.
    sumsq = jnp.sum(G3 * G3, axis=1, keepdims=True)              # (groups,1,C)
    inv_norm = lax.rsqrt(jnp.maximum(sumsq, 1e-24))
    # residual scale (1.1 - 0.1*Ra) == 1.0 because Ra == 1 in the module.
    out3 = G3 * (inv_norm * 0.1) + X.reshape(groups, S, C)
    out_ref[...] = out3.reshape(L2, C)


def _fold_affine(ws, bs):
    """Compose consecutive PyTorch Linear layers into one x@M + v affine map."""
    C = ws.shape[-1]
    M = jnp.eye(C, dtype=jnp.float32)
    v = jnp.zeros((C,), dtype=jnp.float32)
    for i in range(ws.shape[0]):
        M = M @ ws[i].T
        v = v @ ws[i].T + bs[i]
    return M, v


def trans_attention(pseudo_feas0, valid_feas0, weights, biases, *, block_b=None):
    """pseudo_feas0 / valid_feas0: (B, C, S) float32 (PyTorch channels-first).
    weights: (7, C, C) in PyTorch (out, in) layout; biases: (7, C)."""
    B, C, S = pseudo_feas0.shape
    if block_b is None:
        block_b = -(-B // 2)             # grid of 2 -> both v7x TensorCores busy
    bt = max(1, min(block_b, B))
    nb = -(-B // bt)
    Bp = nb * bt
    L2 = 2 * bt * S

    def to_blocks(x):                    # (B, C, S) -> (nb, bt, S, C)
        x = jnp.transpose(x, (0, 2, 1))
        if Bp != B:
            x = jnp.pad(x, ((0, Bp - B), (0, 0), (0, 0)))
        return x.reshape(nb, bt, S, C)

    pse = to_blocks(pseudo_feas0)
    val = to_blocks(valid_feas0)
    # Per grid block: [pseudo batches ; valid batches], plus the swapped order
    # (the V operand of the second bmm uses the same stream as the query).
    x_rows = jnp.concatenate([pse, val], axis=1).reshape(nb * L2, C)
    v_rows = jnp.concatenate([val, pse], axis=1).reshape(nb * L2, C)

    # Collapse fc1: Linear x4 -> SELU -> Dropout(eval=id) -> Linear x3.
    wa, ba = _fold_affine(weights[:4], biases[:4])
    wb, bb = _fold_affine(weights[4:], biases[4:])
    w_stack = jnp.stack([wa, wb]).astype(jnp.float32)            # (2, C, C)
    b_stack = jnp.stack([ba, bb]).reshape(2, 1, C).astype(jnp.float32)

    # Cross-stream block mask with 1/dn folded in (dn == N == C).
    grp = jnp.arange(L2, dtype=jnp.int32) // S
    bid, hid = grp % bt, grp // bt
    mask = (bid[:, None] == bid[None, :]) & (hid[:, None] != hid[None, :])
    mask = mask.astype(jnp.float32) * (1.0 / float(C))           # (2L, 2L)

    kernel = functools.partial(trans_attention_kernel, S=S, groups=2 * bt)
    grid_spec = pltpu.PrefetchScalarGridSpec(
        num_scalar_prefetch=0,
        grid=(nb,),
        in_specs=[
            pl.BlockSpec((L2, C), lambda i: (i, 0)),
            pl.BlockSpec((L2, C), lambda i: (i, 0)),
            pl.BlockSpec((2, C, C), lambda i: (0, 0, 0)),    # resident weights
            pl.BlockSpec((2, 1, C), lambda i: (0, 0, 0)),    # resident biases
            pl.BlockSpec((L2, L2), lambda i: (0, 0)),        # resident mask
        ],
        out_specs=pl.BlockSpec((L2, C), lambda i: (i, 0)),
    )
    out_rows = pl.pallas_call(
        kernel,
        out_shape=jax.ShapeDtypeStruct((nb * L2, C), jnp.float32),
        grid_spec=grid_spec,
        compiler_params=pltpu.CompilerParams(dimension_semantics=("parallel",)),
    )(x_rows, v_rows, w_stack, b_stack, mask)

    out = out_rows.reshape(nb, 2, bt, S, C)

    def to_bcs(o):                       # (nb, bt, S, C) -> (B, C, S)
        return jnp.transpose(o.reshape(Bp, S, C)[:B], (0, 2, 1))

    return to_bcs(out[:, 0]), to_bcs(out[:, 1])


# ---- pure-JAX reference (original 7-layer fc1; numerical sanity check) ----
def _l2_normalize_ref(x, axis=-1, eps=1e-12):
    n = jnp.sqrt(jnp.sum(x * x, axis=axis, keepdims=True))
    return x / jnp.maximum(n, eps)


def _reference(pse0, val0, w, b):
    def fc1(x):
        y = x
        for i in range(7):
            y = y @ w[i].T + b[i]
            if i == 3:
                y = _selu(y)
        return y

    B, C, S = pse0.shape
    dn = float(C)
    pse_x = jnp.transpose(pse0, (0, 2, 1))
    val_x = jnp.transpose(val0, (0, 2, 1))
    pse_F = fc1(pse_x)
    val_F = fc1(val_x)
    pse_Q = jax.nn.softmax(pse_F, axis=-2)
    pse_K = jax.nn.softmax(pse_F, axis=-1)
    val_Q = jax.nn.softmax(val_F, axis=-2)
    val_K = jax.nn.softmax(val_F, axis=-1)

    pe = jnp.einsum('bsc,btc->bst', pse_Q, val_K) / dn
    pe = jnp.einsum('bst,btc->bsc', pe, pse_x)
    pe = jnp.transpose(fc1(pe), (0, 2, 1))
    pe = _l2_normalize_ref(pe, axis=-1) * 0.1 + pse0 * 1.0

    ve = jnp.einsum('bsc,btc->bst', val_Q, pse_K) / dn
    ve = jnp.einsum('bst,btc->bsc', ve, val_x)
    ve = jnp.transpose(fc1(ve), (0, 2, 1))
    ve = _l2_normalize_ref(ve, axis=-1) * 0.1 + val0 * 1.0
    return pe, ve


if __name__ == "__main__":
    key = jax.random.PRNGKey(0)
    # (batch, channels=N, points): channels is the Linear feature dim.
    # B=16 with the default block -> grid of 2 parallel steps.
    B, C, S = 16, 32, 16

    k1, k2, k3, k4 = jax.random.split(key, 4)
    pseudo_feas0 = jax.random.normal(k1, (B, C, S), dtype=jnp.float32)
    valid_feas0 = jax.random.normal(k2, (B, C, S), dtype=jnp.float32)

    # Deterministic fc1 params: 7 Linear(C, C) layers (PyTorch-style init).
    bound = 1.0 / jnp.sqrt(jnp.float32(C))
    weights = jax.random.uniform(k3, (7, C, C), dtype=jnp.float32,
                                 minval=-bound, maxval=bound)
    biases = jax.random.uniform(k4, (7, C), dtype=jnp.float32,
                                minval=-bound, maxval=bound)

    pse_out, val_out = trans_attention(pseudo_feas0, valid_feas0, weights, biases)
    jax.block_until_ready((pse_out, val_out))

    ref_pse, ref_val = _reference(pseudo_feas0, valid_feas0, weights, biases)
    assert pse_out.shape == (B, C, S) and val_out.shape == (B, C, S)
    assert bool(jnp.all(jnp.isfinite(pse_out))) and bool(jnp.all(jnp.isfinite(val_out)))
    assert bool(jnp.allclose(pse_out, ref_pse, atol=5e-2, rtol=5e-2))
    assert bool(jnp.allclose(val_out, ref_val, atol=5e-2, rtol=5e-2))

    print("KERNEL_OK")
</pallas_src>

<mosaic_0001>
module attributes {stable_mosaic.version = 11 : i64} {
  func.func @trans_attention_kernel(%arg0: i32, %arg1: memref<256x32xf32, #tpu.memory_space<vmem>>, %arg2: memref<256x32xf32, #tpu.memory_space<vmem>>, %arg3: memref<2x32x32xf32, #tpu.memory_space<vmem>>, %arg4: memref<2x1x32xf32, #tpu.memory_space<vmem>>, %arg5: memref<256x256xf32, #tpu.memory_space<vmem>>, %arg6: memref<256x32xf32, #tpu.memory_space<vmem>>) attributes {dimension_semantics = [#tpu.dimension_semantics<parallel>], iteration_bounds = array<i64: 2>, scalar_prefetch = 0 : i64, scratch_operands = 0 : i64, tpu.core_type = #tpu.core_type<tc>, window_params = [{transform_indices = @transform_0, window_bounds = array<i64: 256, 32>}, {transform_indices = @transform_1, window_bounds = array<i64: 256, 32>}, {pipeline_mode = #tpu.pipeline_mode<synchronous>, transform_indices = @transform_2, window_bounds = array<i64: 2, 32, 32>}, {pipeline_mode = #tpu.pipeline_mode<synchronous>, transform_indices = @transform_3, window_bounds = array<i64: 2, 1, 32>}, {pipeline_mode = #tpu.pipeline_mode<synchronous>, transform_indices = @transform_4, window_bounds = array<i64: 256, 256>}, {transform_indices = @transform_5, window_bounds = array<i64: 256, 32>}]} {
    %c0 = arith.constant 0 : index
    %c0_0 = arith.constant 0 : index
    %0 = vector.load %arg1[%c0, %c0_0] : memref<256x32xf32, #tpu.memory_space<vmem>>, vector<256x32xf32>
    %c0_1 = arith.constant 0 : index
    %c0_2 = arith.constant 0 : index
    %c0_3 = arith.constant 0 : index
    %1 = vector.load %arg3[%c0_1, %c0_2, %c0_3] : memref<2x32x32xf32, #tpu.memory_space<vmem>>, vector<1x32x32xf32>
    %2 = vector.shape_cast %1 : vector<1x32x32xf32> to vector<32x32xf32>
    %cst = arith.constant dense<0.000000e+00> : vector<256x32xf32>
    %3 = tpu.matmul %0, %2, %cst {dimension_numbers = #tpu.dot_dimension_numbers<[1], [0], [0], [1], [0, 0, 1, 1], [], []>} : vector<256x32xf32>, vector<32x32xf32>, vector<256x32xf32> -> vector<256x32xf32>
    %c0_4 = arith.constant 0 : index
    %c0_5 = arith.constant 0 : index
    %c0_6 = arith.constant 0 : index
    %4 = vector.load %arg4[%c0_4, %c0_5, %c0_6] : memref<2x1x32xf32, #tpu.memory_space<vmem>>, vector<1x1x32xf32>
    %5 = vector.shape_cast %4 : vector<1x1x32xf32> to vector<1x32xf32>
    %6 = vector.broadcast %5 : vector<1x32xf32> to vector<256x32xf32>
    %7 = arith.addf %3, %6 : vector<256x32xf32>
    %cst_7 = arith.constant 0.000000e+00 : f32
    %8 = vector.broadcast %cst_7 : f32 to vector<256x32xf32>
    %9 = arith.cmpf ogt, %7, %8 : vector<256x32xf32>
    %10 = math.exp %7 : vector<256x32xf32>
    %cst_8 = arith.constant 1.000000e+00 : f32
    %11 = vector.broadcast %cst_8 : f32 to vector<256x32xf32>
    %12 = arith.subf %10, %11 : vector<256x32xf32>
    %cst_9 = arith.constant 1.67326319 : f32
    %13 = vector.broadcast %cst_9 : f32 to vector<256x32xf32>
    %14 = arith.mulf %13, %12 : vector<256x32xf32>
    %15 = arith.select %9, %7, %14 : vector<256x32xi1>, vector<256x32xf32>
    %cst_10 = arith.constant 1.05070102 : f32
    %16 = vector.broadcast %cst_10 : f32 to vector<256x32xf32>
    %17 = arith.mulf %16, %15 : vector<256x32xf32>
    %c1 = arith.constant 1 : index
    %c0_11 = arith.constant 0 : index
    %c0_12 = arith.constant 0 : index
    %18 = vector.load %arg3[%c1, %c0_11, %c0_12] : memref<2x32x32xf32, #tpu.memory_space<vmem>>, vector<1x32x32xf32>
    %19 = vector.shape_cast %18 : vector<1x32x32xf32> to vector<32x32xf32>
    %cst_13 = arith.constant dense<0.000000e+00> : vector<256x32xf32>
    %20 = tpu.matmul %17, %19, %cst_13 {dimension_numbers = #tpu.dot_dimension_numbers<[1], [0], [0], [1], [0, 0, 1, 1], [], []>} : vector<256x32xf32>, vector<32x32xf32>, vector<256x32xf32> -> vector<256x32xf32>
    %c1_14 = arith.constant 1 : index
    %c0_15 = arith.constant 0 : index
    %c0_16 = arith.constant 0 : index
    %21 = vector.load %arg4[%c1_14, %c0_15, %c0_16] : memref<2x1x32xf32, #tpu.memory_space<vmem>>, vector<1x1x32xf32>
    %22 = vector.shape_cast %21 : vector<1x1x32xf32> to vector<1x32xf32>
    %23 = vector.broadcast %22 : vector<1x32xf32> to vector<256x32xf32>
    %24 = arith.addf %20, %23 : vector<256x32xf32>
    %25 = vector.shape_cast %24 : vector<256x32xf32> to vector<16x16x32xf32>
    %cst_17 = arith.constant dense<0xFF800000> : vector<16x32xf32>
    %26 = vector.multi_reduction <maximumf>, %25, %cst_17 [1] : vector<16x16x32xf32> to vector<16x32xf32>
    %27 = vector.shape_cast %26 : vector<16x32xf32> to vector<16x1x32xf32>
    %28 = vector.broadcast %27 : vector<16x1x32xf32> to vector<16x16x32xf32>
    %29 = arith.subf %25, %28 : vector<16x16x32xf32>
    %30 = math.exp %29 : vector<16x16x32xf32>
    %cst_18 = arith.constant dense<0.000000e+00> : vector<16x32xf32>
    %31 = vector.multi_reduction <add>, %30, %cst_18 [1] : vector<16x16x32xf32> to vector<16x32xf32>
    %32 = vector.shape_cast %31 : vector<16x32xf32> to vector<16x1x32xf32>
    %33 = tpu.reciprocal %32 {approx = true} : vector<16x1x32xf32> -> vector<16x1x32xf32>
    %34 = vector.broadcast %33 : vector<16x1x32xf32> to vector<16x16x32xf32>
    %35 = arith.mulf %30, %34 : vector<16x16x32xf32>
    %36 = vector.shape_cast %35 : vector<16x16x32xf32> to vector<256x32xf32>
    %cst_19 = arith.constant dense<0xFF800000> : vector<256xf32>
    %37 = vector.multi_reduction <maximumf>, %24, %cst_19 [1] : vector<256x32xf32> to vector<256xf32>
    %38 = vector.shape_cast %37 : vector<256xf32> to vector<256x1xf32>
    %39 = vector.broadcast %38 : vector<256x1xf32> to vector<256x32xf32>
    %40 = arith.subf %24, %39 : vector<256x32xf32>
    %41 = math.exp %40 : vector<256x32xf32>
    %cst_20 = arith.constant dense<0.000000e+00> : vector<256xf32>
    %42 = vector.multi_reduction <add>, %41, %cst_20 [1] : vector<256x32xf32> to vector<256xf32>
    %43 = vector.shape_cast %42 : vector<256xf32> to vector<256x1xf32>
    %44 = tpu.reciprocal %43 {approx = true} : vector<256x1xf32> -> vector<256x1xf32>
    %45 = vector.broadcast %44 : vector<256x1xf32> to vector<256x32xf32>
    %46 = arith.mulf %41, %45 : vector<256x32xf32>
    %cst_21 = arith.constant dense<0.000000e+00> : vector<256x256xf32>
    %47 = tpu.matmul %36, %46, %cst_21 {dimension_numbers = #tpu.dot_dimension_numbers<[1], [1], [0], [0], [0, 0, 1, 0], [], []>} : vector<256x32xf32>, vector<256x32xf32>, vector<256x256xf32> -> vector<256x256xf32>
    %c0_22 = arith.constant 0 : index
    %c0_23 = arith.constant 0 : index
    %48 = vector.load %arg5[%c0_22, %c0_23] : memref<256x256xf32, #tpu.memory_space<vmem>>, vector<256x256xf32>
    %49 = arith.mulf %47, %48 : vector<256x256xf32>
    %c0_24 = arith.constant 0 : index
    %c0_25 = arith.constant 0 : index
    %50 = vector.load %arg2[%c0_24, %c0_25] : memref<256x32xf32, #tpu.memory_space<vmem>>, vector<256x32xf32>
    %cst_26 = arith.constant dense<0.000000e+00> : vector<256x32xf32>
    %51 = tpu.matmul %49, %50, %cst_26 {dimension_numbers = #tpu.dot_dimension_numbers<[1], [0], [0], [1], [0, 0, 1, 1], [], []>} : vector<256x256xf32>, vector<256x32xf32>, vector<256x32xf32> -> vector<256x32xf32>
    %c0_27 = arith.constant 0 : index
    %c0_28 = arith.constant 0 : index
    %c0_29 = arith.constant 0 : index
    %52 = vector.load %arg3[%c0_27, %c0_28, %c0_29] : memref<2x32x32xf32, #tpu.memory_space<vmem>>, vector<1x32x32xf32>
    %53 = vector.shape_cast %52 : vector<1x32x32xf32> to vector<32x32xf32>
    %cst_30 = arith.constant dense<0.000000e+00> : vector<256x32xf32>
    %54 = tpu.matmul %51, %53, %cst_30 {dimension_numbers = #tpu.dot_dimension_numbers<[1], [0], [0], [1], [0, 0, 1, 1], [], []>} : vector<256x32xf32>, vector<32x32xf32>, vector<256x32xf32> -> vector<256x32xf32>
    %c0_31 = arith.constant 0 : index
    %c0_32 = arith.constant 0 : index
    %c0_33 = arith.constant 0 : index
    %55 = vector.load %arg4[%c0_31, %c0_32, %c0_33] : memref<2x1x32xf32, #tpu.memory_space<vmem>>, vector<1x1x32xf32>
    %56 = vector.shape_cast %55 : vector<1x1x32xf32> to vector<1x32xf32>
    %57 = vector.broadcast %56 : vector<1x32xf32> to vector<256x32xf32>
    %58 = arith.addf %54, %57 : vector<256x32xf32>
    %cst_34 = arith.constant 0.000000e+00 : f32
    %59 = vector.broadcast %cst_34 : f32 to vector<256x32xf32>
    %60 = arith.cmpf ogt, %58, %59 : vector<256x32xf32>
    %61 = math.exp %58 : vector<256x32xf32>
    %cst_35 = arith.constant 1.000000e+00 : f32
    %62 = vector.broadcast %cst_35 : f32 to vector<256x32xf32>
    %63 = arith.subf %61, %62 : vector<256x32xf32>
    %cst_36 = arith.constant 1.67326319 : f32
    %64 = vector.broadcast %cst_36 : f32 to vector<256x32xf32>
    %65 = arith.mulf %64, %63 : vector<256x32xf32>
    %66 = arith.select %60, %58, %65 : vector<256x32xi1>, vector<256x32xf32>
    %cst_37 = arith.constant 1.05070102 : f32
    %67 = vector.broadcast %cst_37 : f32 to vector<256x32xf32>
    %68 = arith.mulf %67, %66 : vector<256x32xf32>
    %c1_38 = arith.constant 1 : index
    %c0_39 = arith.constant 0 : index
    %c0_40 = arith.constant 0 : index
    %69 = vector.load %arg3[%c1_38, %c0_39, %c0_40] : memref<2x32x32xf32, #tpu.memory_space<vmem>>, vector<1x32x32xf32>
    %70 = vector.shape_cast %69 : vector<1x32x32xf32> to vector<32x32xf32>
    %cst_41 = arith.constant dense<0.000000e+00> : vector<256x32xf32>
    %71 = tpu.matmul %68, %70, %cst_41 {dimension_numbers = #tpu.dot_dimension_numbers<[1], [0], [0], [1], [0, 0, 1, 1], [], []>} : vector<256x32xf32>, vector<32x32xf32>, vector<256x32xf32> -> vector<256x32xf32>
    %c1_42 = arith.constant 1 : index
    %c0_43 = arith.constant 0 : index
    %c0_44 = arith.constant 0 : index
    %72 = vector.load %arg4[%c1_42, %c0_43, %c0_44] : memref<2x1x32xf32, #tpu.memory_space<vmem>>, vector<1x1x32xf32>
    %73 = vector.shape_cast %72 : vector<1x1x32xf32> to vector<1x32xf32>
    %74 = vector.broadcast %73 : vector<1x32xf32> to vector<256x32xf32>
    %75 = arith.addf %71, %74 : vector<256x32xf32>
    %76 = vector.shape_cast %75 : vector<256x32xf32> to vector<16x16x32xf32>
    %77 = arith.mulf %76, %76 : vector<16x16x32xf32>
    %cst_45 = arith.constant dense<0.000000e+00> : vector<16x32xf32>
    %78 = vector.multi_reduction <add>, %77, %cst_45 [1] : vector<16x16x32xf32> to vector<16x32xf32>
    %79 = vector.shape_cast %78 : vector<16x32xf32> to vector<16x1x32xf32>
    %cst_46 = arith.constant 1.000000e-24 : f32
    %80 = vector.broadcast %cst_46 : f32 to vector<16x1x32xf32>
    %81 = arith.maximumf %79, %80 : vector<16x1x32xf32>
    %82 = math.rsqrt %81 : vector<16x1x32xf32>
    %cst_47 = arith.constant 1.000000e-01 : f32
    %83 = vector.broadcast %cst_47 : f32 to vector<16x1x32xf32>
    %84 = arith.mulf %82, %83 : vector<16x1x32xf32>
    %85 = vector.broadcast %84 : vector<16x1x32xf32> to vector<16x16x32xf32>
    %86 = arith.mulf %76, %85 : vector<16x16x32xf32>
    %87 = vector.shape_cast %0 : vector<256x32xf32> to vector<16x16x32xf32>
    %88 = arith.addf %86, %87 : vector<16x16x32xf32>
    %89 = vector.shape_cast %88 : vector<16x16x32xf32> to vector<256x32xf32>
    %c0_48 = arith.constant 0 : index
    %c0_49 = arith.constant 0 : index
    %90 = vector.load %arg6[%c0_48, %c0_49] : memref<256x32xf32, #tpu.memory_space<vmem>>, vector<256x32xf32>
    tpu.vector_store %arg6[%c0_48, %c0_49], %89 {strides = array<i32>} : memref<256x32xf32, #tpu.memory_space<vmem>>, vector<256x32xf32>,
    return
  }
  func.func @transform_0(%arg0: i32) -> (i32, i32) {
    %c0_i32 = arith.constant 0 : i32
    %c0_i32_0 = arith.constant 0 : i32
    return %arg0, %c0_i32 : i32, i32
  }
  func.func @transform_1(%arg0: i32) -> (i32, i32) {
    %c0_i32 = arith.constant 0 : i32
    %c0_i32_0 = arith.constant 0 : i32
    return %arg0, %c0_i32 : i32, i32
  }
  func.func @transform_2(%arg0: i32) -> (i32, i32, i32) {
    %c0_i32 = arith.constant 0 : i32
    %c0_i32_0 = arith.constant 0 : i32
    %c0_i32_1 = arith.constant 0 : i32
    %c0_i32_2 = arith.constant 0 : i32
    return %c0_i32, %c0_i32_0, %c0_i32_1 : i32, i32, i32
  }
  func.func @transform_3(%arg0: i32) -> (i32, i32, i32) {
    %c0_i32 = arith.constant 0 : i32
    %c0_i32_0 = arith.constant 0 : i32
    %c0_i32_1 = arith.constant 0 : i32
    %c0_i32_2 = arith.constant 0 : i32
    return %c0_i32, %c0_i32_0, %c0_i32_1 : i32, i32, i32
  }
  func.func @transform_4(%arg0: i32) -> (i32, i32) {
    %c0_i32 = arith.constant 0 : i32
    %c0_i32_0 = arith.constant 0 : i32
    %c0_i32_1 = arith.constant 0 : i32
    return %c0_i32, %c0_i32_0 : i32, i32
  }
  func.func @transform_5(%arg0: i32) -> (i32, i32) {
    %c0_i32 = arith.constant 0 : i32
    %c0_i32_0 = arith.constant 0 : i32
    return %arg0, %c0_i32 : i32, i32
  }
}

</mosaic_0001>

<bundles_post_ra>
// kernel: tpu_custom_call.1
= control target key start
LH: loop header
LB: loop body
LE: loop exit
PB: predicated region body
PF: predicated region fallthrough
CT: control target
= control target key end

     0   :  { %s5347_s18 = smov 0   ;;  %s7174_s0 = inlined_call_operand.vmem [shape: f32[512,32], index: 0, kind: input, shape index: {}]   ;;  %s7175_s1 = inlined_call_operand.vmem [shape: f32[512,32], index: 1, kind: input, shape index: {}]   ;;  %s7176_s2 = inlined_call_operand.vmem [shape: f32[2,32,32], index: 2, kind: input, shape index: {}]   ;;  %s7177_s3 = inlined_call_operand.vmem [shape: f32[2,1,32], index: 3, kind: input, shape index: {}]   ;;  %s7178_s4 = inlined_call_operand.vmem [shape: f32[256,256], index: 4, kind: input, shape index: {}]   ;;  %s7179_s5 = inlined_call_operand.vmem [shape: f32[512,32], index: 5, kind: output, shape index: {}]  }
   0x1 LB: > { %s4013_s19 = sadd.s32 4294967295, %s5314_s18   ;;  %p4017_p0 = scmp.ge.s32.totalorder %s5314_s18, 1  ;;  %s5314_s18 = sphi %s5347_s18, %s15_s18  }
   0x2   : > { %p199_p1 = scmp.lt.s32.totalorder %s5314_s18, 3 }
   0x4   : > { %p200_p2 = pnand %p4017_p0, %p199_p1 }
   0x6   : > { %203 = sbr.rel (%p200_p2) target bundleno = 1938 (0x792), region = 40 }
   0xd   : > { %v282_v0 = vld [vmem:[%s7176_s2] sm:$0xff]  ;;  %v283_v1 = vld [vmem:[%s7176_s2 + $0x8] sm:$0xff]  ;;  %v284_v2 = vld [vmem:[%s7176_s2 + $0x10] sm:$0xff]  ;;  %s4018_s26 = sshll.u32 %s4013_s19, 5  ;;  %vm293_vm0 = vcmask 261120  }
   0xe   : > { %v5364_v3 = vpack.c.bf16 %v283_v1, %v282_v0  ;;  %v285_v4 = vld [vmem:[%s7176_s2 + $0x18] sm:$0xff]  ;;  %p233_p3 = scmp.lt.s32.totalorder %s4018_s26, 63  ;;  %v4089_v38 = vld [vmem:[%s7176_s2 + $0x20] sm:$0xff]  ;;  %v4090_v39 = vld [vmem:[%s7176_s2 + $0x28] sm:$0xff] }
   0xf   : > { %v5369_v5 = vpack.c.bf16 %v285_v4, %v284_v2  ;;  %v5453_v40 = vpack.c.bf16 %v4090_v39, %v4089_v38  ;;  %v4091_v41 = vld [vmem:[%s7176_s2 + $0x30] sm:$0xff]  ;;  %v4092_v42 = vld [vmem:[%s7176_s2 + $0x38] sm:$0xff]  ;;  %v5470_v44 = vld [vmem:[%s7177_s3] ss:$0 sm:$0xff] }
  0x10   : > { %7222 = vst [vmem:[#allocation2_spill] sm:$0xff] %v5364_v3  ;;  %4754 = vmatprep.subr.bf16.mxu0 %v5364_v3  ;;  %s7301_s26 = smov (!%p233_p3, %s4018_s26), 63  ;;  %v5463_v43 = vpack.c.bf16 %v4092_v42, %v4091_v41 }
  0x11   : > { %7223 = vst [vmem:[#allocation3_spill] sm:$0xff] %v5369_v5  ;;  %4756 = vmatpush3.bf16.msra.mxu0 %v5364_v3  ;;  %s5374_s29 = sshll.u32 %s7301_s26, 3  ;;  %7224 = vst [vmem:[#allocation4_spill] sm:$0xff] %v5453_v40  ;;  %4762 = vmatprep.subr.bf16.mxu1 %v5453_v40 }
  0x12   : > { %4758 = vmatprep.subr.bf16.mxu0 %v5369_v5  ;;  %s5380_s7 = scalar_lea.vmem %s7174_s0, %s5374_s29  ;;  %4764 = vmatpush3.bf16.msra.mxu1 %v5453_v40  ;;  %7225 = vst [vmem:[#allocation5_spill] sm:$0xff] %v5463_v43  ;;  %s6287_s23 = scalar_lea.vmem %s7175_s1, %s5374_s29 }
  0x13   : > { %v250_v6 = vld [vmem:[%s5380_s7] sm:$0xff]  ;;  %v251_v7 = vld [vmem:[%s5380_s7 + $0x8] sm:$0xff]  ;;  %v252_v8 = vld [vmem:[%s5380_s7 + $0x10] sm:$0xff]  ;;  %4766 = vmatprep.subr.bf16.mxu1 %v5463_v43  ;;  %s6909_s26 = scalar_lea.vmem %s7179_s5, %s5374_s29 }
  0x14   : > { %4537 = vmatprep.mubr.msk.f32.mxu0 %vm293_vm0, %v250_v6  ;;  %v253_v9 = vld [vmem:[%s5380_s7 + $0x18] sm:$0xff]  ;;  %v254_v10 = vld [vmem:[%s5380_s7 + $0x20] sm:$0xff]  ;;  %v255_v11 = vld [vmem:[%s5380_s7 + $0x28] sm:$0xff] }
  0x15   : > { %4760 = vmatpush3.bf16.msra.mxu0 %v5369_v5  ;;  %v256_v12 = vld [vmem:[%s5380_s7 + $0x30] sm:$0xff]  ;;  %v257_v13 = vld [vmem:[%s5380_s7 + $0x38] sm:$0xff]  ;;  %v258_v14 = vld [vmem:[%s5380_s7 + $0x40] sm:$0xff] }
  0x16   : > { %v259_v15 = vld [vmem:[%s5380_s7 + $0x48] sm:$0xff]  ;;  %v260_v16 = vld [vmem:[%s5380_s7 + $0x50] sm:$0xff]  ;;  %v261_v17 = vld [vmem:[%s5380_s7 + $0x58] sm:$0xff]  ;;  %4768 = vmatpush3.bf16.msra.mxu1 %v5463_v43 }
  0x17   : > { %v262_v18 = vld [vmem:[%s5380_s7 + $0x60] sm:$0xff]  ;;  %v263_v19 = vld [vmem:[%s5380_s7 + $0x68] sm:$0xff]  ;;  %v264_v20 = vld [vmem:[%s5380_s7 + $0x70] sm:$0xff] }
  0x18   : > { %4538 = vmatmul.mubr.msk.f32.vlgmr.msra.gmra.mrb[0].mxu0 %vm293_vm0, %v251_v7  ;;  %v265_v21 = vld [vmem:[%s5380_s7 + $0x78] sm:$0xff]  ;;  %v266_v22 = vld [vmem:[%s5380_s7 + $0x80] sm:$0xff]  ;;  %v267_v23 = vld [vmem:[%s5380_s7 + $0x88] sm:$0xff] }
  0x19   : > { %4540 = vmatprep.mubr.msk.f32.mxu0 %vm293_vm0, %v252_v8  ;;  %v268_v24 = vld [vmem:[%s5380_s7 + $0x90] sm:$0xff]  ;;  %v269_v25 = vld [vmem:[%s5380_s7 + $0x98] sm:$0xff]  ;;  %v270_v26 = vld [vmem:[%s5380_s7 + $0xa0] sm:$0xff] }
  0x1a   : > { %v271_v27 = vld [vmem:[%s5380_s7 + $0xa8] sm:$0xff]  ;;  %v272_v28 = vld [vmem:[%s5380_s7 + $0xb0] sm:$0xff]  ;;  %v273_v29 = vld [vmem:[%s5380_s7 + $0xb8] sm:$0xff] }
  0x1b   : > { %v274_v30 = vld [vmem:[%s5380_s7 + $0xc0] sm:$0xff]  ;;  %v275_v31 = vld [vmem:[%s5380_s7 + $0xc8] sm:$0xff]  ;;  %v276_v32 = vld [vmem:[%s5380_s7 + $0xd0] sm:$0xff] }
  0x1c   : > { %4541 = vmatmul.mubr.msk.f32.gmra.mrb[2].mxu0 %vm293_vm0, %v253_v9  ;;  %v277_v33 = vld [vmem:[%s5380_s7 + $0xd8] sm:$0xff]  ;;  %v278_v34 = vld [vmem:[%s5380_s7 + $0xe0] sm:$0xff]  ;;  %v279_v35 = vld [vmem:[%s5380_s7 + $0xe8] sm:$0xff] }
  0x1d   : > { %4543 = vmatprep.mubr.msk.f32.mxu0 %vm293_vm0, %v254_v10  ;;  %v280_v36 = vld [vmem:[%s5380_s7 + $0xf0] sm:$0xff]  ;;  %v281_v37 = vld [vmem:[%s5380_s7 + $0xf8] sm:$0xff] }
  0x20   : > { %4544 = vmatmul.mubr.msk.f32.gmra.mrb[4].mxu0 %vm293_vm0, %v255_v11 }
  0x21   : > { %4546 = vmatprep.mubr.msk.f32.mxu0 %vm293_vm0, %v256_v12 }
  0x24   : > { %4547 = vmatmul.mubr.msk.f32.gmra.mrb[6].mxu0 %vm293_vm0, %v257_v13 }
  0x25   : > { %4549 = vmatprep.mubr.msk.f32.mxu0 %vm293_vm0, %v258_v14 }
  0x28   : > { %4550 = vmatmul.mubr.msk.f32.gmra.mrb[8].mxu0 %vm293_vm0, %v259_v15 }
  0x29   : > { %4552 = vmatprep.mubr.msk.f32.mxu0 %vm293_vm0, %v260_v16 }
  0x2c   : > { %4553 = vmatmul.mubr.msk.f32.gmra.mrb[10].mxu0 %vm293_vm0, %v261_v17 }
  0x2d   : > { %4555 = vmatprep.mubr.msk.f32.mxu0 %vm293_vm0, %v262_v18 }
  0x30   : > { %4556 = vmatmul.mubr.msk.f32.gmra.mrb[12].mxu0 %vm293_vm0, %v263_v19 }
  0x31   : > { %4558 = vmatprep.mubr.msk.f32.mxu0 %vm293_vm0, %v264_v20 }
  0x34   : > { %4559 = vmatmul.mubr.msk.f32.gmra.mrb[14].mxu0 %vm293_vm0, %v265_v21 }
  0x35   : > { %4561 = vmatprep.mubr.msk.f32.mxu0 %vm293_vm0, %v266_v22 }
  0x38   : > { %4562 = vmatmul.mubr.msk.f32.gmra.mrb[16].mxu0 %vm293_vm0, %v267_v23 }
  0x39   : > { %4564 = vmatprep.mubr.msk.f32.mxu0 %vm293_vm0, %v268_v24 }
  0x3c   : > { %4565 = vmatmul.mubr.msk.f32.gmra.mrb[18].mxu0 %vm293_vm0, %v269_v25 }
  0x3d   : > { %4567 = vmatprep.mubr.msk.f32.mxu0 %vm293_vm0, %v270_v26 }
  0x40   : > { %4568 = vmatmul.mubr.msk.f32.gmra.mrb[20].mxu0 %vm293_vm0, %v271_v27 }
  0x41   : > { %4570 = vmatprep.mubr.msk.f32.mxu0 %vm293_vm0, %v272_v28 }
  0x44   : > { %4571 = vmatmul.mubr.msk.f32.gmra.mrb[22].mxu0 %vm293_vm0, %v273_v29 }
  0x45   : > { %4573 = vmatprep.mubr.msk.f32.mxu0 %vm293_vm0, %v274_v30 }
  0x48   : > { %4574 = vmatmul.mubr.msk.f32.gmra.mrb[24].mxu0 %vm293_vm0, %v275_v31 }
  0x49   : > { %4576 = vmatprep.mubr.msk.f32.mxu0 %vm293_vm0, %v276_v32 }
  0x4c   : > { %4577 = vmatmul.mubr.msk.f32.gmra.mrb[26].mxu0 %vm293_vm0, %v277_v33 }
  0x4d   : > { %4579 = vmatprep.mubr.msk.f32.mxu0 %vm293_vm0, %v278_v34 }
  0x50   : > { %4580 = vmatmul.mubr.msk.f32.gmra.mrb[28].mxu0 %vm293_vm0, %v279_v35 }
  0x51   : > { %4582 = vmatprep.mubr.msk.f32.mxu0 %vm293_vm0, %v280_v36 }
  0x54   : > { %4583 = vmatmul.mubr.msk.f32.gmra.mrb[30].mxu0 %vm293_vm0, %v281_v37 }
  0xeb   : > { %v4539_v45 = vpop.f32.mrb[0].mxu0 }
  0xec   : > { %v462_v46 = vadd.f32 %v4539_v45, %v5470_v44  ;;  %v456_v47 = vpop.f32.mrb[1].mxu0 }
  0xed   : > { %v5474_v48 = vadd.f32 %v5470_v44, %v456_v47 }
  0xee   : > { %v649_v49 = vmul.f32 1.442695, %v462_v46  ;;  %vm616_vm1 = vcmp.gt.f32.partialorder %v462_v46, 0.0 }
  0xef   : > { %v647_v50 = vmul.f32 1.442695, %v5474_v48  ;;  %v4542_v51 = vpop.f32.mrb[2].mxu0  ;;  %vm615_vm3 = vcmp.gt.f32.partialorder %v5474_v48, 0.0 }
  0xf0   : > { %4890 = vpow2.f32 %v649_v49  ;;  %v5478_v52 = vadd.f32 %v4542_v51, %v5470_v44  ;;  %v466_v53 = vpop.f32.mrb[3].mxu0 }
  0xf1   : > { %4892 = vpow2.f32 %v647_v50  ;;  %v467_v54 = vadd.f32 %v5470_v44, %v466_v53 }
  0xf2   : > { %v653_v55 = vmul.f32 1.442695, %v5478_v52  ;;  %vm618_vm4 = vcmp.gt.f32.partialorder %v5478_v52, 0.0 }
  0xf3   : > { %v651_v56 = vmul.f32 1.442695, %v467_v54  ;;  %v4545_v57 = vpop.f32.mrb[4].mxu0  ;;  %vm617_vm2 = vcmp.gt.f32.partialorder %v467_v54, 0.0 }
  0xf4   : > { %4894 = vpow2.f32 %v653_v55  ;;  %v5483_v58 = vadd.f32 %v4545_v57, %v5470_v44  ;;  %v476_v59 = vpop.f32.mrb[5].mxu0 }
  0xf5   : > { %4896 = vpow2.f32 %v651_v56  ;;  %v5486_v60 = vadd.f32 %v5470_v44, %v476_v59 }
  0xf6   : > { %v657_v61 = vmul.f32 1.442695, %v5483_v58  ;;  %vm620_vm6 = vcmp.gt.f32.partialorder %v5483_v58, 0.0 }
  0xf7   : > { %v655_v62 = vmul.f32 1.442695, %v5486_v60  ;;  %v4548_v63 = vpop.f32.mrb[6].mxu0  ;;  %vm619_vm5 = vcmp.gt.f32.partialorder %v5486_v60, 0.0 }
  0xf8   : > { %4898 = vpow2.f32 %v657_v61  ;;  %v5491_v0 = vadd.f32 %v4548_v63, %v5470_v44  ;;  %v486_v1 = vpop.f32.mrb[7].mxu0 }
  0xf9   : > { %4900 = vpow2.f32 %v655_v62  ;;  %v5494_v2 = vadd.f32 %v5470_v44, %v486_v1 }
  0xfa   : > { %v4891_v4 = vpop.eup %4890  ;;  %v661_v6 = vmul.f32 1.442695, %v5491_v0  ;;  %vm622_vm8 = vcmp.gt.f32.partialorder %v5491_v0, 0.0 }
  0xfb   : > { %v4893_v7 = vpop.eup %4892  ;;  %v4058_v8 = vadd.f32 -1.0, %v4891_v4  ;;  %v659_v9 = vmul.f32 1.442695, %v5494_v2  ;;  %v4551_v10 = vpop.f32.mrb[8].mxu0  ;;  %vm621_vm7 = vcmp.gt.f32.partialorder %v5494_v2, 0.0 }
  0xfc   : > { %4902 = vpow2.f32 %v661_v6  ;;  %v5499_v11 = vadd.f32 %v4551_v10, %v5470_v44  ;;  %v496_v12 = vpop.f32.mrb[9].mxu0  ;;  %v4057_v13 = vadd.f32 -1.0, %v4893_v7 }
  0xfd   : > { %4904 = vpow2.f32 %v659_v9  ;;  %v5502_v14 = vadd.f32 %v5470_v44, %v496_v12  ;;  %v744_v16 = vmul.f32 1.6732632, %v4058_v8 }
  0xfe   : > { %v4895_v15 = vpop.eup %4894  ;;  %v665_v17 = vmul.f32 1.442695, %v5499_v11  ;;  %v743_v22 = vmul.f32 1.6732632, %v4057_v13  ;;  %vm624_vm10 = vcmp.gt.f32.partialorder %v5499_v11, 0.0 }
  0xff   : > { %v4897_v18 = vpop.eup %4896  ;;  %v4060_v19 = vadd.f32 -1.0, %v4895_v15  ;;  %v663_v20 = vmul.f32 1.442695, %v5502_v14  ;;  %v4554_v21 = vpop.f32.mrb[10].mxu0  ;;  %v776_v31 = vsel %vm616_vm1, %v462_v46, %v744_v16  ;;  %vm623_vm9 = vcmp.gt.f32.partialorder %v5502_v14, 0.0 }
 0x100   : > { %v4059_v23 = vadd.f32 -1.0, %v4897_v18  ;;  %4906 = vpow2.f32 %v665_v17  ;;  %v5507_v24 = vadd.f32 %v4554_v21, %v5470_v44  ;;  %v506_v25 = vpop.f32.mrb[11].mxu0  ;;  %v775_v35 = vsel %vm615_vm3, %v5474_v48, %v743_v22 }
 0x101   : > { %4908 = vpow2.f32 %v663_v20  ;;  %v5510_v26 = vadd.f32 %v5470_v44, %v506_v25  ;;  %v746_v32 = vmul.f32 1.6732632, %v4060_v19  ;;  %v807_v47 = vmul.f32 1.050701, %v775_v35 }
 0x102   : > { %v4899_v27 = vpop.eup %4898  ;;  %v745_v28 = vmul.f32 1.6732632, %v4059_v23  ;;  %v669_v29 = vmul.f32 1.442695, %v5507_v24  ;;  %v808_v50 = vmul.f32 1.050701, %v776_v31 }
 0x103   : > { %v4901_v30 = vpop.eup %4900  ;;  %v667_v33 = vmul.f32 1.442695, %v5510_v26  ;;  %v4557_v34 = vpop.f32.mrb[12].mxu0  ;;  %v4062_v37 = vadd.f32 -1.0, %v4899_v27  ;;  %v778_v55 = vsel %vm618_vm4, %v5478_v52, %v746_v32  ;;  %4593 = vmatprep.mubr.msk.f32.mxu1 %vm293_vm0, %v807_v47  ;;  %vm625_vm11 = vcmp.gt.f32.partialorder %v5510_v26, 0.0 }
 0x104   : > { %v777_v36 = vsel %vm617_vm2, %v467_v54, %v745_v28  ;;  %v4061_v38 = vadd.f32 -1.0, %v4901_v30  ;;  %4910 = vpow2.f32 %v669_v29  ;;  %v516_v39 = vpop.f32.mrb[13].mxu0  ;;  %v5519_v41 = vadd.f32 %v4557_v34, %v5470_v44  ;;  %4594 = vmatmul.mubr.msk.f32.vlgmr.msra.gmra.mrb[0].mxu1 %vm293_vm0, %v808_v50 }
 0x105   : > { %4912 = vpow2.f32 %v667_v33  ;;  %v809_v45 = vmul.f32 1.050701, %v777_v36  ;;  %v5522_v49 = vadd.f32 %v5470_v44, %v516_v39  ;;  %v748_v56 = vmul.f32 1.6732632, %v4062_v37 }
 0x106   : > { %v4903_v42 = vpop.eup %4902  ;;  %v747_v46 = vmul.f32 1.6732632, %v4061_v38  ;;  %v673_v53 = vmul.f32 1.442695, %v5519_v41  ;;  %v810_v7 = vmul.f32 1.050701, %v778_v55 }
 0x107   : > { %v4905_v48 = vpop.eup %4904  ;;  %v4064_v51 = vadd.f32 -1.0, %v4903_v42  ;;  %v4560_v54 = vpop.f32.mrb[14].mxu0  ;;  %v671_v62 = vmul.f32 1.442695, %v5522_v49  ;;  %4596 = vmatprep.mubr.msk.f32.mxu1 %vm293_vm0, %v809_v45  ;;  %v780_v12 = vsel %vm620_vm6, %v5483_v58, %v748_v56  ;;  %vm626_vm12 = vcmp.gt.f32.partialorder %v5507_v24, 0.0 }
 0x108   : > { %v779_v57 = vsel %vm619_vm5, %v5486_v60, %v747_v46  ;;  %v4063_v59 = vadd.f32 -1.0, %v4905_v48  ;;  %v526_v61 = vpop.f32.mrb[15].mxu0  ;;  %4914 = vpow2.f32 %v673_v53  ;;  %v5533_v52 = vadd.f32 %v4560_v54, %v5470_v44  ;;  %4597 = vmatmul.mubr.msk.f32.gmra.mrb[2].mxu1 %vm293_vm0, %v810_v7 }
 0x109   : > { %v811_v1 = vmul.f32 1.050701, %v779_v57  ;;  %v5537_v60 = vadd.f32 %v5470_v44, %v526_v61  ;;  %v750_v8 = vmul.f32 1.6732632, %v4064_v51  ;;  %4916 = vpow2.f32 %v671_v62 }
 0x10a   : > { %v4907_v63 = vpop.eup %4906  ;;  %v749_v4 = vmul.f32 1.6732632, %v4063_v59  ;;  %v677_v17 = vmul.f32 1.442695, %v5533_v52  ;;  %v812_v23 = vmul.f32 1.050701, %v780_v12 }
 0x10b   : > { %v4909_v6 = vpop.eup %4908  ;;  %v4066_v9 = vadd.f32 -1.0, %v4907_v63  ;;  %v4563_v10 = vpop.f32.mrb[16].mxu0  ;;  %v675_v21 = vmul.f32 1.442695, %v5537_v60  ;;  %4599 = vmatprep.mubr.msk.f32.mxu1 %vm293_vm0, %v811_v1  ;;  %v782_v25 = vsel %vm622_vm8, %v5491_v0, %v750_v8  ;;  %vm628_vm13 = vcmp.gt.f32.partialorder %v5519_v41, 0.0 }
 0x10c   : > { %v781_v13 = vsel %vm621_vm7, %v5494_v2, %v749_v4  ;;  %v4065_v15 = vadd.f32 -1.0, %v4909_v6  ;;  %v536_v16 = vpop.f32.mrb[17].mxu0  ;;  %v5550_v18 = vadd.f32 %v4563_v10, %v5470_v44  ;;  %4918 = vpow2.f32 %v677_v17  ;;  %4600 = vmatmul.mubr.msk.f32.gmra.mrb[4].mxu1 %vm293_vm0, %v812_v23 }
 0x10d   : > { %v813_v20 = vmul.f32 1.050701, %v781_v13  ;;  %v5555_v2 = vadd.f32 %v5470_v44, %v536_v16  ;;  %v752_v27 = vmul.f32 1.6732632, %v4066_v9  ;;  %4920 = vpow2.f32 %v675_v21 }
 0x10e   : > { %v4911_v19 = vpop.eup %4910  ;;  %v751_v58 = vmul.f32 1.6732632, %v4065_v15  ;;  %v681_v33 = vmul.f32 1.442695, %v5550_v18  ;;  %v814_v38 = vmul.f32 1.050701, %v782_v25 }
 0x10f   : > { %v4913_v22 = vpop.eup %4912  ;;  %v4566_v28 = vpop.f32.mrb[18].mxu0  ;;  %v4068_v30 = vadd.f32 -1.0, %v4911_v19  ;;  %v679_v36 = vmul.f32 1.442695, %v5555_v2  ;;  %4602 = vmatprep.mubr.msk.f32.mxu1 %vm293_vm0, %v813_v20  ;;  %v784_v39 = vsel %vm624_vm10, %v5499_v11, %v752_v27  ;;  %vm627_vm14 = vcmp.gt.f32.partialorder %v5522_v49, 0.0 }
 0x110   : > { %v783_v29 = vsel %vm623_vm9, %v5502_v14, %v751_v58  ;;  %v4067_v31 = vadd.f32 -1.0, %v4913_v22  ;;  %v546_v32 = vpop.f32.mrb[19].mxu0  ;;  %v5566_v0 = vadd.f32 %v4566_v28, %v5470_v44  ;;  %4922 = vpow2.f32 %v681_v33  ;;  %4603 = vmatmul.mubr.msk.f32.gmra.mrb[6].mxu1 %vm293_vm0, %v814_v38 }
 0x111   : > { %v815_v34 = vmul.f32 1.050701, %v783_v29  ;;  %v5571_v14 = vadd.f32 %v5470_v44, %v546_v32  ;;  %v754_v46 = vmul.f32 1.6732632, %v4068_v30  ;;  %4924 = vpow2.f32 %v679_v36 }
 0x112   : > { %v753_v35 = vmul.f32 1.6732632, %v4067_v31  ;;  %v4915_v37 = vpop.eup %4914  ;;  %v685_v42 = vmul.f32 1.442695, %v5566_v0  ;;  %vm630_vm15 = vcmp.gt.f32.partialorder %v5533_v52, 0.0  ;;  %vm629_vm1 = vcmp.gt.f32.partialorder %v5537_v60, 0.0 }
 0x113   : > { %v4569_v45 = vpop.f32.mrb[20].mxu0  ;;  %v4070_v48 = vadd.f32 -1.0, %v4915_v37  ;;  %v4917_v51 = vpop.eup %4916  ;;  %v683_v53 = vmul.f32 1.442695, %v5571_v14  ;;  %4605 = vmatprep.mubr.msk.f32.mxu1 %vm293_vm0, %v815_v34  ;;  %v786_v61 = vsel %vm626_vm12, %v5507_v24, %v754_v46  ;;  %vm632_vm2 = vcmp.gt.f32.partialorder %v5550_v18, 0.0 }
 0x114   : > { %v785_v47 = vsel %vm625_vm11, %v5510_v26, %v753_v35  ;;  %v556_v50 = vpop.f32.mrb[21].mxu0  ;;  %4926 = vpow2.f32 %v685_v42  ;;  %v4069_v11 = vadd.f32 -1.0, %v4917_v51  ;;  %v5581_v55 = vadd.f32 %v4569_v45, %v5470_v44 }
 0x115   : > { %v817_v54 = vmul.f32 1.050701, %v785_v47  ;;  %v5585_v56 = vadd.f32 %v5470_v44, %v556_v50  ;;  %v816_v26 = vmul.f32 1.050701, %v784_v39  ;;  %v756_v57 = vmul.f32 1.6732632, %v4070_v48 }
 0x116   : > { %4928 = vpow2.f32 %v683_v53  ;;  %v755_v62 = vmul.f32 1.6732632, %v4069_v11  ;;  %v689_v63 = vmul.f32 1.442695, %v5581_v55  ;;  %v4919_v4 = vpop.eup %4918  ;;  %v818_v12 = vmul.f32 1.050701, %v786_v61 }
 0x117   : > { %v4572_v59 = vpop.f32.mrb[22].mxu0  ;;  %v687_v6 = vmul.f32 1.442695, %v5585_v56  ;;  %4606 = vmatmul.mubr.msk.f32.gmra.mrb[8].mxu1 %vm293_vm0, %v816_v26  ;;  %v4921_v8 = vpop.eup %4920  ;;  %v4072_v9 = vadd.f32 -1.0, %v4919_v4  ;;  %v788_v17 = vsel %vm628_vm13, %v5519_v41, %v756_v57  ;;  %vm631_vm3 = vcmp.gt.f32.partialorder %v5555_v2, 0.0 }
 0x118   : > { %v566_v1 = vpop.f32.mrb[23].mxu0  ;;  %v5596_v7 = vadd.f32 %v4572_v59, %v5470_v44  ;;  %v787_v24 = vsel %vm627_vm14, %v5522_v49, %v755_v62  ;;  %4930 = vpow2.f32 %v689_v63  ;;  %4608 = vmatprep.mubr.msk.f32.mxu1 %vm293_vm0, %v817_v54  ;;  %v4071_v15 = vadd.f32 -1.0, %v4921_v8 }
 0x119   : > { %v5601_v10 = vadd.f32 %v5470_v44, %v566_v1  ;;  %v819_v13 = vmul.f32 1.050701, %v787_v24  ;;  %4932 = vpow2.f32 %v687_v6  ;;  %v758_v19 = vmul.f32 1.6732632, %v4072_v9 }
 0x11a   : > { %v693_v49 = vmul.f32 1.442695, %v5596_v7  ;;  %v4923_v58 = vpop.eup %4922  ;;  %v757_v21 = vmul.f32 1.6732632, %v4071_v15  ;;  %v820_v29 = vmul.f32 1.050701, %v788_v17 }
 0x11b   : > { %v4575_v16 = vpop.f32.mrb[24].mxu0  ;;  %v691_v22 = vmul.f32 1.442695, %v5601_v10  ;;  %4609 = vmatmul.mubr.msk.f32.gmra.mrb[10].mxu1 %vm293_vm0, %v818_v12  ;;  %v4925_v27 = vpop.eup %4924  ;;  %v4074_v41 = vadd.f32 -1.0, %v4923_v58  ;;  %v790_v33 = vsel %vm630_vm15, %v5533_v52, %v758_v19  ;;  %vm634_vm4 = vcmp.gt.f32.partialorder %v5566_v0, 0.0 }
 0x11c   : > { %v576_v20 = vpop.f32.mrb[25].mxu0  ;;  %v5611_v23 = vadd.f32 %v4575_v16, %v5470_v44  ;;  %4934 = vpow2.f32 %v693_v49  ;;  %4611 = vmatprep.mubr.msk.f32.mxu1 %vm293_vm0, %v819_v13  ;;  %v789_v30 = vsel %vm629_vm1, %v5537_v60, %v757_v21  ;;  %v4073_v31 = vadd.f32 -1.0, %v4925_v27 }
 0x11d   : > { %v5614_v25 = vadd.f32 %v5470_v44, %v576_v20  ;;  %4936 = vpow2.f32 %v691_v22  ;;  %v821_v34 = vmul.f32 1.050701, %v789_v30  ;;  %v760_v35 = vmul.f32 1.6732632, %v4074_v41 }
 0x11e   : > { %v4927_v28 = vpop.eup %4926  ;;  %v759_v38 = vmul.f32 1.6732632, %v4073_v31  ;;  %v697_v39 = vmul.f32 1.442695, %v5611_v23  ;;  %vm633_vm5 = vcmp.gt.f32.partialorder %v5571_v14, 0.0  ;;  %vm636_vm6 = vcmp.gt.f32.partialorder %v5581_v55, 0.0 }
 0x11f   : > { %v4578_v32 = vpop.f32.mrb[26].mxu0  ;;  %v4076_v36 = vadd.f32 -1.0, %v4927_v28  ;;  %v695_v42 = vmul.f32 1.442695, %v5614_v25  ;;  %4612 = vmatmul.mubr.msk.f32.gmra.mrb[12].mxu1 %vm293_vm0, %v820_v29  ;;  %v792_v45 = vsel %vm632_vm2, %v5550_v18, %v760_v35  ;;  %v822_v47 = vmul.f32 1.050701, %v790_v33 }
 0x120   : > { %v4929_v37 = vpop.eup %4928  ;;  %v5629_v60 = vadd.f32 %v4578_v32, %v5470_v44  ;;  %4614 = vmatprep.mubr.msk.f32.mxu1 %vm293_vm0, %v821_v34  ;;  %v586_v46 = vpop.f32.mrb[27].mxu0  ;;  %v791_v48 = vsel %vm631_vm3, %v5555_v2, %v759_v38  ;;  %4938 = vpow2.f32 %v697_v39  ;;  %v824_v57 = vmul.f32 1.050701, %v792_v45  ;;  %vm6149_vm3 = vmpackc.low %vm293_vm0, %vm293_vm0 }
 0x121   : > { %v4075_v52 = vadd.f32 -1.0, %v4929_v37  ;;  %v762_v50 = vmul.f32 1.6732632, %v4076_v36  ;;  %v823_v54 = vmul.f32 1.050701, %v791_v48  ;;  %4940 = vpow2.f32 %v695_v42 }
 0x122   : > { %v4931_v53 = vpop.eup %4930  ;;  %v701_v61 = vmul.f32 1.442695, %v5629_v60  ;;  %v5643_v62 = vadd.f32 %v5470_v44, %v586_v46  ;;  %vm635_vm7 = vcmp.gt.f32.partialorder %v5585_v56, 0.0  ;;  %vm637_vm8 = vcmp.gt.f32.partialorder %v5601_v10, 0.0 }
 0x123   : > { %v4581_v51 = vpop.f32.mrb[28].mxu0  ;;  %v761_v11 = vmul.f32 1.6732632, %v4075_v52  ;;  %v4933_v26 = vpop.eup %4932  ;;  %v4078_v59 = vadd.f32 -1.0, %v4931_v53  ;;  %4615 = vmatmul.mubr.msk.f32.gmra.mrb[14].mxu1 %vm293_vm0, %v822_v47  ;;  %v794_v6 = vsel %vm634_vm4, %v5566_v0, %v762_v50  ;;  %vm638_vm9 = vcmp.gt.f32.partialorder %v5596_v7, 0.0 }
 0x124   : > { %v596_v18 = vpop.f32.mrb[29].mxu0  ;;  %v4077_v63 = vadd.f32 -1.0, %v4933_v26  ;;  %v5650_v1 = vadd.f32 %v4581_v51, %v5470_v44  ;;  %4617 = vmatprep.mubr.msk.f32.mxu1 %vm293_vm0, %v823_v54  ;;  %4942 = vpow2.f32 %v701_v61  ;;  %v699_v13 = vmul.f32 1.442695, %v5643_v62 }
 0x125   : > { %v793_v2 = vsel %vm633_vm5, %v5571_v14, %v761_v11  ;;  %v5654_v4 = vadd.f32 %v5470_v44, %v596_v18  ;;  %v764_v24 = vmul.f32 1.6732632, %v4078_v59  ;;  %v826_v49 = vmul.f32 1.050701, %v794_v6 }
 0x126   : > { %v825_v8 = vmul.f32 1.050701, %v793_v2  ;;  %v4935_v12 = vpop.eup %4934  ;;  %v763_v14 = vmul.f32 1.6732632, %v4077_v63  ;;  %v705_v17 = vmul.f32 1.442695, %v5650_v1  ;;  %4944 = vpow2.f32 %v699_v13 }
 0x127   : > { %v4584_v9 = vpop.f32.mrb[30].mxu0  ;;  %v4937_v15 = vpop.eup %4936  ;;  %v4080_v16 = vadd.f32 -1.0, %v4935_v12  ;;  %v703_v19 = vmul.f32 1.442695, %v5654_v4  ;;  %4618 = vmatmul.mubr.msk.f32.gmra.mrb[16].mxu1 %vm293_vm0, %v824_v57  ;;  %v796_v21 = vsel %vm636_vm6, %v5581_v55, %v764_v24  ;;  %vm640_vm10 = vcmp.gt.f32.partialorder %v5611_v23, 0.0 }
 0x128   : > { %v606_v0 = vpop.f32.mrb[31].mxu0  ;;  %v795_v20 = vsel %vm635_vm7, %v5585_v56, %v763_v14  ;;  %v4079_v58 = vadd.f32 -1.0, %v4937_v15  ;;  %4620 = vmatprep.mubr.msk.f32.mxu1 %vm293_vm0, %v825_v8  ;;  %4946 = vpow2.f32 %v705_v17  ;;  %v5671_v27 = vadd.f32 %v4584_v9, %v5470_v44 }
 0x129   : > { %v827_v22 = vmul.f32 1.050701, %v795_v20  ;;  %v766_v41 = vmul.f32 1.6732632, %v4080_v16  ;;  %4948 = vpow2.f32 %v703_v19  ;;  %v5674_v29 = vadd.f32 %v5470_v44, %v606_v0  ;;  %v5715_v16 = vld [vmem:[%s7177_s3 + $0x1] ss:$0 sm:$0xff] }
 0x12a   : > { %v765_v28 = vmul.f32 1.6732632, %v4079_v58  ;;  %v4939_v56 = vpop.eup %4938  ;;  %v709_v30 = vmul.f32 1.442695, %v5671_v27  ;;  %v828_v55 = vmul.f32 1.050701, %v796_v21 }
 0x12b   : > { %4621 = vmatmul.mubr.msk.f32.gmra.mrb[18].mxu1 %vm293_vm0, %v826_v49  ;;  %v4941_v31 = vpop.eup %4940  ;;  %v4082_v33 = vadd.f32 -1.0, %v4939_v56  ;;  %v707_v35 = vmul.f32 1.442695, %v5674_v29  ;;  %v798_v36 = vsel %vm638_vm9, %v5596_v7, %v766_v41  ;;  %vm639_vm11 = vcmp.gt.f32.partialorder %v5614_v25, 0.0 }
 0x12c   : > { %v797_v32 = vsel %vm637_vm8, %v5601_v10, %v765_v28  ;;  %4623 = vmatprep.mubr.msk.f32.mxu1 %vm293_vm0, %v827_v22  ;;  %v4081_v34 = vadd.f32 -1.0, %v4941_v31  ;;  %4950 = vpow2.f32 %v709_v30  ;;  %v830_v45 = vmul.f32 1.050701, %v798_v36 }
 0x12d   : > { %v829_v44 = vmul.f32 1.050701, %v797_v32  ;;  %v768_v37 = vmul.f32 1.6732632, %v4082_v33  ;;  %4952 = vpow2.f32 %v707_v35  ;;  %vm642_vm12 = vcmp.gt.f32.partialorder %v5629_v60, 0.0 }
 0x12e   : > { %v4943_v38 = vpop.eup %4942  ;;  %v767_v39 = vmul.f32 1.6732632, %v4081_v34  ;;  %vm641_vm13 = vcmp.gt.f32.partialorder %v5643_v62, 0.0  ;;  %vm644_vm14 = vcmp.gt.f32.partialorder %v5650_v1, 0.0  ;;  %vm643_vm15 = vcmp.gt.f32.partialorder %v5654_v4, 0.0 }
 0x12f   : > { %4624 = vmatmul.mubr.msk.f32.gmra.mrb[20].mxu1 %vm293_vm0, %v828_v55  ;;  %v800_v10 = vsel %vm640_vm10, %v5611_v23, %v768_v37  ;;  %v4084_v42 = vadd.f32 -1.0, %v4943_v38  ;;  %vm646_vm1 = vcmp.gt.f32.partialorder %v5671_v27, 0.0  ;;  %vm645_vm2 = vcmp.gt.f32.partialorder %v5674_v29, 0.0 }
 0x130   : > { %4626 = vmatprep.mubr.msk.f32.mxu1 %vm293_vm0, %v829_v44  ;;  %v799_v52 = vsel %vm639_vm11, %v5614_v25, %v767_v39  ;;  %v4945_v46 = vpop.eup %4944  ;;  %v832_v50 = vmul.f32 1.050701, %v800_v10 }
 0x131   : > { %v831_v7 = vmul.f32 1.050701, %v799_v52  ;;  %v770_v47 = vmul.f32 1.6732632, %v4084_v42  ;;  %v4083_v51 = vadd.f32 -1.0, %v4945_v46 }
 0x132   : > { %v4947_v48 = vpop.eup %4946 }
 0x133   : > { %4627 = vmatmul.mubr.msk.f32.gmra.mrb[22].mxu1 %vm293_vm0, %v830_v45  ;;  %v4949_v53 = vpop.eup %4948  ;;  %v802_v54 = vsel %vm642_vm12, %v5629_v60, %v770_v47  ;;  %v4086_v23 = vadd.f32 -1.0, %v4947_v48  ;;  %v769_v11 = vmul.f32 1.6732632, %v4083_v51 }
 0x134   : > { %4629 = vmatprep.mubr.msk.f32.mxu1 %vm293_vm0, %v831_v7  ;;  %v4085_v25 = vadd.f32 -1.0, %v4949_v53  ;;  %v834_v57 = vmul.f32 1.050701, %v802_v54 }
 0x135   : > { %v772_v18 = vmul.f32 1.6732632, %v4086_v23  ;;  %v801_v59 = vsel %vm641_vm13, %v5643_v62, %v769_v11 }
 0x136   : > { %v4951_v26 = vpop.eup %4950  ;;  %v771_v61 = vmul.f32 1.6732632, %v4085_v25  ;;  %v833_v60 = vmul.f32 1.050701, %v801_v59 }
 0x137   : > { %4630 = vmatmul.mubr.msk.f32.gmra.mrb[24].mxu1 %vm293_vm0, %v832_v50  ;;  %v804_v2 = vsel %vm644_vm14, %v5650_v1, %v772_v18  ;;  %v4088_v63 = vadd.f32 -1.0, %v4951_v26  ;;  %v4953_v6 = vpop.eup %4952 }
 0x138   : > { %v803_v8 = vsel %vm643_vm15, %v5654_v4, %v771_v61  ;;  %v4087_v12 = vadd.f32 -1.0, %v4953_v6  ;;  %4632 = vmatprep.mubr.msk.f32.mxu1 %vm293_vm0, %v833_v60  ;;  %v836_v14 = vmul.f32 1.050701, %v804_v2 }
 0x139   : > { %v835_v24 = vmul.f32 1.050701, %v803_v8  ;;  %v774_v9 = vmul.f32 1.6732632, %v4088_v63 }
 0x13a   : > { %v773_v13 = vmul.f32 1.6732632, %v4087_v12 }
 0x13b   : > { %4633 = vmatmul.mubr.msk.f32.gmra.mrb[26].mxu1 %vm293_vm0, %v834_v57  ;;  %v806_v62 = vsel %vm646_vm1, %v5671_v27, %v774_v9 }
 0x13c   : > { %4635 = vmatprep.mubr.msk.f32.mxu1 %vm293_vm0, %v835_v24  ;;  %v805_v1 = vsel %vm645_vm2, %v5674_v29, %v773_v13  ;;  %v838_v4 = vmul.f32 1.050701, %v806_v62 }
 0x13d   : > { %v837_v15 = vmul.f32 1.050701, %v805_v1 }
 0x13f   : > { %4636 = vmatmul.mubr.msk.f32.gmra.mrb[28].mxu1 %vm293_vm0, %v836_v14 }
 0x140   : > { %4638 = vmatprep.mubr.msk.f32.mxu1 %vm293_vm0, %v837_v15 }
 0x143   : > { %4639 = vmatmul.mubr.msk.f32.gmra.mrb[30].mxu1 %vm293_vm0, %v838_v4 }
 0x1d7   : > { %v4595_v17 = vpop.f32.mrb[0].mxu1 }
 0x1d8   : > { %v5718_v19 = vadd.f32 %v4595_v17, %v5715_v16  ;;  %v1014_v0 = vpop.f32.mrb[1].mxu1 }
 0x1d9   : > { %v5721_v49 = vadd.f32 %v5715_v16, %v1014_v0 }
 0x1da   : > { %v1174_v20 = vsel %vm293_vm0, %v5718_v19, -inf }
 0x1db   : > { %v4598_v58 = vpop.f32.mrb[2].mxu1  ;;  %v1173_v21 = vsel %vm293_vm0, %v5721_v49, -inf }
 0x1dc   : > { %v5728_v22 = vadd.f32 %v4598_v58, %v5715_v16  ;;  %v1024_v27 = vpop.f32.mrb[3].mxu1  ;;  %1605 = vmax.xlane.f32.xlu1 %v1173_v21  ;;  %v1175_v41 = vmax.f32 %v1173_v21, %v1174_v20 }
 0x1dd   : > { %v5731_v28 = vadd.f32 %v5715_v16, %v1024_v27 }
 0x1de   : > { %v1176_v29 = vrot.slane %v1175_v41, 4  ;;  %v5735_v56 = vsel %vm293_vm0, %v5728_v22, -inf }
 0x1df   : > { %v4601_v30 = vpop.f32.mrb[4].mxu1  ;;  %v5739_v31 = vsel %vm293_vm0, %v5731_v28, -inf }
 0x1e0   : > { %v5742_v55 = vadd.f32 %v4601_v30, %v5715_v16  ;;  %v1034_v32 = vpop.f32.mrb[5].mxu1  ;;  %1607 = vmax.xlane.f32.xlu1 %v1174_v20  ;;  %v1177_v33 = vmax.f32 %v1175_v41, %v1176_v29  ;;  %v5746_v44 = vmax.f32 %v5739_v31, %v5735_v56 }
 0x1e1   : > { %v5749_v34 = vadd.f32 %v5715_v16, %v1034_v32 }
 0x1e2   : > { %v1178_v35 = vrot.slane %v1177_v33, 2  ;;  %v5753_v36 = vsel %vm293_vm0, %v5742_v55, -inf }
 0x1e3   : > { %v4604_v37 = vpop.f32.mrb[6].mxu1  ;;  %v5757_v38 = vsel %vm293_vm0, %v5749_v34, -inf }
 0x1e4   : > { %v1179_v39 = vmax.f32 %v1177_v33, %v1178_v35  ;;  %v5760_v10 = vadd.f32 %v4604_v37, %v5715_v16  ;;  %v1044_v42 = vpop.f32.mrb[7].mxu1  ;;  %v5764_v45 = vmax.f32 %v5757_v38, %v5753_v36 }
 0x1e5   : > { %v5767_v52 = vadd.f32 %v5715_v16, %v1044_v42 }
 0x1e6   : > { %v1180_v46 = vrot.slane %v1179_v39, 1  ;;  %v5771_v7 = vsel %vm293_vm0, %v5760_v10, -inf }
 0x1e7   : > { %v5775_v48 = vsel %vm293_vm0, %v5767_v52, -inf }
 0x1e8   : > { %v1181_v50 = vmax.f32 %v1179_v39, %v1180_v46  ;;  %v5785_v23 = vmax.f32 %v5775_v48, %v5771_v7 }
 0x1ea   : > { %v4607_v47 = vpop.f32.mrb[8].mxu1  ;;  %v1317_v11 = vsub.f32 %v5721_v49, %v1181_v50  ;;  %v1318_v25 = vsub.f32 %v5718_v19, %v1181_v50 }
 0x1eb   : > { %v5778_v51 = vadd.f32 %v4607_v47, %v5715_v16  ;;  %v1054_v53 = vpop.f32.mrb[9].mxu1 }
 0x1ec   : > { %v5781_v54 = vadd.f32 %v5715_v16, %v1054_v53  ;;  %v1349_v59 = vmul.f32 1.442695, %v1317_v11  ;;  %v1351_v61 = vmul.f32 1.442695, %v1318_v25 }
 0x1ed   : > { %v5791_v26 = vsel %vm293_vm0, %v5778_v51, -inf }
 0x1ee   : > { %v4610_v18 = vpop.f32.mrb[10].mxu1  ;;  %v5795_v57 = vsel %vm293_vm0, %v5781_v54, -inf  ;;  %4954 = vpow2.f32 %v1349_v59 }
 0x1ef   : > { %v5798_v60 = vadd.f32 %v4610_v18, %v5715_v16  ;;  %v1064_v2 = vpop.f32.mrb[11].mxu1  ;;  %v5805_v6 = vmax.f32 %v5795_v57, %v5791_v26  ;;  %4956 = vpow2.f32 %v1351_v61 }
 0x1f0   : > { %v5801_v63 = vadd.f32 %v5715_v16, %v1064_v2 }
 0x1f1   : > { %v5809_v24 = vsel %vm293_vm0, %v5798_v60, -inf }
 0x1f2   : > { %v4613_v8 = vpop.f32.mrb[12].mxu1  ;;  %v5816_v14 = vsel %vm293_vm0, %v5801_v63, -inf }
 0x1f3   : > { %v5812_v9 = vadd.f32 %v4613_v8, %v5715_v16  ;;  %v1074_v12 = vpop.f32.mrb[13].mxu1  ;;  %v5823_v13 = vmax.f32 %v5816_v14, %v5809_v24 }
 0x1f4   : > { %v5819_v62 = vadd.f32 %v5715_v16, %v1074_v12 }
 0x1f5   : > { %7226 = vst [vmem:[#allocation6_spill] sm:$0xff] %v5812_v9  ;;  %v5829_v4 = vsel %vm293_vm0, %v5812_v9, -inf }
 0x1f6   : > { %v5825_v1 = vpop.f32.mrb[14].mxu1  ;;  %v5835_v17 = vsel %vm293_vm0, %v5819_v62, -inf }
 0x1f7   : > { %v5831_v15 = vpop.f32.mrb[15].mxu1  ;;  %v5839_v0 = vmax.f32 %v5835_v17, %v5829_v4 }
 0x1f8   : > { %v5841_v58 = vpop.eup %4954 }
 0x1f9   : > { %v5846_v41 = vpop.eup %4956  ;;  %v1413_v29 = vsel %vm293_vm0, %v5841_v58, 0.0 }
 0x1fa   : > { %v4619_v20 = vpop.f32.mrb[16].mxu1  ;;  %v1414_v32 = vsel %vm293_vm0, %v5846_v41, 0.0 }
 0x1fb   : > { %v5844_v21 = vadd.f32 %v4619_v20, %v5715_v16  ;;  %v1094_v27 = vpop.f32.mrb[17].mxu1  ;;  %v1415_v35 = vadd.f32 %v1414_v32, %v1413_v29 }
 0x1fc   : > { %v5851_v30 = vadd.f32 %v5715_v16, %v1094_v27 }
 0x1fd   : > { %7227 = vst [vmem:[#allocation7_spill] sm:$0xff] %v5844_v21  ;;  %v1246_v33 = vsel %vm293_vm0, %v5844_v21, -inf  ;;  %v1416_v50 = vrot.slane %v1415_v35, 4 }
 0x1fe   : > { %7228 = vst [vmem:[#allocation8_spill] sm:$0xff] %v5851_v30  ;;  %v4622_v37 = vpop.f32.mrb[18].mxu1  ;;  %v1245_v39 = vsel %vm293_vm0, %v5851_v30, -inf }
 0x1ff   : > { %v5860_v42 = vadd.f32 %v4622_v37, %v5715_v16  ;;  %v1104_v46 = vpop.f32.mrb[19].mxu1  ;;  %1637 = vmax.xlane.f32.xlu0 %v1245_v39  ;;  %v5862_v47 = vmax.f32 %v1245_v39, %v1246_v33  ;;  %v1417_v59 = vadd.f32 %v1416_v50, %v1415_v35 }
 0x200   : > { %v5865_v53 = vadd.f32 %v5715_v16, %v1104_v46 }
 0x201   : > { %7229 = vst [vmem:[#allocation9_spill] sm:$0xff] %v5860_v42  ;;  %v1255_v11 = vsel %vm293_vm0, %v5860_v42, -inf  ;;  %v1418_v20 = vrot.slane %v1417_v59, 2 }
 0x202   : > { %7230 = vst [vmem:[#allocation10_spill] sm:$0xff] %v5865_v53  ;;  %v4625_v25 = vpop.f32.mrb[20].mxu1  ;;  %1643 = vmax.xlane.f32.xlu1 %v1255_v11  ;;  %v1254_v18 = vsel %vm293_vm0, %v5865_v53, -inf }
 0x203   : > { %v5872_v61 = vadd.f32 %v4625_v25, %v5715_v16  ;;  %v1114_v2 = vpop.f32.mrb[21].mxu1  ;;  %1639 = vmax.xlane.f32.xlu0 %v1246_v33  ;;  %v5874_v8 = vmax.f32 %v1254_v18, %v1255_v11  ;;  %v1419_v35 = vadd.f32 %v1418_v20, %v1417_v59 }
 0x204   : > { %v5877_v12 = vadd.f32 %v5715_v16, %v1114_v2 }
 0x205   : > { %7231 = vst [vmem:[#allocation11_spill] sm:$0xff] %v5872_v61  ;;  %v1264_v27 = vsel %vm293_vm0, %v5872_v61, -inf  ;;  %v1420_v50 = vrot.slane %v1419_v35, 1 }
 0x206   : > { %7232 = vst [vmem:[#allocation12_spill] sm:$0xff] %v5877_v12  ;;  %v4628_v29 = vpop.f32.mrb[22].mxu1  ;;  %1611 = vmax.xlane.f32.xlu1 %v5735_v56  ;;  %v1263_v32 = vsel %vm293_vm0, %v5877_v12, -inf }
 0x207   : > { %v5885_v37 = vadd.f32 %v4628_v29, %v5715_v16  ;;  %v1124_v33 = vpop.f32.mrb[23].mxu1  ;;  %1641 = vmax.xlane.f32.xlu0 %v1254_v18  ;;  %v5887_v39 = vmax.f32 %v1263_v32, %v1264_v27  ;;  %v1421_v59 = vadd.f32 %v1420_v50, %v1419_v35 }
 0x208   : > { %v5890_v46 = vadd.f32 %v5715_v16, %v1124_v33 }
 0x209   : > { %7233 = vst [vmem:[#allocation13_spill] sm:$0xff] %v5885_v37  ;;  %7234 = vst [vmem:[#allocation14_spill] sm:$0xff] %v5887_v39  ;;  %v1273_v11 = vsel %vm293_vm0, %v5885_v37, -inf  ;;  %4958 = vrcp.f32 %v1421_v59 }
 0x20a   : > { %7235 = vst [vmem:[#allocation15_spill] sm:$0xff] %v5890_v46  ;;  %v4631_v25 = vpop.f32.mrb[24].mxu1  ;;  %1647 = vmax.xlane.f32.xlu1 %v1264_v27  ;;  %v1272_v56 = vsel %vm293_vm0, %v5890_v46, -inf }
 0x20b   : > { %v5897_v2 = vadd.f32 %v4631_v25, %v5715_v16  ;;  %v1134_v20 = vpop.f32.mrb[25].mxu1  ;;  %1609 = vmax.xlane.f32.xlu0 %v5739_v31  ;;  %v5903_v29 = vmax.f32 %v1272_v56, %v1273_v11 }
 0x20c   : > { %v5901_v18 = vadd.f32 %v5715_v16, %v1134_v20 }
 0x20d   : > { %7236 = vst [vmem:[#allocation16_spill] sm:$0xff] %v5897_v2  ;;  %7238 = vst [vmem:[#allocation18_spill] sm:$0xff] %v5903_v29  ;;  %v1282_v27 = vsel %vm293_vm0, %v5897_v2, -inf }
 0x20e   : > { %7237 = vst [vmem:[#allocation17_spill] sm:$0xff] %v5901_v18  ;;  %v4634_v33 = vpop.f32.mrb[26].mxu1  ;;  %1615 = vmax.xlane.f32.xlu1 %v5753_v36  ;;  %v1281_v35 = vsel %vm293_vm0, %v5901_v18, -inf }
 0x20f   : > { %v1144_v50 = vpop.f32.mrb[27].mxu1  ;;  %1645 = vmax.xlane.f32.xlu0 %v1263_v32  ;;  %v5910_v25 = vmax.f32 %v1281_v35, %v1282_v27  ;;  %v5913_v31 = vadd.f32 %v4634_v33, %v5715_v16 }
 0x210   : > { %v5916_v20 = vadd.f32 %v5715_v16, %v1144_v50 }
 0x211   : > { %7239 = vst [vmem:[#allocation19_spill] sm:$0xff] %v5910_v25  ;;  %7240 = vst [vmem:[#allocation20_spill] sm:$0xff] %v5913_v31  ;;  %v1291_v32 = vsel %vm293_vm0, %v5913_v31, -inf }
 0x212   : > { %7241 = vst [vmem:[#allocation21_spill] sm:$0xff] %v5916_v20  ;;  %v4637_v59 = vpop.f32.mrb[28].mxu1  ;;  %1651 = vmax.xlane.f32.xlu1 %v1273_v11  ;;  %v1290_v5 = vsel %vm293_vm0, %v5916_v20, -inf }
 0x213   : > { %v1154_v43 = vpop.f32.mrb[29].mxu1  ;;  %1613 = vmax.xlane.f32.xlu0 %v5757_v38  ;;  %v4959_v36 = vpop.eup %4958  ;;  %v5925_v33 = vadd.f32 %v4637_v59, %v5715_v16 }
 0x214   : > { %v5928_v11 = vmul.f32 %v4959_v36, %v5841_v58  ;;  %v5931_v38 = vadd.f32 %v5715_v16, %v1154_v43  ;;  %v5944_v58 = vadd.f32 %v5825_v1, %v5715_v16  ;;  %v5948_v43 = vadd.f32 %v5715_v16, %v5831_v15 }
 0x215   : > { %7242 = vst [vmem:[#allocation22_spill] sm:$0xff] %v5925_v33  ;;  %v1300_v59 = vsel %vm293_vm0, %v5925_v33, -inf }
 0x216   : > { %v4640_v40 = vpop.f32.mrb[30].mxu1  ;;  %1619 = vmax.xlane.f32.xlu1 %v5771_v7  ;;  %7243 = vst [vmem:[#allocation23_spill] sm:$0xff] %v5928_v11  ;;  %7244 = vst [vmem:[#allocation24_spill] sm:$0xff] %v5931_v38  ;;  %4393 = vmatprep.mubr.msk.f32.mxu0 %vm293_vm0, %v5928_v11  ;;  %v5935_v7 = vmax.f32 %v1290_v5, %v1291_v32  ;;  %v1236_v15 = vsel %vm293_vm0, %v5948_v43, -inf }
 0x217   : > { %v1164_v50 = vpop.f32.mrb[31].mxu1  ;;  %1649 = vmax.xlane.f32.xlu0 %v1272_v56  ;;  %v1299_v56 = vsel %vm293_vm0, %v5931_v38, -inf  ;;  %7246 = vst [vmem:[#allocation26_spill] sm:$0xff] %v5944_v58  ;;  %7247 = vst [vmem:[#allocation27_spill] sm:$0xff] %v5948_v43  ;;  %v5951_v11 = vadd.f32 %v4640_v40, %v5715_v16 }
 0x218   : > { %7245 = vst [vmem:[#allocation25_spill] sm:$0xff] %v5935_v7  ;;  %v1237_v7 = vsel %vm293_vm0, %v5944_v58, -inf }
 0x219   : > { %7248 = vst [vmem:[#allocation28_spill] sm:$0xff] %v5951_v11  ;;  %v1309_v1 = vsel %vm293_vm0, %v5951_v11, -inf }
 0x21a   : > { %1655 = vmax.xlane.f32.xlu1 %v1282_v27  ;;  %v5957_v27 = vadd.f32 %v5715_v16, %v1164_v50  ;;  %v5970_v16 = vmax.f32 %v1236_v15, %v1237_v7 }
 0x21b   : > { %1617 = vmax.xlane.f32.xlu0 %v5775_v48  ;;  %v5954_v48 = vmax.f32 %v1299_v56, %v1300_v59 }
 0x21c   : > { %7250 = vst [vmem:[#allocation30_spill] sm:$0xff] %v5957_v27  ;;  %v1308_v40 = vsel %vm293_vm0, %v5957_v27, -inf }
 0x21d   : > { %7249 = vst [vmem:[#allocation29_spill] sm:$0xff] %v5954_v48 }
 0x21e   : > { %1623 = vmax.xlane.f32.xlu1 %v5791_v26  ;;  %v5968_v26 = vmax.f32 %v1308_v40, %v1309_v1 }
 0x21f   : > { %1653 = vmax.xlane.f32.xlu0 %v1281_v35  ;;  %v5974_v35 = vmul.f32 %v4959_v36, %v5846_v41 }
 0x220   : > { %7251 = vst [vmem:[#allocation31_spill] sm:$0xff] %v5968_v26 }
 0x221   : > { %7252 = vst [vmem:[#allocation32_spill] sm:$0xff] %v5974_v35 }
 0x222   : > { %1659 = vmax.xlane.f32.xlu1 %v1291_v32 }
 0x223   : > { %1621 = vmax.xlane.f32.xlu0 %v5795_v57 }
 0x226   : > { %1627 = vmax.xlane.f32.xlu1 %v5809_v24 }
 0x227   : > { %1657 = vmax.xlane.f32.xlu0 %v1290_v5 }
 0x22a   : > { %1663 = vmax.xlane.f32.xlu1 %v1300_v59 }
 0x22b   : > { %1625 = vmax.xlane.f32.xlu0 %v5816_v14 }
 0x22e   : > { %1631 = vmax.xlane.f32.xlu1 %v5829_v4 }
 0x22f   : > { %1661 = vmax.xlane.f32.xlu0 %v1299_v56 }
 0x232   : > { %1667 = vmax.xlane.f32.xlu1 %v1309_v1 }
 0x233   : > { %1629 = vmax.xlane.f32.xlu0 %v5835_v17 }
 0x236   : > { %1635 = vmax.xlane.f32.xlu1 %v1237_v7 }
 0x237   : > { %1665 = vmax.xlane.f32.xlu0 %v1308_v40 }
 0x23b   : > { %1633 = vmax.xlane.f32.xlu0 %v1236_v15 }
 0x269   : > { %v1606_v57 = vpop.xlane.xlu1 %1605 }
 0x26a   : > { %v1669_v32 = vsub.f32 %v5721_v49, %v1606_v57 }
 0x26c   : > { %v1701_v5 = vmul.f32 1.442695, %v1669_v32 }
 0x26d   : > { %v1608_v24 = vpop.xlane.xlu1 %1607 }
 0x26e   : > { %v1670_v36 = vsub.f32 %v5718_v19, %v1608_v24 }
 0x270   : > { %v1703_v17 = vmul.f32 1.442695, %v1670_v36 }
 0x28c   : > { %v1638_v50 = vpop.xlane.xlu0 %1637 }
 0x28d   : > { %v1685_v41 = vsub.f32 %v5851_v30, %v1638_v50 }
 0x28f   : > { %v1733_v14 = vmul.f32 1.442695, %v1685_v41  ;;  %v1644_v59 = vpop.xlane.xlu1 %1643 }
 0x290   : > { %v1640_v4 = vpop.xlane.xlu0 %1639  ;;  %v1688_v7 = vsub.f32 %v5860_v42, %v1644_v59 }
 0x291   : > { %4960 = vpow2.f32 %v1733_v14  ;;  %v1686_v56 = vsub.f32 %v5844_v21, %v1640_v4 }
 0x292   : > { %4962 = vpow2.f32 %v1701_v5  ;;  %v1739_v57 = vmul.f32 1.442695, %v1688_v7 }
 0x293   : > { %v1735_v1 = vmul.f32 1.442695, %v1686_v56  ;;  %v1612_v15 = vpop.xlane.xlu1 %1611 }
 0x294   : > { %v1642_v49 = vpop.xlane.xlu0 %1641  ;;  %v1672_v19 = vsub.f32 %v5728_v22, %v1612_v15 }
 0x295   : > { %4964 = vpow2.f32 %v1735_v1  ;;  %v1687_v40 = vsub.f32 %v5865_v53, %v1642_v49 }
 0x296   : > { %4966 = vpow2.f32 %v1703_v17  ;;  %v1707_v36 = vmul.f32 1.442695, %v1672_v19 }
 0x297   : > { %v1737_v32 = vmul.f32 1.442695, %v1687_v40  ;;  %v1648_v24 = vpop.xlane.xlu1 %1647 }
 0x298   : > { %v1610_v50 = vpop.xlane.xlu0 %1609  ;;  %v1690_v14 = vsub.f32 %v5872_v61, %v1648_v24 }
 0x299   : > { %4968 = vpow2.f32 %v1737_v32  ;;  %v1671_v41 = vsub.f32 %v5731_v28, %v1610_v50 }
 0x29a   : > { %4970 = vpow2.f32 %v1739_v57  ;;  %v1743_v49 = vmul.f32 1.442695, %v1690_v14 }
 0x29b   : > { %v5987_v5 = vpop.eup %4960  ;;  %v1705_v59 = vmul.f32 1.442695, %v1671_v41  ;;  %v1616_v4 = vpop.xlane.xlu1 %1615 }
 0x29c   : > { %v1646_v56 = vpop.xlane.xlu0 %1645  ;;  %v1813_v17 = vsel %vm293_vm0, %v5987_v5, 0.0  ;;  %v5992_v7 = vpop.eup %4962  ;;  %v1674_v40 = vsub.f32 %v5742_v55, %v1616_v4 }
 0x29d   : > { %4972 = vpow2.f32 %v1705_v59  ;;  %v1689_v1 = vsub.f32 %v5877_v12, %v1646_v56  ;;  %1814 = vadd.xlane.f32.xlu0 %v1813_v17  ;;  %v1765_v50 = vsel %vm293_vm0, %v5992_v7, 0.0 }
 0x29e   : > { %4974 = vpow2.f32 %v1707_v36  ;;  %v1711_v14 = vmul.f32 1.442695, %v1674_v40 }
 0x29f   : > { %v5995_v15 = vpop.eup %4964  ;;  %v1741_v57 = vmul.f32 1.442695, %v1689_v1  ;;  %v1652_v19 = vpop.xlane.xlu1 %1651 }
 0x2a0   : > { %v1614_v32 = vpop.xlane.xlu0 %1613  ;;  %v1816_v24 = vsel %vm293_vm0, %v5995_v15, 0.0  ;;  %v6002_v41 = vpop.eup %4966  ;;  %v1692_v4 = vsub.f32 %v5885_v37, %v1652_v19 }
 0x2a1   : > { %4976 = vpow2.f32 %v1741_v57  ;;  %v1673_v59 = vsub.f32 %v5749_v34, %v1614_v32  ;;  %1817 = vadd.xlane.f32.xlu1 %v1816_v24  ;;  %1766 = vadd.xlane.f32.xlu0 %v1765_v50  ;;  %v1768_v48 = vsel %vm293_vm0, %v6002_v41, 0.0 }
 0x2a2   : > { %4978 = vpow2.f32 %v1743_v49  ;;  %v1747_v40 = vmul.f32 1.442695, %v1692_v4 }
 0x2a3   : > { %v6005_v36 = vpop.eup %4968  ;;  %v1709_v56 = vmul.f32 1.442695, %v1673_v59  ;;  %v1620_v17 = vpop.xlane.xlu1 %1619 }
 0x2a4   : > { %v1650_v1 = vpop.xlane.xlu0 %1649  ;;  %v1819_v26 = vsel %vm293_vm0, %v6005_v36, 0.0  ;;  %v6012_v57 = vpop.eup %4970  ;;  %v1676_v19 = vsub.f32 %v5760_v10, %v1620_v17 }
 0x2a5   : > { %4980 = vpow2.f32 %v1709_v56  ;;  %v1691_v32 = vsub.f32 %v5890_v46, %v1650_v1  ;;  %1820 = vadd.xlane.f32.xlu0 %v1819_v26  ;;  %1769 = vadd.xlane.f32.xlu1 %v1768_v48  ;;  %v1822_v61 = vsel %vm293_vm0, %v6012_v57, 0.0 }
 0x2a6   : > { %4982 = vpow2.f32 %v1711_v14  ;;  %v1715_v14 = vmul.f32 1.442695, %v1676_v19 }
 0x2a7   : > { %v6015_v49 = vpop.eup %4972  ;;  %v1745_v24 = vmul.f32 1.442695, %v1691_v32  ;;  %v1656_v50 = vpop.xlane.xlu1 %1655 }
 0x2a8   : > { %v1618_v59 = vpop.xlane.xlu0 %1617  ;;  %v1771_v37 = vsel %vm293_vm0, %v6015_v49, 0.0  ;;  %v6022_v56 = vpop.eup %4974  ;;  %v1694_v4 = vsub.f32 %v5897_v2, %v1656_v50 }
 0x2a9   : > { %4984 = vpow2.f32 %v1745_v24  ;;  %v1675_v48 = vsub.f32 %v5767_v52, %v1618_v59  ;;  %1772 = vadd.xlane.f32.xlu0 %v1771_v37  ;;  %1823 = vadd.xlane.f32.xlu1 %v1822_v61  ;;  %v1774_v12 = vsel %vm293_vm0, %v6022_v56, 0.0 }
 0x2aa   : > { %4986 = vpow2.f32 %v1747_v40  ;;  %v1751_v40 = vmul.f32 1.442695, %v1694_v4 }
 0x2ab   : > { %v6025_v26 = vpop.eup %4976  ;;  %v1713_v17 = vmul.f32 1.442695, %v1675_v48  ;;  %v1624_v1 = vpop.xlane.xlu1 %1623 }
 0x2ac   : > { %v1654_v32 = vpop.xlane.xlu0 %1653  ;;  %v1825_v46 = vsel %vm293_vm0, %v6025_v26, 0.0  ;;  %v6032_v24 = vpop.eup %4978  ;;  %v1678_v19 = vsub.f32 %v5778_v51, %v1624_v1 }
 0x2ad   : > { %4988 = vpow2.f32 %v1713_v17  ;;  %v1693_v61 = vsub.f32 %v5901_v18, %v1654_v32  ;;  %1826 = vadd.xlane.f32.xlu0 %v1825_v46  ;;  %1775 = vadd.xlane.f32.xlu1 %v1774_v12  ;;  %v1828_v35 = vsel %vm293_vm0, %v6032_v24, 0.0 }
 0x2ae   : > { %4990 = vpow2.f32 %v1715_v14  ;;  %v1719_v14 = vmul.f32 1.442695, %v1678_v19 }
 0x2af   : > { %v6035_v37 = vpop.eup %4980  ;;  %v1749_v50 = vmul.f32 1.442695, %v1693_v61  ;;  %v1660_v59 = vpop.xlane.xlu1 %1659 }
 0x2b0   : > { %v1622_v48 = vpop.xlane.xlu0 %1621  ;;  %v1777_v2 = vsel %vm293_vm0, %v6035_v37, 0.0  ;;  %v6042_v17 = vpop.eup %4982  ;;  %v1696_v4 = vsub.f32 %v5913_v31, %v1660_v59 }
 0x2b1   : > { %4992 = vpow2.f32 %v1749_v50  ;;  %v1677_v12 = vsub.f32 %v5781_v54, %v1622_v48  ;;  %1778 = vadd.xlane.f32.xlu0 %v1777_v2  ;;  %1829 = vadd.xlane.f32.xlu1 %v1828_v35  ;;  %v1780_v42 = vsel %vm293_vm0, %v6042_v17, 0.0 }
 0x2b2   : > { %4994 = vpow2.f32 %v1751_v40  ;;  %v1755_v40 = vmul.f32 1.442695, %v1696_v4 }
 0x2b3   : > { %v6045_v46 = vpop.eup %4984  ;;  %v1717_v1 = vmul.f32 1.442695, %v1677_v12  ;;  %v1628_v32 = vpop.xlane.xlu1 %1627 }
 0x2b4   : > { %v1658_v61 = vpop.xlane.xlu0 %1657  ;;  %v1831_v18 = vsel %vm293_vm0, %v6045_v46, 0.0  ;;  %v6052_v50 = vpop.eup %4986  ;;  %v1680_v19 = vsub.f32 %v5798_v60, %v1628_v32 }
 0x2b5   : > { %4996 = vpow2.f32 %v1717_v1  ;;  %v1695_v2 = vsub.f32 %v5916_v20, %v1658_v61  ;;  %1832 = vadd.xlane.f32.xlu0 %v1831_v18  ;;  %1781 = vadd.xlane.f32.xlu1 %v1780_v42  ;;  %v1834_v25 = vsel %vm293_vm0, %v6052_v50, 0.0 }
 0x2b6   : > { %4998 = vpow2.f32 %v1719_v14  ;;  %v1723_v14 = vmul.f32 1.442695, %v1680_v19 }
 0x2b7   : > { %v6055_v35 = vpop.eup %4988  ;;  %v1753_v59 = vmul.f32 1.442695, %v1695_v2  ;;  %v1664_v48 = vpop.xlane.xlu1 %1663 }
 0x2b8   : > { %v1626_v12 = vpop.xlane.xlu0 %1625  ;;  %v1783_v31 = vsel %vm293_vm0, %v6055_v35, 0.0  ;;  %v6062_v1 = vpop.eup %4990  ;;  %v1698_v4 = vsub.f32 %v5925_v33, %v1664_v48 }
 0x2b9   : > { %5000 = vpow2.f32 %v1753_v59  ;;  %v1679_v42 = vsub.f32 %v5801_v63, %v1626_v12  ;;  %1784 = vadd.xlane.f32.xlu0 %v1783_v31  ;;  %1835 = vadd.xlane.f32.xlu1 %v1834_v25  ;;  %v1786_v53 = vsel %vm293_vm0, %v6062_v1, 0.0 }
 0x2ba   : > { %5002 = vpow2.f32 %v1755_v40  ;;  %v1759_v40 = vmul.f32 1.442695, %v1698_v4 }
 0x2bb   : > { %v6065_v18 = vpop.eup %4992  ;;  %v1721_v32 = vmul.f32 1.442695, %v1679_v42  ;;  %v1632_v61 = vpop.xlane.xlu1 %1631 }
 0x2bc   : > { %v1662_v2 = vpop.xlane.xlu0 %1661  ;;  %v1837_v20 = vsel %vm293_vm0, %v6065_v18, 0.0  ;;  %v6072_v59 = vpop.eup %4994  ;;  %v1682_v19 = vsub.f32 %v5812_v9, %v1632_v61 }
 0x2bd   : > { %5004 = vpow2.f32 %v1721_v32  ;;  %v1697_v25 = vsub.f32 %v5931_v38, %v1662_v2  ;;  %1838 = vadd.xlane.f32.xlu0 %v1837_v20  ;;  %1787 = vadd.xlane.f32.xlu1 %v1786_v53  ;;  %v1840_v3 = vsel %vm293_vm0, %v6072_v59, 0.0 }
 0x2be   : > { %5006 = vpow2.f32 %v1723_v14  ;;  %v1727_v14 = vmul.f32 1.442695, %v1682_v19 }
 0x2bf   : > { %v6075_v31 = vpop.eup %4996  ;;  %v1757_v48 = vmul.f32 1.442695, %v1697_v25  ;;  %v1668_v12 = vpop.xlane.xlu1 %1667 }
 0x2c0   : > { %v1630_v42 = vpop.xlane.xlu0 %1629  ;;  %v1789_v33 = vsel %vm293_vm0, %v6075_v31, 0.0  ;;  %v6082_v32 = vpop.eup %4998  ;;  %v1700_v4 = vsub.f32 %v5951_v11, %v1668_v12 }
 0x2c1   : > { %5008 = vpow2.f32 %v1757_v48  ;;  %v1681_v53 = vsub.f32 %v5819_v62, %v1630_v42  ;;  %1790 = vadd.xlane.f32.xlu0 %v1789_v33  ;;  %1841 = vadd.xlane.f32.xlu1 %v1840_v3  ;;  %v1792_v21 = vsel %vm293_vm0, %v6082_v32, 0.0 }
 0x2c2   : > { %5010 = vpow2.f32 %v1759_v40  ;;  %v1763_v40 = vmul.f32 1.442695, %v1700_v4 }
 0x2c3   : > { %v6085_v20 = vpop.eup %5000  ;;  %v1725_v61 = vmul.f32 1.442695, %v1681_v53  ;;  %v1636_v2 = vpop.xlane.xlu1 %1635 }
 0x2c4   : > { %v1666_v25 = vpop.xlane.xlu0 %1665  ;;  %v1843_v38 = vsel %vm293_vm0, %v6085_v20, 0.0  ;;  %v6092_v48 = vpop.eup %5002  ;;  %v1684_v19 = vsub.f32 %v5944_v58, %v1636_v2 }
 0x2c5   : > { %5012 = vpow2.f32 %v1725_v61  ;;  %v1699_v3 = vsub.f32 %v5957_v27, %v1666_v25  ;;  %1844 = vadd.xlane.f32.xlu0 %v1843_v38  ;;  %1793 = vadd.xlane.f32.xlu1 %v1792_v21  ;;  %v1846_v11 = vsel %vm293_vm0, %v6092_v48, 0.0  ;;  %v1194_v27 = vrot.slane %v5764_v45, 4 }
 0x2c6   : > { %5014 = vpow2.f32 %v1727_v14  ;;  %v1731_v14 = vmul.f32 1.442695, %v1684_v19 }
 0x2c7   : > { %v6095_v33 = vpop.eup %5004  ;;  %v1761_v12 = vmul.f32 1.442695, %v1699_v3 }
 0x2c8   : > { %v1634_v42 = vpop.xlane.xlu0 %1633  ;;  %v1795_v53 = vsel %vm293_vm0, %v6095_v33, 0.0  ;;  %v6102_v30 = vpop.eup %5006 }
 0x2c9   : > { %5016 = vpow2.f32 %v1761_v12  ;;  %v1683_v38 = vsub.f32 %v5948_v43, %v1634_v42  ;;  %1796 = vadd.xlane.f32.xlu0 %v1795_v53  ;;  %1847 = vadd.xlane.f32.xlu1 %v1846_v11  ;;  %v1798_v2 = vsel %vm293_vm0, %v6102_v30, 0.0 }
 0x2ca   : > { %5018 = vpow2.f32 %v1763_v40 }
 0x2cb   : > { %v6105_v21 = vpop.eup %5008  ;;  %v1729_v4 = vmul.f32 1.442695, %v1683_v38 }
 0x2cc   : > { %v1849_v61 = vsel %vm293_vm0, %v6105_v21, 0.0  ;;  %v6111_v25 = vpop.eup %5010 }
 0x2cd   : > { %7253 = vst [vmem:[#allocation33_spill] sm:$0xff] %v6111_v25  ;;  %5020 = vpow2.f32 %v1729_v4  ;;  %1850 = vadd.xlane.f32.xlu0 %v1849_v61  ;;  %1799 = vadd.xlane.f32.xlu1 %v1798_v2  ;;  %v1852_v40 = vsel %vm293_vm0, %v6111_v25, 0.0 }
 0x2ce   : > { %5022 = vpow2.f32 %v1731_v14 }
 0x2cf   : > { %v6113_v3 = vpop.eup %5012 }
 0x2d0   : > { %7254 = vst [vmem:[#allocation34_spill] sm:$0xff] %v6113_v3  ;;  %v1801_v11 = vsel %vm293_vm0, %v6113_v3, 0.0  ;;  %v6119_v19 = vpop.eup %5014 }
 0x2d1   : > { %7255 = vst [vmem:[#allocation35_spill] sm:$0xff] %v6119_v19  ;;  %1802 = vadd.xlane.f32.xlu0 %v1801_v11  ;;  %1853 = vadd.xlane.f32.xlu1 %v1852_v40  ;;  %v1804_v53 = vsel %vm293_vm0, %v6119_v19, 0.0  ;;  %v1185_v40 = vrot.slane %v5746_v44, 4 }
 0x2d3   : > { %v6121_v12 = vpop.eup %5016 }
 0x2d4   : > { %7256 = vst [vmem:[#allocation36_spill] sm:$0xff] %v6121_v12  ;;  %v1855_v42 = vsel %vm293_vm0, %v6121_v12, 0.0  ;;  %v6127_v38 = vpop.eup %5018 }
 0x2d5   : > { %7257 = vst [vmem:[#allocation37_spill] sm:$0xff] %v6127_v38  ;;  %1856 = vadd.xlane.f32.xlu0 %v1855_v42  ;;  %1805 = vadd.xlane.f32.xlu1 %v1804_v53  ;;  %v1858_v61 = vsel %vm293_vm0, %v6127_v38, 0.0  ;;  %v1186_v53 = vmax.f32 %v5746_v44, %v1185_v40  ;;  %v1195_v38 = vmax.f32 %v5764_v45, %v1194_v27 }
 0x2d7   : > { %v6129_v14 = vpop.eup %5020  ;;  %v1187_v58 = vrot.slane %v1186_v53, 2 }
 0x2d8   : > { %7258 = vst [vmem:[#allocation38_spill] sm:$0xff] %v6129_v14  ;;  %v1807_v4 = vsel %vm293_vm0, %v6129_v14, 0.0  ;;  %v6135_v2 = vpop.eup %5022 }
 0x2d9   : > { %7259 = vst [vmem:[#allocation39_spill] sm:$0xff] %v6135_v2  ;;  %1808 = vadd.xlane.f32.xlu0 %v1807_v4  ;;  %1859 = vadd.xlane.f32.xlu1 %v1858_v61  ;;  %v1810_v11 = vsel %vm293_vm0, %v6135_v2, 0.0  ;;  %v1188_v12 = vmax.f32 %v1186_v53, %v1187_v58  ;;  %v1203_v2 = vrot.slane %v5785_v23, 4 }
 0x2db   : > { %v1189_v40 = vrot.slane %v1188_v12, 1  ;;  %v1204_v19 = vmax.f32 %v5785_v23, %v1203_v2  ;;  %v1212_v23 = vrot.slane %v5805_v6, 4 }
 0x2dd   : > { %1811 = vadd.xlane.f32.xlu1 %v1810_v11  ;;  %v1196_v11 = vrot.slane %v1195_v38, 2  ;;  %v1213_v3 = vmax.f32 %v5805_v6, %v1212_v23 }
 0x32a   : > { %v1815_v42 = vpop.xlane.xlu0 %1814 }
 0x32b   : > { %5024 = vrcp.f32 %v1815_v42  ;;  %v1197_v42 = vmax.f32 %v1195_v38, %v1196_v11  ;;  %v1205_v11 = vrot.slane %v1204_v19, 2 }
 0x32d   : > { %v1198_v38 = vrot.slane %v1197_v42, 1 }
 0x32e   : > { %v1767_v14 = vpop.xlane.xlu0 %1766  ;;  %v1818_v29 = vpop.xlane.xlu1 %1817 }
 0x32f   : > { %5026 = vrcp.f32 %v1818_v29 }
 0x330   : > { %5028 = vrcp.f32 %v1767_v14  ;;  %v1190_v14 = vmax.f32 %v1188_v12, %v1189_v40 }
 0x332   : > { %v1821_v4 = vpop.xlane.xlu0 %1820  ;;  %v1770_v61 = vpop.xlane.xlu1 %1769 }
 0x333   : > { %5030 = vrcp.f32 %v1770_v61 }
 0x334   : > { %5032 = vrcp.f32 %v1821_v4 }
 0x335   : > { %v5025_v39 = vpop.eup %5024 }
 0x336   : > { %v1773_v43 = vpop.xlane.xlu0 %1772  ;;  %v1824_v44 = vpop.xlane.xlu1 %1823  ;;  %v1909_v58 = vmul.f32 %v5025_v39, %v5987_v5  ;;  %v1319_v39 = vsub.f32 %v5731_v28, %v1190_v14 }
 0x337   : > { %5034 = vrcp.f32 %v1824_v44 }
 0x338   : > { %5036 = vrcp.f32 %v1773_v43  ;;  %v1353_v25 = vmul.f32 1.442695, %v1319_v39 }
 0x339   : > { %v5027_v29 = vpop.eup %5026 }
 0x33a   : > { %v1827_v45 = vpop.xlane.xlu0 %1826  ;;  %v1776_v27 = vpop.xlane.xlu1 %1775  ;;  %v1910_v53 = vmul.f32 %v5027_v29, %v5995_v15  ;;  %v1199_v29 = vmax.f32 %v1197_v42, %v1198_v38  ;;  %v1214_v42 = vrot.slane %v1213_v3, 2 }
 0x33b   : > { %v5029_v61 = vpop.eup %5028  ;;  %5038 = vrcp.f32 %v1776_v27  ;;  %v1206_v27 = vmax.f32 %v1204_v19, %v1205_v11 }
 0x33c   : > { %v4769_v43 = vpack.c.bf16 %v1910_v53, %v1909_v58  ;;  %5040 = vrcp.f32 %v1827_v45  ;;  %v1893_v5 = vmul.f32 %v5029_v61, %v5992_v7  ;;  %v1320_v45 = vsub.f32 %v5728_v22, %v1190_v14 }
 0x33d   : > { %v5031_v2 = vpop.eup %5030  ;;  %v1321_v19 = vsub.f32 %v5749_v34, %v1199_v29  ;;  %v1207_v6 = vrot.slane %v1206_v27, 1  ;;  %v1322_v34 = vsub.f32 %v5742_v55, %v1199_v29  ;;  %v1215_v39 = vmax.f32 %v1213_v3, %v1214_v42 }
 0x33e   : > { %v1779_v12 = vpop.xlane.xlu0 %1778  ;;  %v1830_v44 = vpop.xlane.xlu1 %1829  ;;  %v1894_v15 = vmul.f32 %v5031_v2, %v6002_v41  ;;  %4771 = vmatprep.subr.msk.bf16.mxu0 %vm6149_vm3, %v4769_v43  ;;  %v1355_v22 = vmul.f32 1.442695, %v1320_v45  ;;  %v1221_v43 = vrot.slane %v5823_v13, 4 }
 0x33f   : > { %v5033_v40 = vpop.eup %5032  ;;  %5042 = vrcp.f32 %v1830_v44  ;;  %v1208_v44 = vmax.f32 %v1206_v27, %v1207_v6  ;;  %v1359_v29 = vmul.f32 1.442695, %v1322_v34  ;;  %v1216_v27 = vrot.slane %v1215_v39, 1 }
 0x340   : > { %v4772_v58 = vpack.c.bf16 %v1894_v15, %v1893_v5  ;;  %5044 = vrcp.f32 %v1779_v12  ;;  %v1911_v7 = vmul.f32 %v5033_v40, %v6005_v36  ;;  %v1357_v12 = vmul.f32 1.442695, %v1321_v19 }
 0x341   : > { %v5035_v53 = vpop.eup %5034  ;;  %v1323_v3 = vsub.f32 %v5767_v52, %v1208_v44  ;;  %v1217_v19 = vmax.f32 %v1215_v39, %v1216_v27 }
 0x342   : > { %v1833_v9 = vpop.xlane.xlu0 %1832  ;;  %v1782_v28 = vpop.xlane.xlu1 %1781  ;;  %4774 = vmatpush3.bf16.xpose.msk.msra.mxu0 %vm6149_vm3, %v4772_v58  ;;  %v1912_v41 = vmul.f32 %v5035_v53, %v6012_v57 }
 0x343   : > { %v5037_v61 = vpop.eup %5036  ;;  %5046 = vrcp.f32 %v1782_v28  ;;  %v1361_v52 = vmul.f32 1.442695, %v1323_v3  ;;  %v1239_v3 = vrot.slane %v5970_v16, 4 }
 0x344   : > { %v4775_v38 = vpack.c.bf16 %v1912_v41, %v1911_v7  ;;  %5048 = vrcp.f32 %v1833_v9  ;;  %v1895_v2 = vmul.f32 %v5037_v61, %v6015_v49  ;;  %v1222_v49 = vmax.f32 %v5823_v13, %v1221_v43 }
 0x345   : > { %v5039_v11 = vpop.eup %5038  ;;  %5050 = vpow2.f32 %v1353_v25  ;;  %v1324_v13 = vsub.f32 %v5760_v10, %v1208_v44 }
 0x346   : > { %v1785_v14 = vpop.xlane.xlu0 %1784  ;;  %v1836_v23 = vpop.xlane.xlu1 %1835  ;;  %v1896_v36 = vmul.f32 %v5039_v11, %v6022_v56  ;;  %4777 = vmatprep.subr.msk.bf16.mxu0 %vm6149_vm3, %v4775_v38  ;;  %v1223_v7 = vrot.slane %v1222_v49, 2  ;;  %v1230_v38 = vrot.slane %v5839_v0, 4 }
 0x347   : > { %v5041_v57 = vpop.eup %5040  ;;  %5052 = vrcp.f32 %v1836_v23 }
 0x348   : > { %v4778_v9 = vpack.c.bf16 %v1896_v36, %v1895_v2  ;;  %5054 = vrcp.f32 %v1785_v14  ;;  %v1913_v56 = vmul.f32 %v5041_v57, %v6025_v26  ;;  %v1325_v2 = vsub.f32 %v5781_v54, %v1217_v19 }
 0x349   : > { %v5043_v5 = vpop.eup %5042  ;;  %5056 = vpow2.f32 %v1355_v22  ;;  %v1224_v22 = vmax.f32 %v1222_v49, %v1223_v7  ;;  %v1231_v34 = vmax.f32 %v5839_v0, %v1230_v38 }
 0x34a   : > { %v1839_v25 = vpop.xlane.xlu0 %1838  ;;  %v1788_v15 = vpop.xlane.xlu1 %1787  ;;  %4780 = vmatpush3.bf16.xpose.msk.msra.mxu0 %vm6149_vm3, %v4778_v9  ;;  %v1914_v40 = vmul.f32 %v5043_v5, %v6032_v24 }
 0x34b   : > { %v5045_v55 = vpop.eup %5044  ;;  %5058 = vrcp.f32 %v1788_v15  ;;  %v1365_v15 = vmul.f32 1.442695, %v1325_v2 }
 0x34c   : > { %5060 = vpow2.f32 %v1357_v12  ;;  %v4781_v58 = vpack.c.bf16 %v1914_v40, %v1913_v56  ;;  %v1897_v41 = vmul.f32 %v5045_v55, %v6035_v37  ;;  %v1363_v37 = vmul.f32 1.442695, %v1324_v13 }
 0x34d   : > { %v5047_v53 = vpop.eup %5046  ;;  %5062 = vrcp.f32 %v1839_v25  ;;  %v1326_v25 = vsub.f32 %v5778_v51, %v1217_v19  ;;  %v1232_v40 = vrot.slane %v1231_v34, 2  ;;  %v1240_v19 = vmax.f32 %v5970_v16, %v1239_v3 }
 0x34e   : > { %v1791_v45 = vpop.xlane.xlu0 %1790  ;;  %v1842_v28 = vpop.xlane.xlu1 %1841  ;;  %v1898_v26 = vmul.f32 %v5047_v53, %v6042_v17  ;;  %4783 = vmatprep.subr.msk.bf16.mxu0 %vm6149_vm3, %v4781_v58 }
 0x34f   : > { %v5049_v24 = vpop.eup %5048  ;;  %5064 = vrcp.f32 %v1842_v28  ;;  %v1233_v7 = vmax.f32 %v1231_v34, %v1232_v40 }
 0x350   : > { %v6183_v61 = vpop.eup %5050  ;;  %5066 = vpow2.f32 %v1359_v29  ;;  %v4784_v6 = vpack.c.bf16 %v1898_v26, %v1897_v41  ;;  %v1915_v17 = vmul.f32 %v5049_v24, %v6045_v46  ;;  %v1225_v46 = vrot.slane %v1224_v22, 1 }
 0x351   : > { %v5053_v42 = vpop.eup %5052  ;;  %5068 = vrcp.f32 %v1791_v45  ;;  %v1422_v54 = vsel %vm293_vm0, %v6183_v61, 0.0  ;;  %v1367_v45 = vmul.f32 1.442695, %v1326_v25 }
 0x352   : > { %v1845_v10 = vpop.xlane.xlu0 %1844  ;;  %v1794_v11 = vpop.xlane.xlu1 %1793  ;;  %4786 = vmatpush3.bf16.xpose.msk.msra.mxu0 %vm6149_vm3, %v4784_v6  ;;  %v1916_v14 = vmul.f32 %v5053_v42, %v6052_v50  ;;  %v1226_v29 = vmax.f32 %v1224_v22, %v1225_v46  ;;  %v1248_v42 = vrot.slane %v5862_v47, 4 }
 0x353   : > { %v5055_v23 = vpop.eup %5054  ;;  %5070 = vrcp.f32 %v1794_v11 }
 0x354   : > { %v6190_v43 = vpop.eup %5056  ;;  %5072 = vpow2.f32 %v1361_v52  ;;  %v4787_v36 = vpack.c.bf16 %v1916_v14, %v1915_v17  ;;  %v1899_v50 = vmul.f32 %v5055_v23, %v6055_v35  ;;  %v1327_v52 = vsub.f32 %v5801_v63, %v1226_v29 }
 0x355   : > { %v5059_v57 = vpop.eup %5058  ;;  %5074 = vrcp.f32 %v1845_v10  ;;  %v1423_v0 = vsel %vm293_vm0, %v6190_v43, 0.0  ;;  %v1241_v23 = vrot.slane %v1240_v19, 2 }
 0x356   : > { %v1797_v12 = vpop.xlane.xlu0 %1796  ;;  %v1848_v44 = vpop.xlane.xlu1 %1847  ;;  %5076 = vpow2.f32 %v1363_v37  ;;  %v1900_v9 = vmul.f32 %v5059_v57, %v6062_v1  ;;  %4789 = vmatprep.subr.msk.bf16.mxu0 %vm6149_vm3, %v4787_v36  ;;  %v1424_v53 = vadd.f32 %v1423_v0, %v1422_v54  ;;  %v1234_v37 = vrot.slane %v1233_v7, 1 }
 0x357   : > { %v6194_v39 = vpop.eup %5060  ;;  %5078 = vrcp.f32 %v1848_v44  ;;  %v1369_v14 = vmul.f32 1.442695, %v1327_v52  ;;  %v1249_v44 = vmax.f32 %v5862_v47, %v1248_v42  ;;  %v1242_v25 = vmax.f32 %v1240_v19, %v1241_v23 }
 0x358   : > { %v5063_v5 = vpop.eup %5062  ;;  %v4790_v49 = vpack.c.bf16 %v1900_v9, %v1899_v50  ;;  %5080 = vrcp.f32 %v1797_v12  ;;  %v1425_v38 = vrot.slane %v1424_v53, 4  ;;  %v1431_v11 = vsel %vm293_vm0, %v6194_v39, 0.0 }
 0x359   : > { %v5065_v56 = vpop.eup %5064  ;;  %v1917_v27 = vmul.f32 %v5063_v5, %v6065_v18  ;;  %v1235_v54 = vmax.f32 %v1233_v7, %v1234_v37  ;;  %v7263_v7 = vld [vmem:[#allocation6_spill] sm:$0xff] }
 0x35a   : > { %v1851_v35 = vpop.xlane.xlu0 %1850  ;;  %v1800_v1 = vpop.xlane.xlu1 %1799  ;;  %4792 = vmatpush3.bf16.xpose.msk.msra.mxu0 %vm6149_vm3, %v4790_v49  ;;  %v1918_v58 = vmul.f32 %v5065_v56, %v6072_v59  ;;  %v1426_v12 = vadd.f32 %v1425_v38, %v1424_v53 }
 0x35b   : > { %v6205_v55 = vpop.eup %5066  ;;  %5082 = vrcp.f32 %v1800_v1  ;;  %v1257_v1 = vrot.slane %v5874_v8, 4 }
 0x35c   : > { %v5069_v51 = vpop.eup %5068  ;;  %5084 = vpow2.f32 %v1365_v15  ;;  %v4793_v28 = vpack.c.bf16 %v1918_v58, %v1917_v27  ;;  %v1432_v63 = vsel %vm293_vm0, %v6205_v55, 0.0  ;;  %v1427_v40 = vrot.slane %v1426_v12, 2 }
 0x35d   : > { %v5071_v13 = vpop.eup %5070  ;;  %5086 = vrcp.f32 %v1851_v35  ;;  %v1901_v18 = vmul.f32 %v5069_v51, %v6075_v31  ;;  %v1433_v34 = vadd.f32 %v1432_v63, %v1431_v11  ;;  %v1250_v35 = vrot.slane %v1249_v44, 2  ;;  %v7264_v63 = vld [vmem:[#allocation34_spill] sm:$0xff] }
 0x35e   : > { %v1803_v41 = vpop.xlane.xlu0 %1802  ;;  %v1854_v26 = vpop.xlane.xlu1 %1853  ;;  %v1902_v59 = vmul.f32 %v5071_v13, %v6082_v32  ;;  %4795 = vmatprep.subr.msk.bf16.mxu0 %vm6149_vm3, %v4793_v28  ;;  %v1328_v32 = vsub.f32 %v5798_v60, %v1226_v29  ;;  %v1329_v58 = vsub.f32 %v5819_v62, %v1235_v54  ;;  %v1258_v62 = vmax.f32 %v5874_v8, %v1257_v1 }
 0x35f   : > { %v6212_v24 = vpop.eup %5072  ;;  %5088 = vrcp.f32 %v1854_v26  ;;  %v1434_v56 = vrot.slane %v1433_v34, 4  ;;  %v1428_v26 = vadd.f32 %v1427_v40, %v1426_v12  ;;  %v1251_v19 = vmax.f32 %v1249_v44, %v1250_v35 }
 0x360   : > { %v5075_v6 = vpop.eup %5074  ;;  %5090 = vpow2.f32 %v1367_v45  ;;  %v4796_v16 = vpack.c.bf16 %v1902_v59, %v1901_v18  ;;  %v1440_v60 = vsel %vm293_vm0, %v6212_v24, 0.0  ;;  %v1371_v5 = vmul.f32 1.442695, %v1328_v32  ;;  %v7262_v45 = vld [vmem:[#allocation33_spill] sm:$0xff] }
 0x361   : > { %v6221_v10 = vpop.eup %5076  ;;  %5092 = vrcp.f32 %v1803_v41  ;;  %v1919_v2 = vmul.f32 %v5075_v6, %v6085_v20  ;;  %v1330_v41 = vsub.f32 %v7263_v7, %v1235_v54  ;;  %v1435_v52 = vadd.f32 %v1434_v56, %v1433_v34  ;;  %v7269_v54 = vld [vmem:[#allocation37_spill] sm:$0xff] }
 0x362   : > { %v5079_v31 = vpop.eup %5078  ;;  %v1857_v22 = vpop.xlane.xlu0 %1856  ;;  %4798 = vmatpush3.bf16.xpose.msk.msra.mxu0 %vm6149_vm3, %v4796_v16  ;;  %v1441_v9 = vsel %vm293_vm0, %v6221_v10, 0.0  ;;  %v1373_v38 = vmul.f32 1.442695, %v1329_v58  ;;  %v1252_v23 = vrot.slane %v1251_v19, 1  ;;  %v7271_v58 = vld [vmem:[#allocation18_spill] sm:$0xff] }
 0x363   : > { %v1806_v17 = vpop.xlane.xlu1 %1805  ;;  %v1920_v36 = vmul.f32 %v5079_v31, %v6092_v48  ;;  %v5081_v57 = vpop.eup %5080  ;;  %v1442_v27 = vadd.f32 %v1441_v9, %v1440_v60  ;;  %v7265_v31 = vld [vmem:[#allocation35_spill] sm:$0xff]  ;;  %v1375_v8 = vmul.f32 1.442695, %v1330_v41  ;;  %v7268_v9 = vld [vmem:[#allocation36_spill] sm:$0xff] }
 0x364   : > { %5094 = vrcp.f32 %v1806_v17  ;;  %v1903_v15 = vmul.f32 %v5081_v57, %v6095_v33  ;;  %v1436_v17 = vrot.slane %v1435_v52, 2  ;;  %v1253_v35 = vmax.f32 %v1251_v19, %v1252_v23 }
 0x365   : > { %v4799_v46 = vpack.c.bf16 %v1920_v36, %v1919_v2  ;;  %v5083_v50 = vpop.eup %5082  ;;  %5096 = vrcp.f32 %v1857_v22  ;;  %v1443_v6 = vrot.slane %v1442_v27, 4  ;;  %v1429_v22 = vrot.slane %v1428_v26, 1  ;;  %v7266_v36 = vld [vmem:[#allocation14_spill] sm:$0xff] }
 0x366   : > { %v1809_v20 = vpop.xlane.xlu0 %1808  ;;  %v6237_v48 = vpop.eup %5084  ;;  %5098 = vpow2.f32 %v1369_v14  ;;  %v1904_v47 = vmul.f32 %v5083_v50, %v6102_v30  ;;  %v1243_v30 = vrot.slane %v1242_v25, 1  ;;  %v1259_v2 = vrot.slane %v1258_v62, 2 }
 0x367   : > { %v1860_v0 = vpop.xlane.xlu1 %1859  ;;  %4801 = vmatprep.subr.msk.bf16.mxu0 %vm6149_vm3, %v4799_v46  ;;  %v5087_v49 = vpop.eup %5086  ;;  %v1449_v42 = vsel %vm293_vm0, %v6237_v48, 0.0  ;;  %v1266_v57 = vrot.slane %v7266_v36, 4  ;;  %v7267_v46 = vld [vmem:[#allocation27_spill] sm:$0xff]  ;;  %v1437_v56 = vadd.f32 %v1436_v17, %v1435_v52 }
 0x368   : > { %5100 = vrcp.f32 %v1860_v0  ;;  %v4802_v29 = vpack.c.bf16 %v1904_v47, %v1903_v15  ;;  %v1921_v53 = vmul.f32 %v5087_v49, %v6105_v21  ;;  %v1244_v11 = vmax.f32 %v1242_v25, %v1243_v30  ;;  %v7270_v15 = vld [vmem:[#allocation26_spill] sm:$0xff] }
 0x369   : > { %5102 = vrcp.f32 %v1809_v20  ;;  %v5089_v3 = vpop.eup %5088  ;;  %v1444_v0 = vadd.f32 %v1443_v6, %v1442_v27  ;;  %v1430_v49 = vadd.f32 %v1429_v22, %v1428_v26  ;;  %v1260_v1 = vmax.f32 %v1258_v62, %v1259_v2  ;;  %v7273_v27 = vld [vmem:[#allocation39_spill] sm:$0xff] }
 0x36a   : > { %5104 = vpow2.f32 %v1371_v5  ;;  %v6245_v51 = vpop.eup %5090  ;;  %4804 = vmatpush3.bf16.xpose.msk.msra.mxu0 %vm6149_vm3, %v4802_v29  ;;  %v1922_v28 = vmul.f32 %v5089_v3, %v7262_v45  ;;  %v1331_v50 = vsub.f32 %v7267_v46, %v1244_v11  ;;  %v1332_v47 = vsub.f32 %v7270_v15, %v1244_v11 }
 0x36b   : > { %v1812_v33 = vpop.xlane.xlu1 %1811  ;;  %v5093_v13 = vpop.eup %5092  ;;  %v1450_v21 = vsel %vm293_vm0, %v6245_v51, 0.0  ;;  %v1267_v29 = vmax.f32 %v7266_v36, %v1266_v57  ;;  %v1445_v26 = vrot.slane %v1444_v0, 2  ;;  %v1438_v62 = vrot.slane %v1437_v56, 1  ;;  %v2502_v36 = vld [vmem:[%s6287_s23] sm:$0xff]  ;;  %v2503_v57 = vld [vmem:[%s6287_s23 + $0x8] sm:$0xff] }
 0x36c   : > { %5106 = vrcp.f32 %v1812_v33  ;;  %v4805_v18 = vpack.c.bf16 %v1922_v28, %v1921_v53  ;;  %v1905_v16 = vmul.f32 %v5093_v13, %v7264_v63  ;;  %v1451_v44 = vadd.f32 %v1450_v21, %v1449_v42  ;;  %v7272_v53 = vld [vmem:[#allocation38_spill] sm:$0xff] }
 0x36d   : > { %5108 = vpow2.f32 %v1373_v38  ;;  %v1275_v33 = vrot.slane %v7271_v58, 4  ;;  %v1377_v41 = vmul.f32 1.442695, %v1331_v50  ;;  %v1379_v52 = vmul.f32 1.442695, %v1332_v47  ;;  %v7275_v38 = vld [vmem:[#allocation7_spill] sm:$0xff] }
 0x36e   : > { %v5095_v59 = vpop.eup %5094  ;;  %4807 = vmatprep.subr.msk.bf16.mxu0 %vm6149_vm3, %v4805_v18  ;;  %5110 = vpow2.f32 %v1375_v8  ;;  %v1452_v30 = vrot.slane %v1451_v44, 4  ;;  %v7274_v18 = vld [vmem:[#allocation8_spill] sm:$0xff]  ;;  %v1261_v6 = vrot.slane %v1260_v1, 1  ;;  %v1268_v42 = vrot.slane %v1267_v29, 2  ;;  %v7276_v8 = vld [vmem:[#allocation2_spill] sm:$0xff]  ;;  %v2505_v50 = vld [vmem:[%s6287_s23 + $0x18] sm:$0xff] }
 0x36f   : > { %v1906_v32 = vmul.f32 %v5095_v59, %v7265_v31  ;;  %v5097_v37 = vpop.eup %5096  ;;  %5112 = vrcp.f32 %v1430_v49  ;;  %v1333_v59 = vsub.f32 %v7274_v18, %v1253_v35  ;;  %v1334_v21 = vsub.f32 %v7275_v38, %v1253_v35  ;;  %v7277_v47 = vld [vmem:[#allocation10_spill] sm:$0xff] }
 0x370   : > { %v6261_v14 = vpop.eup %5098  ;;  %v1923_v5 = vmul.f32 %v5097_v37, %v7268_v9  ;;  %v1276_v11 = vmax.f32 %v7271_v58, %v1275_v33  ;;  %5114 = vpow2.f32 %v1377_v41  ;;  %v1439_v31 = vadd.f32 %v1438_v62, %v1437_v56  ;;  %v7280_v58 = vld [vmem:[#allocation9_spill] sm:$0xff] }
 0x371   : > { %v4808_v34 = vpack.c.bf16 %v1906_v32, %v1905_v16  ;;  %v1458_v13 = vsel %vm293_vm0, %v6261_v14, 0.0  ;;  %5116 = vpow2.f32 %v1379_v52  ;;  %v1446_v32 = vadd.f32 %v1445_v26, %v1444_v0 }
 0x372   : > { %v5101_v12 = vpop.eup %5100  ;;  %v1453_v37 = vadd.f32 %v1452_v30, %v1451_v44  ;;  %v1381_v17 = vmul.f32 1.442695, %v1333_v59  ;;  %v1262_v23 = vmax.f32 %v1260_v1, %v1261_v6  ;;  %v1269_v2 = vmax.f32 %v1267_v29, %v1268_v42  ;;  %v7279_v1 = vld [vmem:[#allocation23_spill] sm:$0xff]  ;;  %v2506_v29 = vld [vmem:[%s6287_s23 + $0x20] sm:$0xff]  ;;  %v2508_v6 = vld [vmem:[%s6287_s23 + $0x30] sm:$0xff] }
 0x373   : > { %v5103_v60 = vpop.eup %5102  ;;  %4810 = vmatpush3.bf16.xpose.msk.msra.mxu0 %vm6149_vm3, %v4808_v34  ;;  %v1924_v20 = vmul.f32 %v5101_v12, %v7269_v54  ;;  %v2504_v34 = vld [vmem:[%s6287_s23 + $0x10] sm:$0xff]  ;;  %v1383_v12 = vmul.f32 1.442695, %v1334_v21  ;;  %v1277_v4 = vrot.slane %v1276_v11, 2  ;;  %v4818_v46 = vpack.c.bf16 %v2503_v57, %v2502_v36  ;;  %v2509_v42 = vld [vmem:[%s6287_s23 + $0x38] sm:$0xff] }
 0x374   : > { %v6269_v25 = vpop.eup %5104  ;;  %v1907_v45 = vmul.f32 %v5103_v60, %v7272_v53  ;;  %v5316_v60 = vmov 0.0|0.0   ;;  %5118 = vrcp.f32 %v1439_v31  ;;  %v1447_v44 = vrot.slane %v1446_v32, 1  ;;  %v7281_v53 = vld [vmem:[#allocation32_spill] sm:$0xff]  ;;  %v7284_v57 = vld [vmem:[#allocation25_spill] sm:$0xff] }
 0x375   : > { %v4811_v3 = vpack.c.bf16 %v1924_v20, %v1923_v5  ;;  %v1459_v7 = vsel %vm293_vm0, %v6269_v25, 0.0  ;;  %4817 = vmatprep.subr.bf16.mxu1 %v5316_v60  ;;  %v1454_v5 = vrot.slane %v1453_v37, 2  ;;  %v4821_v0 = vpack.c.bf16 %v2505_v50, %v2504_v34 }
 0x376   : > { %v5107_v40 = vpop.eup %5106  ;;  %v1460_v63 = vadd.f32 %v1459_v7, %v1458_v13  ;;  %4819 = vmatpush1.bf16.msra.mxu1 %v4818_v46  ;;  %5120 = vpow2.f32 %v1381_v17  ;;  %v1335_v49 = vsub.f32 %v7277_v47, %v1262_v23  ;;  %v1270_v56 = vrot.slane %v1269_v2, 1  ;;  %v7282_v7 = vld [vmem:[#allocation3_spill] sm:$0xff] }
 0x377   : > { %v1908_v28 = vmul.f32 %v5107_v40, %v7273_v27  ;;  %4813 = vmatprep.subr.msk.bf16.mxu0 %vm6149_vm3, %v4811_v3  ;;  %v6293_v16 = vpop.eup %5108  ;;  %v7278_v40 = vld [vmem:[#allocation19_spill] sm:$0xff]  ;;  %4820 = vmatprep.subr.bf16.mxu1 %v5316_v60  ;;  %5122 = vpow2.f32 %v1383_v12  ;;  %v1336_v33 = vsub.f32 %v7280_v58, %v1262_v23  ;;  %v1278_v30 = vmax.f32 %v1276_v11, %v1277_v4  ;;  %v7283_v23 = vld [vmem:[#allocation12_spill] sm:$0xff]  ;;  %v2510_v12 = vld [vmem:[%s6287_s23 + $0x40] sm:$0xff] }
 0x378   : > { %v6296_v22 = vpop.eup %5110  ;;  %v1461_v9 = vrot.slane %v1460_v63, 4  ;;  %v1467_v54 = vsel %vm293_vm0, %v6293_v16, 0.0  ;;  %v1284_v35 = vrot.slane %v7278_v40, 4  ;;  %v2507_v3 = vld [vmem:[%s6287_s23 + $0x28] sm:$0xff]  ;;  %v1448_v27 = vadd.f32 %v1447_v44, %v1446_v32 }
 0x379   : > { %v4814_v19 = vpack.c.bf16 %v1908_v28, %v1907_v45  ;;  %v1468_v20 = vsel %vm293_vm0, %v6296_v22, 0.0  ;;  %v5113_v15 = vpop.eup %5112  ;;  %v1455_v28 = vadd.f32 %v1454_v5, %v1453_v37  ;;  %v4824_v52 = vpack.c.bf16 %v2507_v3, %v2506_v29  ;;  %v2511_v4 = vld [vmem:[%s6287_s23 + $0x48] sm:$0xff] }
 0x37a   : > { %v1469_v45 = vadd.f32 %v1468_v20, %v1467_v54  ;;  %v1462_v13 = vadd.f32 %v1461_v9, %v1460_v63  ;;  %v6319_v41 = vpop.eup %5114  ;;  %v1575_v26 = vmul.f32 %v5113_v15, %v6183_v61  ;;  %4822 = vmatpush1.bf16.msra.mxu1 %v4821_v0  ;;  %v1385_v62 = vmul.f32 1.442695, %v1335_v49  ;;  %v7285_v46 = vld [vmem:[#allocation11_spill] sm:$0xff] }
 0x37b   : > { %4816 = vmatpush3.bf16.xpose.msk.msra.mxu0 %vm6149_vm3, %v4814_v19  ;;  %v6322_v19 = vpop.eup %5116  ;;  %v1271_v18 = vmax.f32 %v1269_v2, %v1270_v56  ;;  %v1285_v59 = vmax.f32 %v7278_v40, %v1284_v35  ;;  %4823 = vmatprep.subr.bf16.mxu1 %v5316_v60  ;;  %v1387_v38 = vmul.f32 1.442695, %v1336_v33  ;;  %v1279_v21 = vrot.slane %v1278_v30, 1  ;;  %v2512_v35 = vld [vmem:[%s6287_s23 + $0x50] sm:$0xff]  ;;  %v7286_v3 = vld [vmem:[#allocation15_spill] sm:$0xff] }
 0x37c   : > { %4866 = vmatprep.subr.bf16.mxu0 %v7276_v8  ;;  %v1470_v61 = vrot.slane %v1469_v45, 4  ;;  %5124 = vrcp.f32 %v1448_v27  ;;  %v1456_v11 = vrot.slane %v1455_v28, 1  ;;  %v1463_v63 = vrot.slane %v1462_v13, 2 }
 0x37d   : > { %v1476_v31 = vsel %vm293_vm0, %v6319_v41, 0.0  ;;  %v1477_v32 = vsel %vm293_vm0, %v6322_v19, 0.0  ;;  %v1576_v37 = vmul.f32 %v5113_v15, %v6190_v43  ;;  %5126 = vpow2.f32 %v1385_v62 }
 0x37e   : > { %4825 = vmatpush1.bf16.msra.mxu1 %v4824_v52  ;;  %v5119_v17 = vpop.eup %5118  ;;  %v1337_v2 = vsub.f32 %v7283_v23, %v1271_v18  ;;  %v1286_v36 = vrot.slane %v1285_v59, 2  ;;  %v1293_v34 = vrot.slane %v7284_v57, 4  ;;  %5128 = vpow2.f32 %v1387_v38 }
 0x37f   : > { %4826 = vmatprep.subr.bf16.mxu1 %v5316_v60  ;;  %v1338_v50 = vsub.f32 %v7285_v46, %v1271_v18  ;;  %v1280_v9 = vmax.f32 %v1278_v30, %v1279_v21  ;;  %v1478_v44 = vadd.f32 %v1477_v32, %v1476_v31  ;;  %v1457_v5 = vadd.f32 %v1456_v11, %v1455_v28  ;;  %v2514_v18 = vld [vmem:[%s6287_s23 + $0x60] sm:$0xff] }
 0x380   : > { %v6345_v43 = vpop.eup %5120  ;;  %v1464_v54 = vadd.f32 %v1463_v63, %v1462_v13  ;;  %v1471_v20 = vadd.f32 %v1470_v61, %v1469_v45  ;;  %v1577_v15 = vmul.f32 %v5119_v17, %v6194_v39  ;;  %v4830_v47 = vpack.c.bf16 %v2511_v4, %v2510_v12 }
 0x381   : > { %v6347_v0 = vpop.eup %5122  ;;  %v1389_v49 = vmul.f32 1.442695, %v1337_v2  ;;  %v1287_v56 = vmax.f32 %v1285_v59, %v1286_v36  ;;  %v1294_v40 = vmax.f32 %v7284_v57, %v1293_v34  ;;  %v1391_v29 = vmul.f32 1.442695, %v1338_v50  ;;  %v2515_v59 = vld [vmem:[%s6287_s23 + $0x68] sm:$0xff]  ;;  %v2516_v2 = vld [vmem:[%s6287_s23 + $0x70] sm:$0xff] }
 0x382   : > { %4394 = vmatmul.mubr.msk.f32.vlgmr.msra.gmra.mrb[32].mxu0 %vm293_vm0, %v7279_v1  ;;  %v2513_v1 = vld [vmem:[%s6287_s23 + $0x58] sm:$0xff]  ;;  %v1339_v58 = vsub.f32 %v7286_v3, %v1280_v9  ;;  %v1479_v33 = vrot.slane %v1478_v44, 4  ;;  %5130 = vrcp.f32 %v1457_v5  ;;  %v1465_v39 = vrot.slane %v1464_v54, 1 }
 0x383   : > { %4395 = vmatprep.mubr.msk.f32.mxu0 %vm293_vm0, %v7281_v53  ;;  %4868 = vmatpush3.bf16.msra.mxu0 %v7276_v8  ;;  %v4827_v8 = vpack.c.bf16 %v2509_v42, %v2508_v6  ;;  %v1472_v30 = vrot.slane %v1471_v20, 2  ;;  %v1486_v45 = vsel %vm293_vm0, %v6347_v0, 0.0  ;;  %v1578_v27 = vmul.f32 %v5119_v17, %v6205_v55  ;;  %v7288_v42 = vld [vmem:[#allocation29_spill] sm:$0xff] }
 0x384   : > { %4870 = vmatprep.subr.bf16.mxu0 %v7282_v7  ;;  %v4833_v28 = vpack.c.bf16 %v2513_v1, %v2512_v35  ;;  %5132 = vpow2.f32 %v1389_v49  ;;  %v1288_v52 = vrot.slane %v1287_v56, 1  ;;  %v1295_v62 = vrot.slane %v1294_v40, 2  ;;  %v2517_v36 = vld [vmem:[%s6287_s23 + $0x78] sm:$0xff]  ;;  %v7290_v49 = vld [vmem:[#allocation16_spill] sm:$0xff]  ;;  %v7291_v35 = vld [vmem:[#allocation31_spill] sm:$0xff] }
 0x385   : > { %4828 = vmatpush1.bf16.msra.mxu1 %v4827_v8  ;;  %5134 = vpow2.f32 %v1391_v29  ;;  %v1393_v6 = vmul.f32 1.442695, %v1339_v58  ;;  %v1302_v38 = vrot.slane %v7288_v42, 4  ;;  %v1466_v61 = vadd.f32 %v1465_v39, %v1464_v54  ;;  %v7289_v5 = vld [vmem:[#allocation17_spill] sm:$0xff] }
 0x386   : > { %4396 = vmatmul.mubr.msk.f32.gmra.mrb[34].mxu0 %vm293_vm0, %v7281_v53  ;;  %4829 = vmatprep.subr.bf16.mxu1 %v5316_v60  ;;  %v1485_v53 = vsel %vm293_vm0, %v6345_v43, 0.0  ;;  %v5125_v13 = vpop.eup %5124  ;;  %v1473_v11 = vadd.f32 %v1472_v30, %v1471_v20  ;;  %v1480_v63 = vadd.f32 %v1479_v33, %v1478_v44  ;;  %v1289_v17 = vmax.f32 %v1287_v56, %v1288_v52 }
 0x387   : > { %4397 = vmatprep.mubr.msk.f32.mxu0 %vm293_vm0, %v1575_v26  ;;  %4872 = vmatpush3.bf16.msra.mxu0 %v7282_v7  ;;  %v7287_v7 = vld [vmem:[#allocation13_spill] sm:$0xff]  ;;  %v6369_v55 = vpop.eup %5126  ;;  %v1487_v21 = vadd.f32 %v1486_v45, %v1485_v53  ;;  %v1579_v32 = vmul.f32 %v5125_v13, %v6212_v24  ;;  %v1296_v23 = vmax.f32 %v1294_v40, %v1295_v62  ;;  %5136 = vpow2.f32 %v1393_v6 }
 0x388   : > { %v6371_v31 = vpop.eup %5128  ;;  %v1303_v57 = vmax.f32 %v7288_v42, %v1302_v38  ;;  %5138 = vrcp.f32 %v1466_v61  ;;  %v1474_v24 = vrot.slane %v1473_v11, 1  ;;  %v1481_v12 = vrot.slane %v1480_v63, 2 }
 0x389   : > { %4831 = vmatpush1.bf16.msra.mxu1 %v4830_v47  ;;  %v1488_v34 = vrot.slane %v1487_v21, 4  ;;  %v1494_v4 = vsel %vm293_vm0, %v6369_v55, 0.0  ;;  %v1495_v46 = vsel %vm293_vm0, %v6371_v31, 0.0  ;;  %v1580_v50 = vmul.f32 %v5125_v13, %v6221_v10  ;;  %v2519_v47 = vld [vmem:[%s6287_s23 + $0x88] sm:$0xff]  ;;  %v2521_v13 = vld [vmem:[%s6287_s23 + $0x98] sm:$0xff] }
 0x38a   : > { %4398 = vmatmul.mubr.msk.f32.gmra.mrb[36].mxu0 %vm293_vm0, %v1575_v26  ;;  %v1340_v26 = vsub.f32 %v7287_v7, %v1280_v9  ;;  %4832 = vmatprep.subr.bf16.mxu1 %v5316_v60  ;;  %v4839_v9 = vpack.c.bf16 %v2517_v36, %v2516_v2  ;;  %v1341_v54 = vsub.f32 %v7289_v5, %v1289_v17  ;;  %v1297_v20 = vrot.slane %v1296_v23, 1 }
 0x38b   : > { %4399 = vmatprep.mubr.msk.f32.mxu0 %vm293_vm0, %v1576_v37  ;;  %v1342_v56 = vsub.f32 %v7290_v49, %v1289_v17  ;;  %v1304_v40 = vrot.slane %v1303_v57, 2  ;;  %v1311_v1 = vrot.slane %v7291_v35, 4  ;;  %v1496_v29 = vadd.f32 %v1495_v46, %v1494_v4 }
 0x38c   : > { %v1395_v8 = vmul.f32 1.442695, %v1340_v26  ;;  %v5131_v44 = vpop.eup %5130  ;;  %v1475_v3 = vadd.f32 %v1474_v24, %v1473_v11  ;;  %v1482_v58 = vadd.f32 %v1481_v12, %v1480_v63  ;;  %v1489_v33 = vadd.f32 %v1488_v34, %v1487_v21  ;;  %v7292_v11 = vld [vmem:[#allocation21_spill] sm:$0xff] }
 0x38d   : > { %4834 = vmatpush1.bf16.msra.mxu1 %v4833_v28  ;;  %v1581_v30 = vmul.f32 %v5131_v44, %v6237_v48  ;;  %v1397_v45 = vmul.f32 1.442695, %v1341_v54  ;;  %v2520_v28 = vld [vmem:[%s6287_s23 + $0x90] sm:$0xff]  ;;  %v1399_v7 = vmul.f32 1.442695, %v1342_v56  ;;  %v1305_v26 = vmax.f32 %v1303_v57, %v1304_v40 }
 0x38e   : > { %4400 = vmatmul.mubr.msk.f32.gmra.mrb[38].mxu0 %vm293_vm0, %v1576_v37  ;;  %v4836_v37 = vpack.c.bf16 %v2515_v59, %v2514_v18  ;;  %4835 = vmatprep.subr.bf16.mxu1 %v5316_v60  ;;  %5140 = vpow2.f32 %v1395_v8  ;;  %v6393_v10 = vpop.eup %5132  ;;  %v1312_v52 = vmax.f32 %v7291_v35, %v1311_v1  ;;  %v1497_v62 = vrot.slane %v1496_v29, 4  ;;  %v7293_v8 = vld [vmem:[#allocation20_spill] sm:$0xff] }
 0x38f   : > { %4401 = vmatprep.mubr.msk.f32.mxu0 %vm293_vm0, %v1577_v15  ;;  %v6395_v39 = vpop.eup %5134  ;;  %5142 = vrcp.f32 %v1475_v3  ;;  %v1483_v48 = vrot.slane %v1482_v58, 1  ;;  %v1490_v18 = vrot.slane %v1489_v33, 2  ;;  %v1503_v6 = vsel %vm293_vm0, %v6393_v10, 0.0  ;;  %v2527_v3 = vld [vmem:[%s6287_s23 + $0xc8] sm:$0xff] }
 0x390   : > { %v1504_v42 = vsel %vm293_vm0, %v6395_v39, 0.0  ;;  %v1582_v38 = vmul.f32 %v5131_v44, %v6245_v51  ;;  %v4845_v21 = vpack.c.bf16 %v2521_v13, %v2520_v28  ;;  %5144 = vpow2.f32 %v1397_v45  ;;  %v2525_v44 = vld [vmem:[%s6287_s23 + $0xb8] sm:$0xff] }
 0x391   : > { %4837 = vmatpush1.bf16.msra.mxu1 %v4836_v37  ;;  %v6404_v59 = vpop.eup %5136  ;;  %v2523_v37 = vld [vmem:[%s6287_s23 + $0xa8] sm:$0xff]  ;;  %5146 = vpow2.f32 %v1399_v7  ;;  %v1313_v2 = vrot.slane %v1312_v52, 2  ;;  %v1505_v36 = vadd.f32 %v1504_v42, %v1503_v6  ;;  %v1484_v57 = vadd.f32 %v1483_v48, %v1482_v58  ;;  %v7294_v58 = vld [vmem:[#allocation24_spill] sm:$0xff] }
 0x392   : > { %4402 = vmatmul.mubr.msk.f32.gmra.mrb[40].mxu0 %vm293_vm0, %v1577_v15  ;;  %4838 = vmatprep.subr.bf16.mxu1 %v5316_v60  ;;  %v2518_v15 = vld [vmem:[%s6287_s23 + $0x80] sm:$0xff]  ;;  %v5139_v61 = vpop.eup %5138  ;;  %v1491_v34 = vadd.f32 %v1490_v18, %v1489_v33  ;;  %v1498_v24 = vadd.f32 %v1497_v62, %v1496_v29  ;;  %v1512_v46 = vsel %vm293_vm0, %v6404_v59, 0.0  ;;  %v2528_v48 = vld [vmem:[%s6287_s23 + $0xd0] sm:$0xff]  ;;  %v2529_v18 = vld [vmem:[%s6287_s23 + $0xd8] sm:$0xff] }
 0x393   : > { %4403 = vmatprep.mubr.msk.f32.mxu0 %vm293_vm0, %v1578_v27  ;;  %v4842_v53 = vpack.c.bf16 %v2519_v47, %v2518_v15  ;;  %v1583_v12 = vmul.f32 %v5139_v61, %v6261_v14  ;;  %v1314_v14 = vmax.f32 %v1312_v52, %v1313_v2  ;;  %v1506_v15 = vrot.slane %v1505_v36, 4  ;;  %v2526_v29 = vld [vmem:[%s6287_s23 + $0xc0] sm:$0xff] }
 0x394   : > { %5148 = vrcp.f32 %v1484_v57  ;;  %v1492_v47 = vrot.slane %v1491_v34, 1  ;;  %v1499_v49 = vrot.slane %v1498_v24, 2  ;;  %v1584_v56 = vmul.f32 %v5139_v61, %v6269_v25  ;;  %v7296_v2 = vld [vmem:[#allocation30_spill] sm:$0xff]  ;;  %v7297_v57 = vld [vmem:[#allocation28_spill] sm:$0xff] }
 0x395   : > { %4840 = vmatpush1.bf16.msra.mxu1 %v4839_v9  ;;  %v2524_v9 = vld [vmem:[%s6287_s23 + $0xb0] sm:$0xff]  ;;  %v1315_v45 = vrot.slane %v1314_v14, 1  ;;  %v1507_v13 = vadd.f32 %v1506_v15, %v1505_v36  ;;  %v4854_v52 = vpack.c.bf16 %v2527_v3, %v2526_v29 }
 0x396   : > { %4404 = vmatmul.mubr.msk.f32.gmra.mrb[42].mxu0 %vm293_vm0, %v1578_v27  ;;  %v1298_v27 = vmax.f32 %v1296_v23, %v1297_v20  ;;  %4841 = vmatprep.subr.bf16.mxu1 %v5316_v60  ;;  %v1306_v23 = vrot.slane %v1305_v26, 1  ;;  %v4851_v40 = vpack.c.bf16 %v2525_v44, %v2524_v9  ;;  %v1500_v28 = vadd.f32 %v1499_v49, %v1498_v24 }
 0x397   : > { %4405 = vmatprep.mubr.msk.f32.mxu0 %vm293_vm0, %v1579_v32 }
 0x398   : > { %v1343_v63 = vsub.f32 %v7292_v11, %v1298_v27  ;;  %v1344_v17 = vsub.f32 %v7293_v8, %v1298_v27  ;;  %v6418_v51 = vpop.eup %5140  ;;  %v1307_v20 = vmax.f32 %v1305_v26, %v1306_v23  ;;  %v1493_v27 = vadd.f32 %v1492_v47, %v1491_v34  ;;  %v2530_v8 = vld [vmem:[%s6287_s23 + $0xe0] sm:$0xff] }
 0x399   : > { %4843 = vmatpush1.bf16.msra.mxu1 %v4842_v53  ;;  %v1513_v5 = vsel %vm293_vm0, %v6418_v51, 0.0  ;;  %v5143_v35 = vpop.eup %5142  ;;  %v1501_v61 = vrot.slane %v1500_v28, 1  ;;  %v1508_v11 = vrot.slane %v1507_v13, 2 }
 0x39a   : > { %4406 = vmatmul.mubr.msk.f32.gmra.mrb[44].mxu0 %vm293_vm0, %v1579_v32  ;;  %4844 = vmatprep.subr.bf16.mxu1 %v5316_v60  ;;  %v2522_v32 = vld [vmem:[%s6287_s23 + $0xa0] sm:$0xff]  ;;  %v1403_v54 = vmul.f32 1.442695, %v1344_v17  ;;  %v1514_v1 = vadd.f32 %v1513_v5, %v1512_v46  ;;  %v1345_v33 = vsub.f32 %v7294_v58, %v1307_v20  ;;  %v6438_v25 = vpop.eup %5144  ;;  %v1585_v26 = vmul.f32 %v5143_v35, %v6293_v16  ;;  %v2531_v17 = vld [vmem:[%s6287_s23 + $0xe8] sm:$0xff] }
 0x39b   : > { %4407 = vmatprep.mubr.msk.f32.mxu0 %vm293_vm0, %v1580_v50  ;;  %v4848_v4 = vpack.c.bf16 %v2523_v37, %v2522_v32  ;;  %v6440_v7 = vpop.eup %5146  ;;  %v1521_v6 = vsel %vm293_vm0, %v6438_v25, 0.0  ;;  %v4857_v32 = vpack.c.bf16 %v2529_v18, %v2528_v48  ;;  %v4860_v9 = vpack.c.bf16 %v2531_v17, %v2530_v8 }
 0x39c   : > { %v1515_v62 = vrot.slane %v1514_v1, 4  ;;  %v1405_v42 = vmul.f32 1.442695, %v1345_v33  ;;  %v1522_v16 = vsel %vm293_vm0, %v6440_v7, 0.0 }
 0x39d   : > { %4846 = vmatpush1.bf16.msra.mxu1 %v4845_v21  ;;  %v1316_v21 = vmax.f32 %v1314_v14, %v1315_v45  ;;  %v1523_v23 = vadd.f32 %v1522_v16, %v1521_v6 }
 0x39e   : > { %4408 = vmatmul.mubr.msk.f32.gmra.mrb[46].mxu0 %vm293_vm0, %v1580_v50  ;;  %v1401_v50 = vmul.f32 1.442695, %v1343_v63  ;;  %4847 = vmatprep.subr.bf16.mxu1 %v5316_v60  ;;  %v1586_v63 = vmul.f32 %v5143_v35, %v6296_v22  ;;  %v5149_v37 = vpop.eup %5148  ;;  %v1502_v22 = vadd.f32 %v1501_v61, %v1500_v28 }
 0x39f   : > { %4409 = vmatprep.mubr.msk.f32.mxu0 %vm293_vm0, %v1581_v30  ;;  %v1347_v36 = vsub.f32 %v7296_v2, %v1316_v21  ;;  %v1348_v34 = vsub.f32 %v7297_v57, %v1316_v21  ;;  %v1524_v44 = vrot.slane %v1523_v23, 4  ;;  %v1588_v47 = vmul.f32 %v5149_v37, %v6322_v19 }
 0x3a0   : > { %5150 = vpow2.f32 %v1401_v50  ;;  %v1587_v50 = vmul.f32 %v5149_v37, %v6319_v41 }
 0x3a1   : > { %4849 = vmatpush1.bf16.msra.mxu1 %v4848_v4  ;;  %5152 = vpow2.f32 %v1403_v54  ;;  %v1516_v4 = vadd.f32 %v1515_v62, %v1514_v1  ;;  %v1409_v54 = vmul.f32 1.442695, %v1347_v36  ;;  %v1525_v1 = vadd.f32 %v1524_v44, %v1523_v23  ;;  %v7298_v44 = vld [vmem:[#allocation4_spill] sm:$0xff] }
 0x3a2   : > { %4410 = vmatmul.mubr.msk.f32.gmra.mrb[48].mxu0 %vm293_vm0, %v1581_v30  ;;  %4850 = vmatprep.subr.bf16.mxu1 %v5316_v60  ;;  %v7295_v30 = vld [vmem:[#allocation22_spill] sm:$0xff]  ;;  %5154 = vrcp.f32 %v1493_v27 }
 0x3a3   : > { %4411 = vmatprep.mubr.msk.f32.mxu0 %vm293_vm0, %v1582_v38  ;;  %v1346_v53 = vsub.f32 %v7295_v30, %v1307_v20  ;;  %5156 = vpow2.f32 %v1405_v42  ;;  %v1411_v20 = vmul.f32 1.442695, %v1348_v34  ;;  %v1517_v41 = vrot.slane %v1516_v4, 2  ;;  %v2532_v34 = vld [vmem:[%s6287_s23 + $0xf0] sm:$0xff] }
 0x3a4   : > { %v1526_v33 = vrot.slane %v1525_v1, 2 }
 0x3a5   : > { %4852 = vmatpush1.bf16.msra.mxu1 %v4851_v40  ;;  %v1518_v35 = vadd.f32 %v1517_v41, %v1516_v4 }
 0x3a6   : > { %4412 = vmatmul.mubr.msk.f32.gmra.mrb[50].mxu0 %vm293_vm0, %v1582_v38  ;;  %4853 = vmatprep.subr.bf16.mxu1 %v5316_v60  ;;  %v1407_v38 = vmul.f32 1.442695, %v1346_v53 }
 0x3a7   : > { %4413 = vmatprep.mubr.msk.f32.mxu0 %vm293_vm0, %v1583_v12 }
 0x3a8   : > { %5158 = vpow2.f32 %v1407_v38 }
 0x3a9   : > { %4855 = vmatpush1.bf16.msra.mxu1 %v4854_v52  ;;  %5160 = vrcp.f32 %v1502_v22  ;;  %v2533_v22 = vld [vmem:[%s6287_s23 + $0xf8] sm:$0xff] }
 0x3aa   : > { %4414 = vmatmul.mubr.msk.f32.gmra.mrb[52].mxu0 %vm293_vm0, %v1583_v12  ;;  %4856 = vmatprep.subr.bf16.mxu1 %v5316_v60  ;;  %v6460_v24 = vpop.eup %5150  ;;  %v1509_v12 = vadd.f32 %v1508_v11, %v1507_v13  ;;  %5162 = vpow2.f32 %v1409_v54  ;;  %v1527_v13 = vadd.f32 %v1526_v33, %v1525_v1  ;;  %v2374_v1 = vld [vmem:[%s7178_s4] sm:$0xff]  ;;  %v2376_v33 = vld [vmem:[%s7178_s4 + $0x10] sm:$0xff] }
 0x3ab   : > { %4415 = vmatprep.mubr.msk.f32.mxu0 %vm293_vm0, %v1584_v56  ;;  %v6462_v46 = vpop.eup %5152  ;;  %v1530_v5 = vsel %vm293_vm0, %v6460_v24, 0.0  ;;  %5164 = vpow2.f32 %v1411_v20 }
 0x3ac   : > { %v1531_v14 = vsel %vm293_vm0, %v6462_v46, 0.0  ;;  %v1510_v15 = vrot.slane %v1509_v12, 1  ;;  %v5155_v49 = vpop.eup %5154  ;;  %v1528_v18 = vrot.slane %v1527_v13, 1 }
 0x3ad   : > { %4858 = vmatpush1.bf16.msra.mxu1 %v4857_v32  ;;  %v6476_v29 = vpop.eup %5156  ;;  %v1589_v3 = vmul.f32 %v5155_v49, %v6345_v43  ;;  %v1590_v45 = vmul.f32 %v5155_v49, %v6347_v0 }
 0x3ae   : > { %4416 = vmatmul.mubr.msk.f32.gmra.mrb[54].mxu0 %vm293_vm0, %v1584_v56  ;;  %4859 = vmatprep.subr.bf16.mxu1 %v5316_v60  ;;  %v1532_v56 = vadd.f32 %v1531_v14, %v1530_v5  ;;  %v1511_v40 = vadd.f32 %v1510_v15, %v1509_v12  ;;  %v1539_v30 = vsel %vm293_vm0, %v6476_v29, 0.0  ;;  %v1529_v61 = vadd.f32 %v1528_v18, %v1527_v13  ;;  %v2378_v13 = vld [vmem:[%s7178_s4 + $0x20] sm:$0xff]  ;;  %v2380_v18 = vld [vmem:[%s7178_s4 + $0x30] sm:$0xff] }
 0x3af   : > { %4417 = vmatprep.mubr.msk.f32.mxu0 %vm293_vm0, %v1585_v26 }
 0x3b0   : > { %v1533_v19 = vrot.slane %v1532_v56, 4  ;;  %5166 = vrcp.f32 %v1511_v40  ;;  %v2375_v40 = vld [vmem:[%s7178_s4 + $0x8] sm:$0xff] }
 0x3b1   : > { %4861 = vmatpush1.bf16.msra.mxu1 %v4860_v9 }
 0x3b2   : > { %4418 = vmatmul.mubr.msk.f32.gmra.mrb[56].mxu0 %vm293_vm0, %v1585_v26  ;;  %4862 = vmatprep.subr.bf16.mxu1 %v5316_v60  ;;  %v6479_v58 = vpop.eup %5158  ;;  %v1519_v60 = vrot.slane %v1518_v35, 1  ;;  %v1534_v26 = vadd.f32 %v1533_v19, %v1532_v56  ;;  %v2377_v19 = vld [vmem:[%s7178_s4 + $0x18] sm:$0xff] }
 0x3b3   : > { %4419 = vmatprep.mubr.msk.f32.mxu0 %vm293_vm0, %v1586_v63  ;;  %v1540_v53 = vsel %vm293_vm0, %v6479_v58, 0.0  ;;  %v5161_v27 = vpop.eup %5160 }
 0x3b4   : > { %v1541_v43 = vadd.f32 %v1540_v53, %v1539_v30  ;;  %v1520_v28 = vadd.f32 %v1519_v60, %v1518_v35  ;;  %v6490_v52 = vpop.eup %5162  ;;  %v1591_v62 = vmul.f32 %v5161_v27, %v6369_v55  ;;  %v1535_v6 = vrot.slane %v1534_v26, 2 }
 0x3b5   : > { %v6493_v48 = vpop.eup %5164  ;;  %v1548_v42 = vsel %vm293_vm0, %v6490_v52, 0.0  ;;  %v1592_v21 = vmul.f32 %v5161_v27, %v6371_v31  ;;  %v2379_v27 = vld [vmem:[%s7178_s4 + $0x28] sm:$0xff] }
 0x3b6   : > { %4420 = vmatmul.mubr.msk.f32.gmra.mrb[58].mxu0 %vm293_vm0, %v1586_v63  ;;  %v1542_v0 = vrot.slane %v1541_v43, 4  ;;  %5168 = vrcp.f32 %v1520_v28  ;;  %v1549_v38 = vsel %vm293_vm0, %v6493_v48, 0.0  ;;  %v1536_v11 = vadd.f32 %v1535_v6, %v1534_v26 }
 0x3b7   : > { %4421 = vmatprep.mubr.msk.f32.mxu0 %vm293_vm0, %v1587_v50  ;;  %v1550_v55 = vadd.f32 %v1549_v38, %v1548_v42  ;;  %5170 = vrcp.f32 %v1529_v61 }
 0x3b8   : > { %v1543_v63 = vadd.f32 %v1542_v0, %v1541_v43  ;;  %v1537_v31 = vrot.slane %v1536_v11, 1  ;;  %v7299_v43 = vld [vmem:[#allocation5_spill] sm:$0xff] }
 0x3b9   : > { %v1551_v37 = vrot.slane %v1550_v55, 4 }
 0x3ba   : > { %4422 = vmatmul.mubr.msk.f32.gmra.mrb[60].mxu0 %vm293_vm0, %v1587_v50  ;;  %v5167_v16 = vpop.eup %5166  ;;  %v1544_v8 = vrot.slane %v1543_v63, 2  ;;  %v1538_v2 = vadd.f32 %v1537_v31, %v1536_v11  ;;  %v2384_v31 = vld [vmem:[%s7178_s4 + $0x50] sm:$0xff] }
 0x3bb   : > { %4423 = vmatprep.mubr.msk.f32.mxu0 %vm293_vm0, %v1588_v47  ;;  %v1593_v32 = vmul.f32 %v5167_v16, %v6393_v10  ;;  %v1594_v17 = vmul.f32 %v5167_v16, %v6395_v39  ;;  %v1552_v10 = vadd.f32 %v1551_v37, %v1550_v55  ;;  %v4863_v39 = vpack.c.bf16 %v2533_v22, %v2532_v34  ;;  %v2382_v55 = vld [vmem:[%s7178_s4 + $0x40] sm:$0xff] }
 0x3bc   : > { %v1545_v36 = vadd.f32 %v1544_v8, %v1543_v63  ;;  %5172 = vrcp.f32 %v1538_v2  ;;  %v2387_v2 = vld [vmem:[%s7178_s4 + $0x68] sm:$0xff] }
 0x3bd   : > { %v1553_v4 = vrot.slane %v1552_v10, 2  ;;  %4864 = vmatpush1.bf16.msra.mxu1 %v4863_v39  ;;  %v2388_v39 = vld [vmem:[%s7178_s4 + $0x70] sm:$0xff] }
 0x3be   : > { %4424 = vmatmul.mubr.msk.f32.gmra.mrb[62].mxu0 %vm293_vm0, %v1588_v47  ;;  %v1546_v12 = vrot.slane %v1545_v36, 1  ;;  %4874 = vmatprep.subr.bf16.mxu1 %v7298_v44 }
 0x3bf   : > { %4425 = vmatprep.mubr.msk.f32.mxu0 %vm293_vm0, %v1589_v3  ;;  %v1554_v5 = vadd.f32 %v1553_v4, %v1552_v10  ;;  %v2386_v10 = vld [vmem:[%s7178_s4 + $0x60] sm:$0xff] }
 0x3c0   : > { %v5169_v23 = vpop.eup %5168 }
 0x3c1   : > { %v1595_v57 = vmul.f32 %v5169_v23, %v6404_v59  ;;  %v1596_v50 = vmul.f32 %v5169_v23, %v6418_v51  ;;  %v5171_v9 = vpop.eup %5170  ;;  %v1547_v59 = vadd.f32 %v1546_v12, %v1545_v36  ;;  %v1555_v20 = vrot.slane %v1554_v5, 1  ;;  %v2389_v12 = vld [vmem:[%s7178_s4 + $0x78] sm:$0xff] }
 0x3c2   : > { %4426 = vmatmul.mubr.msk.f32.gmra.mrb[64].mxu0 %vm293_vm0, %v1589_v3  ;;  %v1597_v54 = vmul.f32 %v5171_v9, %v6438_v25  ;;  %v1598_v51 = vmul.f32 %v5171_v9, %v6440_v7 }
 0x3c3   : > { %4427 = vmatprep.mubr.msk.f32.mxu0 %vm293_vm0, %v1590_v45  ;;  %5174 = vrcp.f32 %v1547_v59  ;;  %v1556_v15 = vadd.f32 %v1555_v20, %v1554_v5  ;;  %v2391_v59 = vld [vmem:[%s7178_s4 + $0x88] sm:$0xff] }
 0x3c5   : > { %5176 = vrcp.f32 %v1556_v15  ;;  %v2393_v15 = vld [vmem:[%s7178_s4 + $0x98] sm:$0xff] }
 0x3c6   : > { %4428 = vmatmul.mubr.msk.f32.gmra.mrb[66].mxu0 %vm293_vm0, %v1590_v45  ;;  %v5173_v14 = vpop.eup %5172 }
 0x3c7   : > { %4429 = vmatprep.mubr.msk.f32.mxu0 %vm293_vm0, %v1591_v62  ;;  %v1599_v41 = vmul.f32 %v5173_v14, %v6460_v24  ;;  %v1600_v25 = vmul.f32 %v5173_v14, %v6462_v46 }
 0x3ca   : > { %4430 = vmatmul.mubr.msk.f32.gmra.mrb[68].mxu0 %vm293_vm0, %v1591_v62 }
 0x3cb   : > { %4431 = vmatprep.mubr.msk.f32.mxu0 %vm293_vm0, %v1592_v21 }
 0x3cd   : > { %v5175_v47 = vpop.eup %5174 }
 0x3ce   : > { %4432 = vmatmul.mubr.msk.f32.gmra.mrb[70].mxu0 %vm293_vm0, %v1592_v21  ;;  %v1601_v7 = vmul.f32 %v5175_v47, %v6476_v29  ;;  %v1602_v24 = vmul.f32 %v5175_v47, %v6479_v58  ;;  %v2383_v21 = vld [vmem:[%s7178_s4 + $0x48] sm:$0xff] }
 0x3cf   : > { %4433 = vmatprep.mubr.msk.f32.mxu0 %vm293_vm0, %v1593_v32  ;;  %v5177_v49 = vpop.eup %5176 }
 0x3d0   : > { %v1603_v46 = vmul.f32 %v5177_v49, %v6490_v52  ;;  %v1604_v56 = vmul.f32 %v5177_v49, %v6493_v48  ;;  %v2381_v48 = vld [vmem:[%s7178_s4 + $0x38] sm:$0xff]  ;;  %v2395_v49 = vld [vmem:[%s7178_s4 + $0xa8] sm:$0xff] }
 0x3d2   : > { %4434 = vmatmul.mubr.msk.f32.gmra.mrb[72].mxu0 %vm293_vm0, %v1593_v32  ;;  %v2385_v32 = vld [vmem:[%s7178_s4 + $0x58] sm:$0xff] }
 0x3d3   : > { %4435 = vmatprep.mubr.msk.f32.mxu0 %vm293_vm0, %v1594_v17 }
 0x3d6   : > { %4436 = vmatmul.mubr.msk.f32.gmra.mrb[74].mxu0 %vm293_vm0, %v1594_v17 }
 0x3d7   : > { %4437 = vmatprep.mubr.msk.f32.mxu0 %vm293_vm0, %v1595_v57 }
 0x3da   : > { %4438 = vmatmul.mubr.msk.f32.gmra.mrb[76].mxu0 %vm293_vm0, %v1595_v57 }
 0x3db   : > { %4439 = vmatprep.mubr.msk.f32.mxu0 %vm293_vm0, %v1596_v50 }
 0x3de   : > { %4440 = vmatmul.mubr.msk.f32.gmra.mrb[78].mxu0 %vm293_vm0, %v1596_v50 }
 0x3df   : > { %4441 = vmatprep.mubr.msk.f32.mxu0 %vm293_vm0, %v1597_v54 }
 0x3e2   : > { %4442 = vmatmul.mubr.msk.f32.gmra.mrb[80].mxu0 %vm293_vm0, %v1597_v54  ;;  %v2390_v54 = vld [vmem:[%s7178_s4 + $0x80] sm:$0xff] }
 0x3e3   : > { %4443 = vmatprep.mubr.msk.f32.mxu0 %vm293_vm0, %v1598_v51 }
 0x3e6   : > { %4444 = vmatmul.mubr.msk.f32.gmra.mrb[82].mxu0 %vm293_vm0, %v1598_v51 }
 0x3e7   : > { %4445 = vmatprep.mubr.msk.f32.mxu0 %vm293_vm0, %v1599_v41 }
 0x3ea   : > { %4446 = vmatmul.mubr.msk.f32.gmra.mrb[84].mxu0 %vm293_vm0, %v1599_v41 }
 0x3eb   : > { %4447 = vmatprep.mubr.msk.f32.mxu0 %vm293_vm0, %v1600_v25 }
 0x3ee   : > { %4448 = vmatmul.mubr.msk.f32.gmra.mrb[86].mxu0 %vm293_vm0, %v1600_v25  ;;  %v2392_v25 = vld [vmem:[%s7178_s4 + $0x90] sm:$0xff] }
 0x3ef   : > { %4449 = vmatprep.mubr.msk.f32.mxu0 %vm293_vm0, %v1601_v7 }
 0x3f2   : > { %4450 = vmatmul.mubr.msk.f32.gmra.mrb[88].mxu0 %vm293_vm0, %v1601_v7 }
 0x3f3   : > { %4451 = vmatprep.mubr.msk.f32.mxu0 %vm293_vm0, %v1602_v24 }
 0x3f6   : > { %4452 = vmatmul.mubr.msk.f32.gmra.mrb[90].mxu0 %vm293_vm0, %v1602_v24 }
 0x3f7   : > { %4453 = vmatprep.mubr.msk.f32.mxu0 %vm293_vm0, %v1603_v46 }
 0x3fa   : > { %4454 = vmatmul.mubr.msk.f32.gmra.mrb[92].mxu0 %vm293_vm0, %v1603_v46 }
 0x3fb   : > { %4455 = vmatprep.mubr.msk.f32.mxu0 %vm293_vm0, %v1604_v56 }
 0x3fe   : > { %4456 = vmatmul.mubr.msk.f32.gmra.mrb[94].mxu0 %vm293_vm0, %v1604_v56  ;;  %v2394_v56 = vld [vmem:[%s7178_s4 + $0xa0] sm:$0xff] }
 0x455   : > { %v2183_v35 = vpop.f32.mrb[32].mxu0 }
 0x456   : > { %v2185_v29 = vpop.f32.mrb[33].mxu0  ;;  %v2438_v58 = vmul.f32 %v2374_v1, %v2183_v35 }
 0x457   : > { %v2439_v3 = vmul.f32 %v2375_v40, %v2185_v29  ;;  %v2397_v29 = vld [vmem:[%s7178_s4 + $0xb8] sm:$0xff] }
 0x459   : > { %v2189_v60 = vpop.f32.mrb[34].mxu0  ;;  %2598 = vmatprep.mubr.f32.mxu1 %v2439_v3 }
 0x45a   : > { %v2191_v30 = vpop.f32.mrb[35].mxu0  ;;  %2599 = vmatmul.mubr.f32.vlgmr.msra.gmra.mrb[32].mxu1 %v2438_v58  ;;  %v2440_v45 = vmul.f32 %v2376_v33, %v2189_v60  ;;  %v2396_v58 = vld [vmem:[%s7178_s4 + $0xb0] sm:$0xff] }
 0x45b   : > { %v2441_v53 = vmul.f32 %v2377_v19, %v2191_v30  ;;  %4876 = vmatpush3.bf16.msra.mxu1 %v7298_v44  ;;  %v2399_v30 = vld [vmem:[%s7178_s4 + $0xc8] sm:$0xff] }
 0x45c   : > { %4878 = vmatprep.subr.bf16.mxu1 %v7299_v43 }
 0x45d   : > { %v2195_v28 = vpop.f32.mrb[36].mxu0  ;;  %2603 = vmatprep.mubr.f32.mxu1 %v2441_v53 }
 0x45e   : > { %v2197_v26 = vpop.f32.mrb[37].mxu0  ;;  %2604 = vmatmul.mubr.f32.gmra.mrb[34].mxu1 %v2440_v45  ;;  %v2442_v62 = vmul.f32 %v2378_v13, %v2195_v28  ;;  %v2398_v45 = vld [vmem:[%s7178_s4 + $0xc0] sm:$0xff]  ;;  %v2401_v13 = vld [vmem:[%s7178_s4 + $0xd8] sm:$0xff] }
 0x45f   : > { %v2443_v52 = vmul.f32 %v2379_v27, %v2197_v26  ;;  %4880 = vmatpush3.bf16.msra.mxu1 %v7299_v43 }
 0x461   : > { %v2201_v0 = vpop.f32.mrb[38].mxu0  ;;  %2608 = vmatprep.mubr.f32.mxu1 %v2443_v52  ;;  %v2400_v52 = vld [vmem:[%s7178_s4 + $0xd0] sm:$0xff] }
 0x462   : > { %v2203_v6 = vpop.f32.mrb[39].mxu0  ;;  %2609 = vmatmul.mubr.f32.gmra.mrb[36].mxu1 %v2442_v62  ;;  %v2444_v38 = vmul.f32 %v2380_v18, %v2201_v0  ;;  %v2403_v18 = vld [vmem:[%s7178_s4 + $0xe8] sm:$0xff] }
 0x463   : > { %v2445_v42 = vmul.f32 %v2381_v48, %v2203_v6 }
 0x465   : > { %v2207_v16 = vpop.f32.mrb[40].mxu0  ;;  %2613 = vmatprep.mubr.f32.mxu1 %v2445_v42  ;;  %v2402_v42 = vld [vmem:[%s7178_s4 + $0xe0] sm:$0xff] }
 0x466   : > { %v2209_v61 = vpop.f32.mrb[41].mxu0  ;;  %2614 = vmatmul.mubr.f32.gmra.mrb[38].mxu1 %v2444_v38  ;;  %v2446_v63 = vmul.f32 %v2382_v55, %v2207_v16  ;;  %v2405_v55 = vld [vmem:[%s7178_s4 + $0xf8] sm:$0xff] }
 0x467   : > { %v2447_v11 = vmul.f32 %v2383_v21, %v2209_v61 }
 0x469   : > { %v2213_v37 = vpop.f32.mrb[42].mxu0  ;;  %2618 = vmatprep.mubr.f32.mxu1 %v2447_v11  ;;  %v2404_v11 = vld [vmem:[%s7178_s4 + $0xf0] sm:$0xff] }
 0x46a   : > { %v2215_v8 = vpop.f32.mrb[43].mxu0  ;;  %2619 = vmatmul.mubr.f32.gmra.mrb[40].mxu1 %v2446_v63  ;;  %v2448_v23 = vmul.f32 %v2384_v31, %v2213_v37  ;;  %v2407_v31 = vld [vmem:[%s7178_s4 + $0x108] sm:$0xff] }
 0x46b   : > { %v2449_v17 = vmul.f32 %v2385_v32, %v2215_v8 }
 0x46d   : > { %v2219_v36 = vpop.f32.mrb[44].mxu0  ;;  %2623 = vmatprep.mubr.f32.mxu1 %v2449_v17  ;;  %v2406_v17 = vld [vmem:[%s7178_s4 + $0x100] sm:$0xff] }
 0x46e   : > { %v2221_v57 = vpop.f32.mrb[45].mxu0  ;;  %2624 = vmatmul.mubr.f32.gmra.mrb[42].mxu1 %v2448_v23  ;;  %v2450_v22 = vmul.f32 %v2386_v10, %v2219_v36  ;;  %v2409_v10 = vld [vmem:[%s7178_s4 + $0x118] sm:$0xff] }
 0x46f   : > { %v2451_v34 = vmul.f32 %v2387_v2, %v2221_v57 }
 0x471   : > { %v2225_v4 = vpop.f32.mrb[46].mxu0  ;;  %2628 = vmatprep.mubr.f32.mxu1 %v2451_v34  ;;  %v2408_v34 = vld [vmem:[%s7178_s4 + $0x110] sm:$0xff] }
 0x472   : > { %v2227_v50 = vpop.f32.mrb[47].mxu0  ;;  %2629 = vmatmul.mubr.f32.gmra.mrb[44].mxu1 %v2450_v22  ;;  %v2452_v44 = vmul.f32 %v2388_v39, %v2225_v4  ;;  %v2411_v39 = vld [vmem:[%s7178_s4 + $0x128] sm:$0xff] }
 0x473   : > { %v2453_v9 = vmul.f32 %v2389_v12, %v2227_v50 }
 0x475   : > { %v2231_v5 = vpop.f32.mrb[48].mxu0  ;;  %2633 = vmatprep.mubr.f32.mxu1 %v2453_v9  ;;  %v2410_v9 = vld [vmem:[%s7178_s4 + $0x120] sm:$0xff] }
 0x476   : > { %v2233_v20 = vpop.f32.mrb[49].mxu0  ;;  %2634 = vmatmul.mubr.f32.gmra.mrb[46].mxu1 %v2452_v44  ;;  %v2454_v14 = vmul.f32 %v2390_v54, %v2231_v5  ;;  %v2413_v54 = vld [vmem:[%s7178_s4 + $0x138] sm:$0xff] }
 0x477   : > { %v2455_v51 = vmul.f32 %v2391_v59, %v2233_v20 }
 0x479   : > { %v2237_v41 = vpop.f32.mrb[50].mxu0  ;;  %2638 = vmatprep.mubr.f32.mxu1 %v2455_v51  ;;  %v2412_v51 = vld [vmem:[%s7178_s4 + $0x130] sm:$0xff] }
 0x47a   : > { %v2239_v47 = vpop.f32.mrb[51].mxu0  ;;  %2639 = vmatmul.mubr.f32.gmra.mrb[48].mxu1 %v2454_v14  ;;  %v2456_v24 = vmul.f32 %v2392_v25, %v2237_v41  ;;  %v2415_v25 = vld [vmem:[%s7178_s4 + $0x148] sm:$0xff] }
 0x47b   : > { %v2457_v7 = vmul.f32 %v2393_v15, %v2239_v47 }
 0x47d   : > { %v2243_v46 = vpop.f32.mrb[52].mxu0  ;;  %2643 = vmatprep.mubr.f32.mxu1 %v2457_v7  ;;  %v2414_v7 = vld [vmem:[%s7178_s4 + $0x140] sm:$0xff] }
 0x47e   : > { %v2245_v40 = vpop.f32.mrb[53].mxu0  ;;  %2644 = vmatmul.mubr.f32.gmra.mrb[50].mxu1 %v2456_v24  ;;  %v2458_v1 = vmul.f32 %v2394_v56, %v2243_v46  ;;  %v2417_v56 = vld [vmem:[%s7178_s4 + $0x158] sm:$0xff] }
 0x47f   : > { %v2459_v35 = vmul.f32 %v2395_v49, %v2245_v40 }
 0x481   : > { %v2249_v3 = vpop.f32.mrb[54].mxu0  ;;  %2648 = vmatprep.mubr.f32.mxu1 %v2459_v35  ;;  %v2416_v35 = vld [vmem:[%s7178_s4 + $0x150] sm:$0xff] }
 0x482   : > { %v2251_v19 = vpop.f32.mrb[55].mxu0  ;;  %2649 = vmatmul.mubr.f32.gmra.mrb[52].mxu1 %v2458_v1  ;;  %v2460_v33 = vmul.f32 %v2396_v58, %v2249_v3  ;;  %v2419_v58 = vld [vmem:[%s7178_s4 + $0x168] sm:$0xff] }
 0x483   : > { %v2461_v60 = vmul.f32 %v2397_v29, %v2251_v19 }
 0x485   : > { %v2255_v53 = vpop.f32.mrb[56].mxu0  ;;  %2653 = vmatprep.mubr.f32.mxu1 %v2461_v60  ;;  %v2418_v60 = vld [vmem:[%s7178_s4 + $0x160] sm:$0xff] }
 0x486   : > { %v2257_v27 = vpop.f32.mrb[57].mxu0  ;;  %2654 = vmatmul.mubr.f32.gmra.mrb[54].mxu1 %v2460_v33  ;;  %v2462_v28 = vmul.f32 %v2398_v45, %v2255_v53  ;;  %v2421_v45 = vld [vmem:[%s7178_s4 + $0x178] sm:$0xff] }
 0x487   : > { %v2463_v43 = vmul.f32 %v2399_v30, %v2257_v27 }
 0x489   : > { %v2261_v26 = vpop.f32.mrb[58].mxu0  ;;  %2658 = vmatprep.mubr.f32.mxu1 %v2463_v43  ;;  %v2420_v43 = vld [vmem:[%s7178_s4 + $0x170] sm:$0xff] }
 0x48a   : > { %v2263_v62 = vpop.f32.mrb[59].mxu0  ;;  %2659 = vmatmul.mubr.f32.gmra.mrb[56].mxu1 %v2462_v28  ;;  %v2464_v0 = vmul.f32 %v2400_v52, %v2261_v26  ;;  %v2423_v52 = vld [vmem:[%s7178_s4 + $0x188] sm:$0xff] }
 0x48b   : > { %v2465_v48 = vmul.f32 %v2401_v13, %v2263_v62 }
 0x48d   : > { %v2267_v6 = vpop.f32.mrb[60].mxu0  ;;  %2663 = vmatprep.mubr.f32.mxu1 %v2465_v48  ;;  %v2422_v48 = vld [vmem:[%s7178_s4 + $0x180] sm:$0xff] }
 0x48e   : > { %v2269_v38 = vpop.f32.mrb[61].mxu0  ;;  %2664 = vmatmul.mubr.f32.gmra.mrb[58].mxu1 %v2464_v0  ;;  %v2466_v16 = vmul.f32 %v2402_v42, %v2267_v6  ;;  %v2425_v42 = vld [vmem:[%s7178_s4 + $0x198] sm:$0xff] }
 0x48f   : > { %v2467_v21 = vmul.f32 %v2403_v18, %v2269_v38 }
 0x491   : > { %v2273_v61 = vpop.f32.mrb[62].mxu0  ;;  %2668 = vmatprep.mubr.f32.mxu1 %v2467_v21  ;;  %v2424_v21 = vld [vmem:[%s7178_s4 + $0x190] sm:$0xff] }
 0x492   : > { %v2275_v63 = vpop.f32.mrb[63].mxu0  ;;  %2669 = vmatmul.mubr.f32.gmra.mrb[60].mxu1 %v2466_v16  ;;  %v2468_v37 = vmul.f32 %v2404_v11, %v2273_v61  ;;  %v2427_v11 = vld [vmem:[%s7178_s4 + $0x1a8] sm:$0xff] }
 0x493   : > { %v2469_v32 = vmul.f32 %v2405_v55, %v2275_v63 }
 0x495   : > { %v2279_v8 = vpop.f32.mrb[64].mxu0  ;;  %2673 = vmatprep.mubr.f32.mxu1 %v2469_v32  ;;  %v2426_v32 = vld [vmem:[%s7178_s4 + $0x1a0] sm:$0xff] }
 0x496   : > { %v2281_v23 = vpop.f32.mrb[65].mxu0  ;;  %2674 = vmatmul.mubr.f32.gmra.mrb[62].mxu1 %v2468_v37  ;;  %v2470_v36 = vmul.f32 %v2406_v17, %v2279_v8  ;;  %v2429_v17 = vld [vmem:[%s7178_s4 + $0x1b8] sm:$0xff] }
 0x497   : > { %v2471_v2 = vmul.f32 %v2407_v31, %v2281_v23 }
 0x499   : > { %v2285_v57 = vpop.f32.mrb[66].mxu0  ;;  %2678 = vmatprep.mubr.f32.mxu1 %v2471_v2  ;;  %v2428_v2 = vld [vmem:[%s7178_s4 + $0x1b0] sm:$0xff] }
 0x49a   : > { %v2287_v22 = vpop.f32.mrb[67].mxu0  ;;  %2679 = vmatmul.mubr.f32.gmra.mrb[64].mxu1 %v2470_v36  ;;  %v2472_v4 = vmul.f32 %v2408_v34, %v2285_v57  ;;  %v2431_v34 = vld [vmem:[%s7178_s4 + $0x1c8] sm:$0xff] }
 0x49b   : > { %v2473_v12 = vmul.f32 %v2409_v10, %v2287_v22 }
 0x49d   : > { %v2291_v50 = vpop.f32.mrb[68].mxu0  ;;  %2683 = vmatprep.mubr.f32.mxu1 %v2473_v12  ;;  %v2430_v12 = vld [vmem:[%s7178_s4 + $0x1c0] sm:$0xff] }
 0x49e   : > { %v2293_v44 = vpop.f32.mrb[69].mxu0  ;;  %2684 = vmatmul.mubr.f32.gmra.mrb[66].mxu1 %v2472_v4  ;;  %v2474_v5 = vmul.f32 %v2410_v9, %v2291_v50  ;;  %v2433_v9 = vld [vmem:[%s7178_s4 + $0x1d8] sm:$0xff] }
 0x49f   : > { %v2475_v59 = vmul.f32 %v2411_v39, %v2293_v44 }
 0x4a1   : > { %v2297_v20 = vpop.f32.mrb[70].mxu0  ;;  %2688 = vmatprep.mubr.f32.mxu1 %v2475_v59  ;;  %v2432_v59 = vld [vmem:[%s7178_s4 + $0x1d0] sm:$0xff] }
 0x4a2   : > { %v2299_v14 = vpop.f32.mrb[71].mxu0  ;;  %2689 = vmatmul.mubr.f32.gmra.mrb[68].mxu1 %v2474_v5  ;;  %v2476_v41 = vmul.f32 %v2412_v51, %v2297_v20  ;;  %v2435_v51 = vld [vmem:[%s7178_s4 + $0x1e8] sm:$0xff] }
 0x4a3   : > { %v2477_v15 = vmul.f32 %v2413_v54, %v2299_v14 }
 0x4a5   : > { %v2303_v47 = vpop.f32.mrb[72].mxu0  ;;  %2693 = vmatprep.mubr.f32.mxu1 %v2477_v15  ;;  %v2434_v15 = vld [vmem:[%s7178_s4 + $0x1e0] sm:$0xff] }
 0x4a6   : > { %v2305_v24 = vpop.f32.mrb[73].mxu0  ;;  %2694 = vmatmul.mubr.f32.gmra.mrb[70].mxu1 %v2476_v41  ;;  %v2478_v46 = vmul.f32 %v2414_v7, %v2303_v47  ;;  %v2437_v7 = vld [vmem:[%s7178_s4 + $0x1f8] sm:$0xff] }
 0x4a7   : > { %v2479_v49 = vmul.f32 %v2415_v25, %v2305_v24 }
 0x4a9   : > { %v2309_v40 = vpop.f32.mrb[74].mxu0  ;;  %2698 = vmatprep.mubr.f32.mxu1 %v2479_v49  ;;  %v2436_v49 = vld [vmem:[%s7178_s4 + $0x1f0] sm:$0xff] }
 0x4aa   : > { %v2311_v1 = vpop.f32.mrb[75].mxu0  ;;  %2699 = vmatmul.mubr.f32.gmra.mrb[72].mxu1 %v2478_v46  ;;  %v2480_v3 = vmul.f32 %v2416_v35, %v2309_v40 }
 0x4ab   : > { %v2481_v29 = vmul.f32 %v2417_v56, %v2311_v1 }
 0x4ad   : > { %v2315_v19 = vpop.f32.mrb[76].mxu0  ;;  %2703 = vmatprep.mubr.f32.mxu1 %v2481_v29 }
 0x4ae   : > { %v2317_v33 = vpop.f32.mrb[77].mxu0  ;;  %2704 = vmatmul.mubr.f32.gmra.mrb[74].mxu1 %v2480_v3  ;;  %v2482_v53 = vmul.f32 %v2418_v60, %v2315_v19 }
 0x4af   : > { %v2483_v30 = vmul.f32 %v2419_v58, %v2317_v33 }
 0x4b1   : > { %v2321_v27 = vpop.f32.mrb[78].mxu0  ;;  %2708 = vmatprep.mubr.f32.mxu1 %v2483_v30 }
 0x4b2   : > { %v2323_v28 = vpop.f32.mrb[79].mxu0  ;;  %2709 = vmatmul.mubr.f32.gmra.mrb[76].mxu1 %v2482_v53  ;;  %v2484_v26 = vmul.f32 %v2420_v43, %v2321_v27 }
 0x4b3   : > { %v2485_v13 = vmul.f32 %v2421_v45, %v2323_v28 }
 0x4b5   : > { %v2327_v62 = vpop.f32.mrb[80].mxu0  ;;  %2713 = vmatprep.mubr.f32.mxu1 %v2485_v13 }
 0x4b6   : > { %v2329_v0 = vpop.f32.mrb[81].mxu0  ;;  %2714 = vmatmul.mubr.f32.gmra.mrb[78].mxu1 %v2484_v26  ;;  %v2486_v6 = vmul.f32 %v2422_v48, %v2327_v62 }
 0x4b7   : > { %v2487_v18 = vmul.f32 %v2423_v52, %v2329_v0 }
 0x4b9   : > { %v2333_v38 = vpop.f32.mrb[82].mxu0  ;;  %2718 = vmatprep.mubr.f32.mxu1 %v2487_v18 }
 0x4ba   : > { %v2335_v16 = vpop.f32.mrb[83].mxu0  ;;  %2719 = vmatmul.mubr.f32.gmra.mrb[80].mxu1 %v2486_v6  ;;  %v2488_v61 = vmul.f32 %v2424_v21, %v2333_v38 }
 0x4bb   : > { %v2489_v55 = vmul.f32 %v2425_v42, %v2335_v16 }
 0x4bd   : > { %v2339_v63 = vpop.f32.mrb[84].mxu0  ;;  %2723 = vmatprep.mubr.f32.mxu1 %v2489_v55 }
 0x4be   : > { %v2341_v37 = vpop.f32.mrb[85].mxu0  ;;  %2724 = vmatmul.mubr.f32.gmra.mrb[82].mxu1 %v2488_v61  ;;  %v2490_v8 = vmul.f32 %v2426_v32, %v2339_v63 }
 0x4bf   : > { %v2491_v31 = vmul.f32 %v2427_v11, %v2341_v37 }
 0x4c1   : > { %v2345_v23 = vpop.f32.mrb[86].mxu0  ;;  %2728 = vmatprep.mubr.f32.mxu1 %v2491_v31 }
 0x4c2   : > { %v2347_v36 = vpop.f32.mrb[87].mxu0  ;;  %2729 = vmatmul.mubr.f32.gmra.mrb[84].mxu1 %v2490_v8  ;;  %v2492_v57 = vmul.f32 %v2428_v2, %v2345_v23 }
 0x4c3   : > { %v2493_v10 = vmul.f32 %v2429_v17, %v2347_v36 }
 0x4c5   : > { %v2351_v22 = vpop.f32.mrb[88].mxu0  ;;  %2733 = vmatprep.mubr.f32.mxu1 %v2493_v10 }
 0x4c6   : > { %v2353_v4 = vpop.f32.mrb[89].mxu0  ;;  %2734 = vmatmul.mubr.f32.gmra.mrb[86].mxu1 %v2492_v57  ;;  %v2494_v50 = vmul.f32 %v2430_v12, %v2351_v22 }
 0x4c7   : > { %v2495_v39 = vmul.f32 %v2431_v34, %v2353_v4 }
 0x4c9   : > { %v2357_v44 = vpop.f32.mrb[90].mxu0  ;;  %2738 = vmatprep.mubr.f32.mxu1 %v2495_v39 }
 0x4ca   : > { %v2359_v5 = vpop.f32.mrb[91].mxu0  ;;  %2739 = vmatmul.mubr.f32.gmra.mrb[88].mxu1 %v2494_v50  ;;  %v2496_v20 = vmul.f32 %v2432_v59, %v2357_v44 }
 0x4cb   : > { %v2497_v54 = vmul.f32 %v2433_v9, %v2359_v5 }
 0x4cd   : > { %v2363_v14 = vpop.f32.mrb[92].mxu0  ;;  %2743 = vmatprep.mubr.f32.mxu1 %v2497_v54 }
 0x4ce   : > { %v2365_v41 = vpop.f32.mrb[93].mxu0  ;;  %2744 = vmatmul.mubr.f32.gmra.mrb[90].mxu1 %v2496_v20  ;;  %v2498_v47 = vmul.f32 %v2434_v15, %v2363_v14 }
 0x4cf   : > { %v2499_v25 = vmul.f32 %v2435_v51, %v2365_v41 }
 0x4d1   : > { %v2369_v24 = vpop.f32.mrb[94].mxu0  ;;  %2748 = vmatprep.mubr.f32.mxu1 %v2499_v25 }
 0x4d2   : > { %v2371_v46 = vpop.f32.mrb[95].mxu0  ;;  %2749 = vmatmul.mubr.f32.gmra.mrb[92].mxu1 %v2498_v47  ;;  %v2500_v40 = vmul.f32 %v2436_v49, %v2369_v24 }
 0x4d3   : > { %v2501_v56 = vmul.f32 %v2437_v7, %v2371_v46 }
 0x4d5   : > { %2753 = vmatprep.mubr.f32.mxu1 %v2501_v56 }
 0x4d6   : > { %2754 = vmatmul.mubr.f32.gmra.mrb[94].mxu1 %v2500_v40 }
 0x52d   : > { %v2600_v35 = vpop.f32.mrb[32].mxu1 }
 0x52e   : > { %v2602_v1 = vpop.f32.mrb[33].mxu1  ;;  %4649 = vmatprep.mubr.msk.f32.mxu0 %vm293_vm0, %v2600_v35 }
 0x52f   : > { %v6774_v1 = vld [vmem:[%s7177_s3] ss:$0 sm:$0xff] }
 0x531   : > { %v2605_v29 = vpop.f32.mrb[34].mxu1 }
 0x532   : > { %v2607_v3 = vpop.f32.mrb[35].mxu1  ;;  %4650 = vmatmul.mubr.msk.f32.vlgmr.msra.gmra.mrb[96].mxu0 %vm293_vm0, %v2605_v29 }
 0x535   : > { %v2610_v58 = vpop.f32.mrb[36].mxu1 }
 0x536   : > { %v2612_v19 = vpop.f32.mrb[37].mxu1  ;;  %4652 = vmatprep.mubr.msk.f32.mxu0 %vm293_vm0, %v2610_v58 }
 0x539   : > { %v2615_v60 = vpop.f32.mrb[38].mxu1 }
 0x53a   : > { %v2617_v33 = vpop.f32.mrb[39].mxu1  ;;  %4653 = vmatmul.mubr.msk.f32.gmra.mrb[98].mxu0 %vm293_vm0, %v2615_v60 }
 0x53d   : > { %v2620_v30 = vpop.f32.mrb[40].mxu1 }
 0x53e   : > { %v2622_v53 = vpop.f32.mrb[41].mxu1  ;;  %4655 = vmatprep.mubr.msk.f32.mxu0 %vm293_vm0, %v2620_v30 }
 0x541   : > { %v2625_v45 = vpop.f32.mrb[42].mxu1 }
 0x542   : > { %v2627_v27 = vpop.f32.mrb[43].mxu1  ;;  %4656 = vmatmul.mubr.msk.f32.gmra.mrb[100].mxu0 %vm293_vm0, %v2625_v45 }
 0x545   : > { %v2630_v43 = vpop.f32.mrb[44].mxu1 }
 0x546   : > { %v2632_v28 = vpop.f32.mrb[45].mxu1  ;;  %4658 = vmatprep.mubr.msk.f32.mxu0 %vm293_vm0, %v2630_v43 }
 0x549   : > { %v2635_v13 = vpop.f32.mrb[46].mxu1 }
 0x54a   : > { %v2637_v26 = vpop.f32.mrb[47].mxu1  ;;  %4659 = vmatmul.mubr.msk.f32.gmra.mrb[102].mxu0 %vm293_vm0, %v2635_v13 }
 0x54d   : > { %v2640_v52 = vpop.f32.mrb[48].mxu1 }
 0x54e   : > { %v2642_v62 = vpop.f32.mrb[49].mxu1  ;;  %4661 = vmatprep.mubr.msk.f32.mxu0 %vm293_vm0, %v2640_v52 }
 0x551   : > { %v2645_v48 = vpop.f32.mrb[50].mxu1 }
 0x552   : > { %v2647_v0 = vpop.f32.mrb[51].mxu1  ;;  %4662 = vmatmul.mubr.msk.f32.gmra.mrb[104].mxu0 %vm293_vm0, %v2645_v48 }
 0x555   : > { %v2650_v18 = vpop.f32.mrb[52].mxu1 }
 0x556   : > { %v2652_v6 = vpop.f32.mrb[53].mxu1  ;;  %4664 = vmatprep.mubr.msk.f32.mxu0 %vm293_vm0, %v2650_v18 }
 0x559   : > { %v2655_v42 = vpop.f32.mrb[54].mxu1 }
 0x55a   : > { %v2657_v38 = vpop.f32.mrb[55].mxu1  ;;  %4665 = vmatmul.mubr.msk.f32.gmra.mrb[106].mxu0 %vm293_vm0, %v2655_v42 }
 0x55d   : > { %v2660_v21 = vpop.f32.mrb[56].mxu1 }
 0x55e   : > { %v2662_v16 = vpop.f32.mrb[57].mxu1  ;;  %4667 = vmatprep.mubr.msk.f32.mxu0 %vm293_vm0, %v2660_v21 }
 0x561   : > { %v2665_v55 = vpop.f32.mrb[58].mxu1 }
 0x562   : > { %v2667_v61 = vpop.f32.mrb[59].mxu1  ;;  %4668 = vmatmul.mubr.msk.f32.gmra.mrb[108].mxu0 %vm293_vm0, %v2665_v55 }
 0x565   : > { %v2670_v11 = vpop.f32.mrb[60].mxu1 }
 0x566   : > { %v2672_v63 = vpop.f32.mrb[61].mxu1  ;;  %4670 = vmatprep.mubr.msk.f32.mxu0 %vm293_vm0, %v2670_v11 }
 0x569   : > { %v2675_v32 = vpop.f32.mrb[62].mxu1 }
 0x56a   : > { %v2677_v37 = vpop.f32.mrb[63].mxu1  ;;  %4671 = vmatmul.mubr.msk.f32.gmra.mrb[110].mxu0 %vm293_vm0, %v2675_v32 }
 0x56d   : > { %v2680_v31 = vpop.f32.mrb[64].mxu1 }
 0x56e   : > { %v2682_v8 = vpop.f32.mrb[65].mxu1  ;;  %4673 = vmatprep.mubr.msk.f32.mxu0 %vm293_vm0, %v2680_v31 }
 0x571   : > { %v2685_v17 = vpop.f32.mrb[66].mxu1 }
 0x572   : > { %v2687_v23 = vpop.f32.mrb[67].mxu1  ;;  %4674 = vmatmul.mubr.msk.f32.gmra.mrb[112].mxu0 %vm293_vm0, %v2685_v17 }
 0x575   : > { %v2690_v2 = vpop.f32.mrb[68].mxu1 }
 0x576   : > { %v2692_v36 = vpop.f32.mrb[69].mxu1  ;;  %4676 = vmatprep.mubr.msk.f32.mxu0 %vm293_vm0, %v2690_v2 }
 0x579   : > { %v2695_v10 = vpop.f32.mrb[70].mxu1 }
 0x57a   : > { %v2697_v57 = vpop.f32.mrb[71].mxu1  ;;  %4677 = vmatmul.mubr.msk.f32.gmra.mrb[114].mxu0 %vm293_vm0, %v2695_v10 }
 0x57d   : > { %v2700_v34 = vpop.f32.mrb[72].mxu1 }
 0x57e   : > { %v2702_v22 = vpop.f32.mrb[73].mxu1  ;;  %4679 = vmatprep.mubr.msk.f32.mxu0 %vm293_vm0, %v2700_v34 }
 0x581   : > { %v2705_v12 = vpop.f32.mrb[74].mxu1 }
 0x582   : > { %v2707_v4 = vpop.f32.mrb[75].mxu1  ;;  %4680 = vmatmul.mubr.msk.f32.gmra.mrb[116].mxu0 %vm293_vm0, %v2705_v12 }
 0x585   : > { %v2710_v39 = vpop.f32.mrb[76].mxu1 }
 0x586   : > { %v2712_v50 = vpop.f32.mrb[77].mxu1  ;;  %4682 = vmatprep.mubr.msk.f32.mxu0 %vm293_vm0, %v2710_v39 }
 0x589   : > { %v2715_v9 = vpop.f32.mrb[78].mxu1 }
 0x58a   : > { %v2717_v44 = vpop.f32.mrb[79].mxu1  ;;  %4683 = vmatmul.mubr.msk.f32.gmra.mrb[118].mxu0 %vm293_vm0, %v2715_v9 }
 0x58d   : > { %v2720_v59 = vpop.f32.mrb[80].mxu1 }
 0x58e   : > { %v2722_v5 = vpop.f32.mrb[81].mxu1  ;;  %4685 = vmatprep.mubr.msk.f32.mxu0 %vm293_vm0, %v2720_v59 }
 0x591   : > { %v2725_v54 = vpop.f32.mrb[82].mxu1 }
 0x592   : > { %v2727_v20 = vpop.f32.mrb[83].mxu1  ;;  %4686 = vmatmul.mubr.msk.f32.gmra.mrb[120].mxu0 %vm293_vm0, %v2725_v54 }
 0x595   : > { %v2730_v51 = vpop.f32.mrb[84].mxu1 }
 0x596   : > { %v2732_v14 = vpop.f32.mrb[85].mxu1  ;;  %4688 = vmatprep.mubr.msk.f32.mxu0 %vm293_vm0, %v2730_v51 }
 0x599   : > { %v2735_v15 = vpop.f32.mrb[86].mxu1 }
 0x59a   : > { %v2737_v41 = vpop.f32.mrb[87].mxu1  ;;  %4689 = vmatmul.mubr.msk.f32.gmra.mrb[122].mxu0 %vm293_vm0, %v2735_v15 }
 0x59d   : > { %v2740_v25 = vpop.f32.mrb[88].mxu1 }
 0x59e   : > { %v2742_v47 = vpop.f32.mrb[89].mxu1  ;;  %4691 = vmatprep.mubr.msk.f32.mxu0 %vm293_vm0, %v2740_v25 }
 0x5a1   : > { %v2745_v7 = vpop.f32.mrb[90].mxu1 }
 0x5a2   : > { %v2747_v24 = vpop.f32.mrb[91].mxu1  ;;  %4692 = vmatmul.mubr.msk.f32.gmra.mrb[124].mxu0 %vm293_vm0, %v2745_v7 }
 0x5a5   : > { %v2750_v49 = vpop.f32.mrb[92].mxu1 }
 0x5a6   : > { %v2752_v46 = vpop.f32.mrb[93].mxu1  ;;  %4694 = vmatprep.mubr.msk.f32.mxu0 %vm293_vm0, %v2750_v49 }
 0x5a9   : > { %v2755_v56 = vpop.f32.mrb[94].mxu1 }
 0x5aa   : > { %v2757_v40 = vpop.f32.mrb[95].mxu1  ;;  %4695 = vmatmul.mubr.msk.f32.gmra.mrb[126].mxu0 %vm293_vm0, %v2755_v56 }
 0x605   : > { %v4651_v35 = vpop.f32.mrb[96].mxu0 }
 0x606   : > { %v2927_v29 = vadd.f32 %v6774_v1, %v4651_v35  ;;  %v2921_v3 = vpop.f32.mrb[97].mxu0 }
 0x607   : > { %v2922_v58 = vadd.f32 %v6774_v1, %v2921_v3 }
 0x608   : > { %v3114_v19 = vmul.f32 1.442695, %v2927_v29  ;;  %vm3081_vm4 = vcmp.gt.f32.partialorder %v2927_v29, 0.0 }
 0x609   : > { %v3112_v60 = vmul.f32 1.442695, %v2922_v58  ;;  %vm3080_vm5 = vcmp.gt.f32.partialorder %v2922_v58, 0.0 }
 0x60a   : > { %5178 = vpow2.f32 %v3114_v19 }
 0x60b   : > { %5180 = vpow2.f32 %v3112_v60 }
 0x60d   : > { %v4654_v33 = vpop.f32.mrb[98].mxu0 }
 0x60e   : > { %v2937_v30 = vadd.f32 %v6774_v1, %v4654_v33  ;;  %v2931_v53 = vpop.f32.mrb[99].mxu0 }
 0x60f   : > { %v2932_v45 = vadd.f32 %v6774_v1, %v2931_v53 }
 0x610   : > { %v3118_v27 = vmul.f32 1.442695, %v2937_v30  ;;  %vm3083_vm6 = vcmp.gt.f32.partialorder %v2937_v30, 0.0 }
 0x611   : > { %v3116_v43 = vmul.f32 1.442695, %v2932_v45  ;;  %vm3082_vm7 = vcmp.gt.f32.partialorder %v2932_v45, 0.0 }
 0x612   : > { %5182 = vpow2.f32 %v3118_v27 }
 0x613   : > { %5184 = vpow2.f32 %v3116_v43 }
 0x614   : > { %v5179_v28 = vpop.eup %5178 }
 0x615   : > { %v5181_v13 = vpop.eup %5180  ;;  %v4224_v26 = vadd.f32 -1.0, %v5179_v28  ;;  %v4657_v52 = vpop.f32.mrb[100].mxu0 }
 0x616   : > { %v4223_v62 = vadd.f32 -1.0, %v5181_v13  ;;  %v2947_v48 = vadd.f32 %v6774_v1, %v4657_v52  ;;  %v2941_v0 = vpop.f32.mrb[101].mxu0 }
 0x617   : > { %v3209_v18 = vmul.f32 1.6732632, %v4224_v26  ;;  %v2942_v6 = vadd.f32 %v6774_v1, %v2941_v0 }
 0x618   : > { %v3208_v42 = vmul.f32 1.6732632, %v4223_v62  ;;  %v3122_v38 = vmul.f32 1.442695, %v2947_v48  ;;  %vm3085_vm8 = vcmp.gt.f32.partialorder %v2947_v48, 0.0 }
 0x619   : > { %v3241_v21 = vsel %vm3081_vm4, %v2927_v29, %v3209_v18  ;;  %v3120_v16 = vmul.f32 1.442695, %v2942_v6  ;;  %vm3084_vm9 = vcmp.gt.f32.partialorder %v2942_v6, 0.0 }
 0x61a   : > { %v3240_v55 = vsel %vm3080_vm5, %v2922_v58, %v3208_v42  ;;  %5186 = vpow2.f32 %v3122_v38  ;;  %v3273_v63 = vmul.f32 1.050701, %v3241_v21 }
 0x61b   : > { %v3272_v61 = vmul.f32 1.050701, %v3240_v55  ;;  %5188 = vpow2.f32 %v3120_v16 }
 0x61c   : > { %v5183_v11 = vpop.eup %5182 }
 0x61d   : > { %v5185_v32 = vpop.eup %5184  ;;  %v4226_v37 = vadd.f32 -1.0, %v5183_v11  ;;  %v4660_v31 = vpop.f32.mrb[102].mxu0  ;;  %4705 = vmatprep.mubr.msk.f32.mxu1 %vm293_vm0, %v3272_v61 }
 0x61e   : > { %v4225_v8 = vadd.f32 -1.0, %v5185_v32  ;;  %v2957_v17 = vadd.f32 %v6774_v1, %v4660_v31  ;;  %v2951_v23 = vpop.f32.mrb[103].mxu0  ;;  %4706 = vmatmul.mubr.msk.f32.vlgmr.msra.gmra.mrb[96].mxu1 %vm293_vm0, %v3273_v63 }
 0x61f   : > { %v3211_v2 = vmul.f32 1.6732632, %v4226_v37  ;;  %v2952_v36 = vadd.f32 %v6774_v1, %v2951_v23 }
 0x620   : > { %v3210_v10 = vmul.f32 1.6732632, %v4225_v8  ;;  %v3126_v57 = vmul.f32 1.442695, %v2957_v17  ;;  %vm3087_vm10 = vcmp.gt.f32.partialorder %v2957_v17, 0.0 }
 0x621   : > { %v3243_v34 = vsel %vm3083_vm6, %v2937_v30, %v3211_v2  ;;  %v3124_v22 = vmul.f32 1.442695, %v2952_v36  ;;  %vm3086_vm11 = vcmp.gt.f32.partialorder %v2952_v36, 0.0 }
 0x622   : > { %v3242_v12 = vsel %vm3082_vm7, %v2932_v45, %v3210_v10  ;;  %5190 = vpow2.f32 %v3126_v57  ;;  %v3275_v50 = vmul.f32 1.050701, %v3243_v34 }
 0x623   : > { %v3274_v4 = vmul.f32 1.050701, %v3242_v12  ;;  %5192 = vpow2.f32 %v3124_v22 }
 0x624   : > { %v5187_v39 = vpop.eup %5186 }
 0x625   : > { %v5189_v9 = vpop.eup %5188  ;;  %v4228_v44 = vadd.f32 -1.0, %v5187_v39  ;;  %v4663_v59 = vpop.f32.mrb[104].mxu0  ;;  %4708 = vmatprep.mubr.msk.f32.mxu1 %vm293_vm0, %v3274_v4 }
 0x626   : > { %v4227_v5 = vadd.f32 -1.0, %v5189_v9  ;;  %v2967_v54 = vadd.f32 %v6774_v1, %v4663_v59  ;;  %v2961_v20 = vpop.f32.mrb[105].mxu0  ;;  %4709 = vmatmul.mubr.msk.f32.gmra.mrb[98].mxu1 %vm293_vm0, %v3275_v50 }
 0x627   : > { %v3213_v51 = vmul.f32 1.6732632, %v4228_v44  ;;  %v2962_v14 = vadd.f32 %v6774_v1, %v2961_v20 }
 0x628   : > { %v3212_v15 = vmul.f32 1.6732632, %v4227_v5  ;;  %v3130_v41 = vmul.f32 1.442695, %v2967_v54  ;;  %vm3089_vm12 = vcmp.gt.f32.partialorder %v2967_v54, 0.0 }
 0x629   : > { %v3245_v25 = vsel %vm3085_vm8, %v2947_v48, %v3213_v51  ;;  %v3128_v47 = vmul.f32 1.442695, %v2962_v14  ;;  %vm3088_vm13 = vcmp.gt.f32.partialorder %v2962_v14, 0.0 }
 0x62a   : > { %v3244_v7 = vsel %vm3084_vm9, %v2942_v6, %v3212_v15  ;;  %5194 = vpow2.f32 %v3130_v41  ;;  %v3277_v46 = vmul.f32 1.050701, %v3245_v25 }
 0x62b   : > { %v3276_v24 = vmul.f32 1.050701, %v3244_v7  ;;  %5196 = vpow2.f32 %v3128_v47 }
 0x62c   : > { %v5191_v49 = vpop.eup %5190 }
 0x62d   : > { %v5193_v56 = vpop.eup %5192  ;;  %v4230_v40 = vadd.f32 -1.0, %v5191_v49  ;;  %v4666_v35 = vpop.f32.mrb[106].mxu0  ;;  %4711 = vmatprep.mubr.msk.f32.mxu1 %vm293_vm0, %v3276_v24 }
 0x62e   : > { %v4229_v29 = vadd.f32 -1.0, %v5193_v56  ;;  %v2977_v3 = vadd.f32 %v6774_v1, %v4666_v35  ;;  %v2971_v58 = vpop.f32.mrb[107].mxu0  ;;  %4712 = vmatmul.mubr.msk.f32.gmra.mrb[100].mxu1 %vm293_vm0, %v3277_v46 }
 0x62f   : > { %v3215_v19 = vmul.f32 1.6732632, %v4230_v40  ;;  %v2972_v60 = vadd.f32 %v6774_v1, %v2971_v58 }
 0x630   : > { %v3214_v33 = vmul.f32 1.6732632, %v4229_v29  ;;  %v3134_v30 = vmul.f32 1.442695, %v2977_v3  ;;  %vm3091_vm14 = vcmp.gt.f32.partialorder %v2977_v3, 0.0 }
 0x631   : > { %v3247_v53 = vsel %vm3087_vm10, %v2957_v17, %v3215_v19  ;;  %v3132_v45 = vmul.f32 1.442695, %v2972_v60  ;;  %vm3090_vm15 = vcmp.gt.f32.partialorder %v2972_v60, 0.0 }
 0x632   : > { %v3246_v27 = vsel %vm3086_vm11, %v2952_v36, %v3214_v33  ;;  %5198 = vpow2.f32 %v3134_v30  ;;  %v3279_v13 = vmul.f32 1.050701, %v3247_v53 }
 0x633   : > { %v3278_v43 = vmul.f32 1.050701, %v3246_v27  ;;  %5200 = vpow2.f32 %v3132_v45 }
 0x634   : > { %v5195_v28 = vpop.eup %5194 }
 0x635   : > { %v5197_v26 = vpop.eup %5196  ;;  %v4232_v52 = vadd.f32 -1.0, %v5195_v28  ;;  %v4669_v62 = vpop.f32.mrb[108].mxu0  ;;  %4714 = vmatprep.mubr.msk.f32.mxu1 %vm293_vm0, %v3278_v43 }
 0x636   : > { %v4231_v48 = vadd.f32 -1.0, %v5197_v26  ;;  %v2987_v0 = vadd.f32 %v6774_v1, %v4669_v62  ;;  %v2981_v18 = vpop.f32.mrb[109].mxu0  ;;  %4715 = vmatmul.mubr.msk.f32.gmra.mrb[102].mxu1 %vm293_vm0, %v3279_v13 }
 0x637   : > { %v3217_v6 = vmul.f32 1.6732632, %v4232_v52  ;;  %v2982_v42 = vadd.f32 %v6774_v1, %v2981_v18 }
 0x638   : > { %v3216_v38 = vmul.f32 1.6732632, %v4231_v48  ;;  %v3138_v21 = vmul.f32 1.442695, %v2987_v0  ;;  %vm3093_vm1 = vcmp.gt.f32.partialorder %v2987_v0, 0.0 }
 0x639   : > { %v3249_v16 = vsel %vm3089_vm12, %v2967_v54, %v3217_v6  ;;  %v3136_v55 = vmul.f32 1.442695, %v2982_v42  ;;  %vm3092_vm2 = vcmp.gt.f32.partialorder %v2982_v42, 0.0 }
 0x63a   : > { %v3248_v61 = vsel %vm3088_vm13, %v2962_v14, %v3216_v38  ;;  %5202 = vpow2.f32 %v3138_v21  ;;  %v3281_v32 = vmul.f32 1.050701, %v3249_v16 }
 0x63b   : > { %v3280_v11 = vmul.f32 1.050701, %v3248_v61  ;;  %5204 = vpow2.f32 %v3136_v55 }
 0x63c   : > { %v5199_v63 = vpop.eup %5198 }
 0x63d   : > { %v5201_v37 = vpop.eup %5200  ;;  %v4234_v31 = vadd.f32 -1.0, %v5199_v63  ;;  %v4672_v8 = vpop.f32.mrb[110].mxu0  ;;  %4717 = vmatprep.mubr.msk.f32.mxu1 %vm293_vm0, %v3280_v11 }
 0x63e   : > { %v4233_v17 = vadd.f32 -1.0, %v5201_v37  ;;  %v2997_v23 = vadd.f32 %v6774_v1, %v4672_v8  ;;  %v2991_v2 = vpop.f32.mrb[111].mxu0  ;;  %4718 = vmatmul.mubr.msk.f32.gmra.mrb[104].mxu1 %vm293_vm0, %v3281_v32 }
 0x63f   : > { %v3219_v36 = vmul.f32 1.6732632, %v4234_v31  ;;  %v2992_v10 = vadd.f32 %v6774_v1, %v2991_v2 }
 0x640   : > { %v3218_v57 = vmul.f32 1.6732632, %v4233_v17  ;;  %v3142_v34 = vmul.f32 1.442695, %v2997_v23  ;;  %vm3095_vm3 = vcmp.gt.f32.partialorder %v2997_v23, 0.0 }
 0x641   : > { %v3251_v22 = vsel %vm3091_vm14, %v2977_v3, %v3219_v36  ;;  %v3140_v12 = vmul.f32 1.442695, %v2992_v10  ;;  %vm3094_vm4 = vcmp.gt.f32.partialorder %v2992_v10, 0.0 }
 0x642   : > { %v3250_v4 = vsel %vm3090_vm15, %v2972_v60, %v3218_v57  ;;  %5206 = vpow2.f32 %v3142_v34  ;;  %v3283_v9 = vmul.f32 1.050701, %v3251_v22 }
 0x643   : > { %v3282_v39 = vmul.f32 1.050701, %v3250_v4  ;;  %5208 = vpow2.f32 %v3140_v12 }
 0x644   : > { %v5203_v50 = vpop.eup %5202 }
 0x645   : > { %v5205_v44 = vpop.eup %5204  ;;  %v4236_v59 = vadd.f32 -1.0, %v5203_v50  ;;  %v4675_v5 = vpop.f32.mrb[112].mxu0  ;;  %4720 = vmatprep.mubr.msk.f32.mxu1 %vm293_vm0, %v3282_v39 }
 0x646   : > { %v4235_v54 = vadd.f32 -1.0, %v5205_v44  ;;  %v3007_v20 = vadd.f32 %v6774_v1, %v4675_v5  ;;  %v3001_v51 = vpop.f32.mrb[113].mxu0  ;;  %4721 = vmatmul.mubr.msk.f32.gmra.mrb[106].mxu1 %vm293_vm0, %v3283_v9 }
 0x647   : > { %v3221_v14 = vmul.f32 1.6732632, %v4236_v59  ;;  %v3002_v15 = vadd.f32 %v6774_v1, %v3001_v51 }
 0x648   : > { %v3220_v41 = vmul.f32 1.6732632, %v4235_v54  ;;  %v3146_v25 = vmul.f32 1.442695, %v3007_v20  ;;  %vm3097_vm5 = vcmp.gt.f32.partialorder %v3007_v20, 0.0 }
 0x649   : > { %v3253_v47 = vsel %vm3093_vm1, %v2987_v0, %v3221_v14  ;;  %v3144_v7 = vmul.f32 1.442695, %v3002_v15  ;;  %vm3096_vm6 = vcmp.gt.f32.partialorder %v3002_v15, 0.0 }
 0x64a   : > { %v3252_v24 = vsel %vm3092_vm2, %v2982_v42, %v3220_v41  ;;  %5210 = vpow2.f32 %v3146_v25  ;;  %v3285_v56 = vmul.f32 1.050701, %v3253_v47 }
 0x64b   : > { %v3284_v49 = vmul.f32 1.050701, %v3252_v24  ;;  %5212 = vpow2.f32 %v3144_v7 }
 0x64c   : > { %v5207_v46 = vpop.eup %5206 }
 0x64d   : > { %v5209_v40 = vpop.eup %5208  ;;  %v4238_v35 = vadd.f32 -1.0, %v5207_v46  ;;  %v4678_v29 = vpop.f32.mrb[114].mxu0  ;;  %4723 = vmatprep.mubr.msk.f32.mxu1 %vm293_vm0, %v3284_v49 }
 0x64e   : > { %v4237_v3 = vadd.f32 -1.0, %v5209_v40  ;;  %v3017_v58 = vadd.f32 %v6774_v1, %v4678_v29  ;;  %v3011_v19 = vpop.f32.mrb[115].mxu0  ;;  %4724 = vmatmul.mubr.msk.f32.gmra.mrb[108].mxu1 %vm293_vm0, %v3285_v56 }
 0x64f   : > { %v3223_v60 = vmul.f32 1.6732632, %v4238_v35  ;;  %v3012_v33 = vadd.f32 %v6774_v1, %v3011_v19 }
 0x650   : > { %v3222_v30 = vmul.f32 1.6732632, %v4237_v3  ;;  %v3150_v53 = vmul.f32 1.442695, %v3017_v58  ;;  %vm3099_vm7 = vcmp.gt.f32.partialorder %v3017_v58, 0.0 }
 0x651   : > { %v3255_v45 = vsel %vm3095_vm3, %v2997_v23, %v3223_v60  ;;  %v3148_v27 = vmul.f32 1.442695, %v3012_v33  ;;  %vm3098_vm8 = vcmp.gt.f32.partialorder %v3012_v33, 0.0 }
 0x652   : > { %v3254_v43 = vsel %vm3094_vm4, %v2992_v10, %v3222_v30  ;;  %5214 = vpow2.f32 %v3150_v53  ;;  %v3287_v26 = vmul.f32 1.050701, %v3255_v45 }
 0x653   : > { %v3286_v28 = vmul.f32 1.050701, %v3254_v43  ;;  %5216 = vpow2.f32 %v3148_v27 }
 0x654   : > { %v5211_v13 = vpop.eup %5210 }
 0x655   : > { %v5213_v52 = vpop.eup %5212  ;;  %v4240_v62 = vadd.f32 -1.0, %v5211_v13  ;;  %v4681_v48 = vpop.f32.mrb[116].mxu0  ;;  %4726 = vmatprep.mubr.msk.f32.mxu1 %vm293_vm0, %v3286_v28 }
 0x656   : > { %v4239_v0 = vadd.f32 -1.0, %v5213_v52  ;;  %v3027_v18 = vadd.f32 %v6774_v1, %v4681_v48  ;;  %v3021_v6 = vpop.f32.mrb[117].mxu0  ;;  %4727 = vmatmul.mubr.msk.f32.gmra.mrb[110].mxu1 %vm293_vm0, %v3287_v26 }
 0x657   : > { %v3225_v42 = vmul.f32 1.6732632, %v4240_v62  ;;  %v3022_v38 = vadd.f32 %v6774_v1, %v3021_v6 }
 0x658   : > { %v3224_v21 = vmul.f32 1.6732632, %v4239_v0  ;;  %v3154_v16 = vmul.f32 1.442695, %v3027_v18  ;;  %vm3101_vm9 = vcmp.gt.f32.partialorder %v3027_v18, 0.0 }
 0x659   : > { %v3257_v55 = vsel %vm3097_vm5, %v3007_v20, %v3225_v42  ;;  %v3152_v61 = vmul.f32 1.442695, %v3022_v38  ;;  %vm3100_vm10 = vcmp.gt.f32.partialorder %v3022_v38, 0.0 }
 0x65a   : > { %v3256_v11 = vsel %vm3096_vm6, %v3002_v15, %v3224_v21  ;;  %5218 = vpow2.f32 %v3154_v16  ;;  %v3289_v37 = vmul.f32 1.050701, %v3257_v55 }
 0x65b   : > { %v3288_v63 = vmul.f32 1.050701, %v3256_v11  ;;  %5220 = vpow2.f32 %v3152_v61 }
 0x65c   : > { %v5215_v32 = vpop.eup %5214 }
 0x65d   : > { %v5217_v31 = vpop.eup %5216  ;;  %v4242_v8 = vadd.f32 -1.0, %v5215_v32  ;;  %v4684_v17 = vpop.f32.mrb[118].mxu0  ;;  %4729 = vmatprep.mubr.msk.f32.mxu1 %vm293_vm0, %v3288_v63 }
 0x65e   : > { %v4241_v23 = vadd.f32 -1.0, %v5217_v31  ;;  %v3037_v2 = vadd.f32 %v6774_v1, %v4684_v17  ;;  %v3031_v36 = vpop.f32.mrb[119].mxu0  ;;  %4730 = vmatmul.mubr.msk.f32.gmra.mrb[112].mxu1 %vm293_vm0, %v3289_v37 }
 0x65f   : > { %v3227_v10 = vmul.f32 1.6732632, %v4242_v8  ;;  %v3032_v57 = vadd.f32 %v6774_v1, %v3031_v36 }
 0x660   : > { %v3226_v34 = vmul.f32 1.6732632, %v4241_v23  ;;  %v3158_v22 = vmul.f32 1.442695, %v3037_v2  ;;  %vm3103_vm11 = vcmp.gt.f32.partialorder %v3037_v2, 0.0 }
 0x661   : > { %v3259_v12 = vsel %vm3099_vm7, %v3017_v58, %v3227_v10  ;;  %v3156_v4 = vmul.f32 1.442695, %v3032_v57  ;;  %vm3102_vm12 = vcmp.gt.f32.partialorder %v3032_v57, 0.0 }
 0x662   : > { %v3258_v39 = vsel %vm3098_vm8, %v3012_v33, %v3226_v34  ;;  %5222 = vpow2.f32 %v3158_v22  ;;  %v3291_v44 = vmul.f32 1.050701, %v3259_v12 }
 0x663   : > { %v3290_v50 = vmul.f32 1.050701, %v3258_v39  ;;  %5224 = vpow2.f32 %v3156_v4 }
 0x664   : > { %v5219_v9 = vpop.eup %5218 }
 0x665   : > { %v5221_v59 = vpop.eup %5220  ;;  %v4244_v5 = vadd.f32 -1.0, %v5219_v9  ;;  %v4687_v54 = vpop.f32.mrb[120].mxu0  ;;  %4732 = vmatprep.mubr.msk.f32.mxu1 %vm293_vm0, %v3290_v50 }
 0x666   : > { %v4243_v20 = vadd.f32 -1.0, %v5221_v59  ;;  %v3047_v51 = vadd.f32 %v6774_v1, %v4687_v54  ;;  %v3041_v14 = vpop.f32.mrb[121].mxu0  ;;  %4733 = vmatmul.mubr.msk.f32.gmra.mrb[114].mxu1 %vm293_vm0, %v3291_v44 }
 0x667   : > { %v3229_v15 = vmul.f32 1.6732632, %v4244_v5  ;;  %v3042_v41 = vadd.f32 %v6774_v1, %v3041_v14 }
 0x668   : > { %v3228_v25 = vmul.f32 1.6732632, %v4243_v20  ;;  %v3162_v47 = vmul.f32 1.442695, %v3047_v51  ;;  %vm3105_vm13 = vcmp.gt.f32.partialorder %v3047_v51, 0.0 }
 0x669   : > { %v3261_v7 = vsel %vm3101_vm9, %v3027_v18, %v3229_v15  ;;  %v3160_v24 = vmul.f32 1.442695, %v3042_v41  ;;  %vm3104_vm14 = vcmp.gt.f32.partialorder %v3042_v41, 0.0 }
 0x66a   : > { %v3260_v49 = vsel %vm3100_vm10, %v3022_v38, %v3228_v25  ;;  %5226 = vpow2.f32 %v3162_v47  ;;  %v3293_v40 = vmul.f32 1.050701, %v3261_v7 }
 0x66b   : > { %v3292_v46 = vmul.f32 1.050701, %v3260_v49  ;;  %5228 = vpow2.f32 %v3160_v24 }
 0x66c   : > { %v5223_v56 = vpop.eup %5222 }
 0x66d   : > { %v5225_v35 = vpop.eup %5224  ;;  %v4246_v29 = vadd.f32 -1.0, %v5223_v56  ;;  %v4690_v3 = vpop.f32.mrb[122].mxu0  ;;  %4735 = vmatprep.mubr.msk.f32.mxu1 %vm293_vm0, %v3292_v46 }
 0x66e   : > { %v4245_v58 = vadd.f32 -1.0, %v5225_v35  ;;  %v3057_v19 = vadd.f32 %v6774_v1, %v4690_v3  ;;  %v3051_v60 = vpop.f32.mrb[123].mxu0  ;;  %4736 = vmatmul.mubr.msk.f32.gmra.mrb[116].mxu1 %vm293_vm0, %v3293_v40 }
 0x66f   : > { %v3231_v33 = vmul.f32 1.6732632, %v4246_v29  ;;  %v3052_v30 = vadd.f32 %v6774_v1, %v3051_v60 }
 0x670   : > { %v3230_v53 = vmul.f32 1.6732632, %v4245_v58  ;;  %v3166_v45 = vmul.f32 1.442695, %v3057_v19  ;;  %vm3107_vm15 = vcmp.gt.f32.partialorder %v3057_v19, 0.0 }
 0x671   : > { %v3263_v27 = vsel %vm3103_vm11, %v3037_v2, %v3231_v33  ;;  %v3164_v43 = vmul.f32 1.442695, %v3052_v30  ;;  %vm3106_vm1 = vcmp.gt.f32.partialorder %v3052_v30, 0.0 }
 0x672   : > { %v3262_v28 = vsel %vm3102_vm12, %v3032_v57, %v3230_v53  ;;  %5230 = vpow2.f32 %v3166_v45  ;;  %v3295_v52 = vmul.f32 1.050701, %v3263_v27 }
 0x673   : > { %v3294_v13 = vmul.f32 1.050701, %v3262_v28  ;;  %5232 = vpow2.f32 %v3164_v43 }
 0x674   : > { %v5227_v26 = vpop.eup %5226 }
 0x675   : > { %v5229_v62 = vpop.eup %5228  ;;  %v4248_v48 = vadd.f32 -1.0, %v5227_v26  ;;  %v4693_v0 = vpop.f32.mrb[124].mxu0  ;;  %4738 = vmatprep.mubr.msk.f32.mxu1 %vm293_vm0, %v3294_v13 }
 0x676   : > { %v4247_v18 = vadd.f32 -1.0, %v5229_v62  ;;  %v3067_v6 = vadd.f32 %v6774_v1, %v4693_v0  ;;  %v3061_v42 = vpop.f32.mrb[125].mxu0  ;;  %4739 = vmatmul.mubr.msk.f32.gmra.mrb[118].mxu1 %vm293_vm0, %v3295_v52 }
 0x677   : > { %v3233_v38 = vmul.f32 1.6732632, %v4248_v48  ;;  %v3062_v21 = vadd.f32 %v6774_v1, %v3061_v42 }
 0x678   : > { %v3232_v16 = vmul.f32 1.6732632, %v4247_v18  ;;  %v3170_v55 = vmul.f32 1.442695, %v3067_v6  ;;  %vm3109_vm2 = vcmp.gt.f32.partialorder %v3067_v6, 0.0 }
 0x679   : > { %v3265_v61 = vsel %vm3105_vm13, %v3047_v51, %v3233_v38  ;;  %v3168_v11 = vmul.f32 1.442695, %v3062_v21  ;;  %vm3108_vm3 = vcmp.gt.f32.partialorder %v3062_v21, 0.0 }
 0x67a   : > { %v3264_v63 = vsel %vm3104_vm14, %v3042_v41, %v3232_v16  ;;  %5234 = vpow2.f32 %v3170_v55  ;;  %v3297_v31 = vmul.f32 1.050701, %v3265_v61 }
 0x67b   : > { %v3296_v32 = vmul.f32 1.050701, %v3264_v63  ;;  %5236 = vpow2.f32 %v3168_v11 }
 0x67c   : > { %v5231_v37 = vpop.eup %5230 }
 0x67d   : > { %v5233_v8 = vpop.eup %5232  ;;  %v4250_v17 = vadd.f32 -1.0, %v5231_v37  ;;  %v4696_v23 = vpop.f32.mrb[126].mxu0  ;;  %4741 = vmatprep.mubr.msk.f32.mxu1 %vm293_vm0, %v3296_v32 }
 0x67e   : > { %v4249_v2 = vadd.f32 -1.0, %v5233_v8  ;;  %v3077_v36 = vadd.f32 %v6774_v1, %v4696_v23  ;;  %v3071_v10 = vpop.f32.mrb[127].mxu0  ;;  %4742 = vmatmul.mubr.msk.f32.gmra.mrb[120].mxu1 %vm293_vm0, %v3297_v31 }
 0x67f   : > { %v3235_v57 = vmul.f32 1.6732632, %v4250_v17  ;;  %v3072_v34 = vadd.f32 %v6774_v1, %v3071_v10 }
 0x680   : > { %v3234_v22 = vmul.f32 1.6732632, %v4249_v2  ;;  %v3174_v12 = vmul.f32 1.442695, %v3077_v36  ;;  %vm3111_vm4 = vcmp.gt.f32.partialorder %v3077_v36, 0.0 }
 0x681   : > { %v3267_v4 = vsel %vm3107_vm15, %v3057_v19, %v3235_v57  ;;  %v3172_v39 = vmul.f32 1.442695, %v3072_v34  ;;  %vm3110_vm5 = vcmp.gt.f32.partialorder %v3072_v34, 0.0  ;;  %v6843_v19 = vld [vmem:[%s7177_s3 + $0x1] ss:$0 sm:$0xff] }
 0x682   : > { %v3266_v50 = vsel %vm3106_vm1, %v3052_v30, %v3234_v22  ;;  %5238 = vpow2.f32 %v3174_v12  ;;  %v3299_v59 = vmul.f32 1.050701, %v3267_v4 }
 0x683   : > { %v3298_v9 = vmul.f32 1.050701, %v3266_v50  ;;  %5240 = vpow2.f32 %v3172_v39 }
 0x684   : > { %v5235_v44 = vpop.eup %5234 }
 0x685   : > { %v5237_v5 = vpop.eup %5236  ;;  %v4252_v54 = vadd.f32 -1.0, %v5235_v44  ;;  %4744 = vmatprep.mubr.msk.f32.mxu1 %vm293_vm0, %v3298_v9 }
 0x686   : > { %v4251_v20 = vadd.f32 -1.0, %v5237_v5  ;;  %4745 = vmatmul.mubr.msk.f32.gmra.mrb[122].mxu1 %vm293_vm0, %v3299_v59 }
 0x687   : > { %v3237_v1 = vmul.f32 1.6732632, %v4252_v54 }
 0x688   : > { %v3236_v51 = vmul.f32 1.6732632, %v4251_v20 }
 0x689   : > { %v3269_v14 = vsel %vm3109_vm2, %v3067_v6, %v3237_v1 }
 0x68a   : > { %v3268_v15 = vsel %vm3108_vm3, %v3062_v21, %v3236_v51  ;;  %v3301_v47 = vmul.f32 1.050701, %v3269_v14 }
 0x68b   : > { %v3300_v41 = vmul.f32 1.050701, %v3268_v15 }
 0x68c   : > { %v5239_v25 = vpop.eup %5238 }
 0x68d   : > { %v5241_v7 = vpop.eup %5240  ;;  %v4254_v24 = vadd.f32 -1.0, %v5239_v25  ;;  %4747 = vmatprep.mubr.msk.f32.mxu1 %vm293_vm0, %v3300_v41 }
 0x68e   : > { %v4253_v49 = vadd.f32 -1.0, %v5241_v7  ;;  %4748 = vmatmul.mubr.msk.f32.gmra.mrb[124].mxu1 %vm293_vm0, %v3301_v47 }
 0x68f   : > { %v3239_v46 = vmul.f32 1.6732632, %v4254_v24 }
 0x690   : > { %v3238_v56 = vmul.f32 1.6732632, %v4253_v49 }
 0x691   : > { %v3271_v40 = vsel %vm3111_vm4, %v3077_v36, %v3239_v46 }
 0x692   : > { %v3270_v35 = vsel %vm3110_vm5, %v3072_v34, %v3238_v56  ;;  %v3303_v3 = vmul.f32 1.050701, %v3271_v40 }
 0x693   : > { %v3302_v29 = vmul.f32 1.050701, %v3270_v35 }
 0x695   : > { %4750 = vmatprep.mubr.msk.f32.mxu1 %vm293_vm0, %v3302_v29 }
 0x696   : > { %4751 = vmatmul.mubr.msk.f32.gmra.mrb[126].mxu1 %vm293_vm0, %v3303_v3 }
 0x6f1   : > { %v4707_v58 = vpop.f32.mrb[96].mxu1 }
 0x6f2   : > { %v6846_v60 = vadd.f32 %v6843_v19, %v4707_v58  ;;  %v3466_v33 = vpop.f32.mrb[97].mxu1 }
 0x6f3   : > { %v6849_v30 = vadd.f32 %v6843_v19, %v3466_v33 }
 0x6f4   : > { %v3626_v53 = vmul.f32 %v6846_v60, %v6846_v60 }
 0x6f5   : > { %v3625_v45 = vmul.f32 %v6849_v30, %v6849_v30 }
 0x6f6   : > { %v3658_v27 = vsel %vm293_vm0, %v3626_v53, 0.0 }
 0x6f7   : > { %v3657_v43 = vsel %vm293_vm0, %v3625_v45, 0.0 }
 0x6f8   : > { %v3659_v28 = vadd.f32 %v3658_v27, %v3657_v43 }
 0x6f9   : > { %v4710_v13 = vpop.f32.mrb[98].mxu1 }
 0x6fa   : > { %v3660_v26 = vrot.slane %v3659_v28, 4  ;;  %v6858_v52 = vadd.f32 %v6843_v19, %v4710_v13  ;;  %v3476_v62 = vpop.f32.mrb[99].mxu1 }
 0x6fb   : > { %v6861_v48 = vadd.f32 %v6843_v19, %v3476_v62 }
 0x6fc   : > { %v3661_v0 = vadd.f32 %v3660_v26, %v3659_v28  ;;  %v3628_v18 = vmul.f32 %v6858_v52, %v6858_v52  ;;  %v5276_v26 = vld [vmem:[%s5380_s7] sm:$0xff] }
 0x6fd   : > { %v3627_v6 = vmul.f32 %v6861_v48, %v6861_v48 }
 0x6fe   : > { %v3662_v42 = vrot.slane %v3661_v0, 2  ;;  %v3667_v38 = vsel %vm293_vm0, %v3628_v18, 0.0 }
 0x6ff   : > { %v3666_v21 = vsel %vm293_vm0, %v3627_v6, 0.0 }
 0x700   : > { %v3663_v16 = vadd.f32 %v3662_v42, %v3661_v0  ;;  %v3668_v55 = vadd.f32 %v3667_v38, %v3666_v21  ;;  %v5277_v0 = vld [vmem:[%s5380_s7 + $0x8] sm:$0xff] }
 0x701   : > { %v4713_v61 = vpop.f32.mrb[100].mxu1 }
 0x702   : > { %v3664_v11 = vrot.slane %v3663_v16, 1  ;;  %v3669_v63 = vrot.slane %v3668_v55, 4  ;;  %v6870_v32 = vadd.f32 %v6843_v19, %v4713_v61  ;;  %v3486_v37 = vpop.f32.mrb[101].mxu1 }
 0x703   : > { %v6873_v31 = vadd.f32 %v6843_v19, %v3486_v37 }
 0x704   : > { %v3665_v8 = vadd.f32 %v3664_v11, %v3663_v16  ;;  %v3670_v17 = vadd.f32 %v3669_v63, %v3668_v55  ;;  %v3630_v23 = vmul.f32 %v6870_v32, %v6870_v32 }
 0x705   : > { %v3629_v2 = vmul.f32 %v6873_v31, %v6873_v31 }
 0x706   : > { %v3801_v36 = vmax.f32 %v3665_v8, 1e-24  ;;  %v3671_v10 = vrot.slane %v3670_v17, 2  ;;  %v3676_v57 = vsel %vm293_vm0, %v3630_v23, 0.0 }
 0x707   : > { %v3675_v34 = vsel %vm293_vm0, %v3629_v2, 0.0 }
 0x708   : > { %5242 = vrsqrt.f32 %v3801_v36  ;;  %v3672_v22 = vadd.f32 %v3671_v10, %v3670_v17  ;;  %v3677_v12 = vadd.f32 %v3676_v57, %v3675_v34 }
 0x709   : > { %v4716_v4 = vpop.f32.mrb[102].mxu1 }
 0x70a   : > { %v3673_v39 = vrot.slane %v3672_v22, 1  ;;  %v3678_v50 = vrot.slane %v3677_v12, 4  ;;  %v6882_v9 = vadd.f32 %v6843_v19, %v4716_v4  ;;  %v3496_v44 = vpop.f32.mrb[103].mxu1  ;;  %v5279_v4 = vld [vmem:[%s5380_s7 + $0x18] sm:$0xff] }
 0x70b   : > { %v6885_v59 = vadd.f32 %v6843_v19, %v3496_v44 }
 0x70c   : > { %v3674_v5 = vadd.f32 %v3673_v39, %v3672_v22  ;;  %v3679_v54 = vadd.f32 %v3678_v50, %v3677_v12  ;;  %v3632_v20 = vmul.f32 %v6882_v9, %v6882_v9  ;;  %v5278_v22 = vld [vmem:[%s5380_s7 + $0x10] sm:$0xff] }
 0x70d   : > { %v3631_v1 = vmul.f32 %v6885_v59, %v6885_v59 }
 0x70e   : > { %v3802_v51 = vmax.f32 %v3674_v5, 1e-24  ;;  %v3680_v14 = vrot.slane %v3679_v54, 2  ;;  %v3685_v15 = vsel %vm293_vm0, %v3632_v20, 0.0 }
 0x70f   : > { %v3684_v41 = vsel %vm293_vm0, %v3631_v1, 0.0 }
 0x710   : > { %5244 = vrsqrt.f32 %v3802_v51  ;;  %v3681_v25 = vadd.f32 %v3680_v14, %v3679_v54  ;;  %v3686_v47 = vadd.f32 %v3685_v15, %v3684_v41 }
 0x711   : > { %v4719_v7 = vpop.f32.mrb[104].mxu1 }
 0x712   : > { %v5243_v24 = vpop.eup %5242  ;;  %v3682_v49 = vrot.slane %v3681_v25, 1  ;;  %v3687_v46 = vrot.slane %v3686_v47, 4  ;;  %v6894_v56 = vadd.f32 %v6843_v19, %v4719_v7  ;;  %v3506_v40 = vpop.f32.mrb[105].mxu1 }
 0x713   : > { %v3833_v35 = vmul.f32 0.1, %v5243_v24  ;;  %v6897_v29 = vadd.f32 %v6843_v19, %v3506_v40 }
 0x714   : > { %v3683_v3 = vadd.f32 %v3682_v49, %v3681_v25  ;;  %v3688_v58 = vadd.f32 %v3687_v46, %v3686_v47  ;;  %v3634_v33 = vmul.f32 %v6894_v56, %v6894_v56 }
 0x715   : > { %v3849_v53 = vmul.f32 %v3833_v35, %v6849_v30  ;;  %v3850_v45 = vmul.f32 %v3833_v35, %v6846_v60  ;;  %v3633_v27 = vmul.f32 %v6897_v29, %v6897_v29 }
 0x716   : > { %v3803_v43 = vmax.f32 %v3683_v3, 1e-24  ;;  %v3689_v28 = vrot.slane %v3688_v58, 2  ;;  %v3694_v13 = vsel %vm293_vm0, %v3634_v33, 0.0  ;;  %v5280_v3 = vld [vmem:[%s5380_s7 + $0x20] sm:$0xff]  ;;  %v5281_v33 = vld [vmem:[%s5380_s7 + $0x28] sm:$0xff] }
 0x717   : > { %v3881_v62 = vadd.f32 %v5276_v26, %v3849_v53  ;;  %v3882_v30 = vadd.f32 %v5277_v0, %v3850_v45  ;;  %v3693_v60 = vsel %vm293_vm0, %v3633_v27, 0.0 }
 0x718   : > { %5246 = vrsqrt.f32 %v3803_v43  ;;  %v3690_v18 = vadd.f32 %v3689_v28, %v3688_v58  ;;  %v3695_v6 = vadd.f32 %v3694_v13, %v3693_v60 }
 0x719   : > { %3913 = vst.msk [vmem:[%s6909_s26] sm:$0xff] %vm293_vm0, %v3881_v62  ;;  %3914 = vst.msk [vmem:[%s6909_s26 + $0x8] sm:$0xff] %vm293_vm0, %v3882_v30  ;;  %v4722_v42 = vpop.f32.mrb[106].mxu1 }
 0x71a   : > { %v5245_v38 = vpop.eup %5244  ;;  %v3691_v21 = vrot.slane %v3690_v18, 1  ;;  %v3696_v16 = vrot.slane %v3695_v6, 4  ;;  %v6920_v55 = vadd.f32 %v6843_v19, %v4722_v42  ;;  %v3516_v61 = vpop.f32.mrb[107].mxu1 }
 0x71b   : > { %v3834_v11 = vmul.f32 0.1, %v5245_v38  ;;  %v6923_v63 = vadd.f32 %v6843_v19, %v3516_v61 }
 0x71c   : > { %v3692_v37 = vadd.f32 %v3691_v21, %v3690_v18  ;;  %v3697_v8 = vadd.f32 %v3696_v16, %v3695_v6  ;;  %v3636_v17 = vmul.f32 %v6920_v55, %v6920_v55 }
 0x71d   : > { %v3851_v23 = vmul.f32 %v3834_v11, %v6861_v48  ;;  %v3852_v2 = vmul.f32 %v3834_v11, %v6858_v52  ;;  %v3635_v36 = vmul.f32 %v6923_v63, %v6923_v63 }
 0x71e   : > { %v3804_v10 = vmax.f32 %v3692_v37, 1e-24  ;;  %v3698_v57 = vrot.slane %v3697_v8, 2  ;;  %v3703_v34 = vsel %vm293_vm0, %v3636_v17, 0.0  ;;  %v5282_v37 = vld [vmem:[%s5380_s7 + $0x30] sm:$0xff]  ;;  %v5283_v17 = vld [vmem:[%s5380_s7 + $0x38] sm:$0xff] }
 0x71f   : > { %v3883_v12 = vadd.f32 %v5278_v22, %v3851_v23  ;;  %v3884_v39 = vadd.f32 %v5279_v4, %v3852_v2  ;;  %v3702_v50 = vsel %vm293_vm0, %v3635_v36, 0.0 }
 0x720   : > { %5248 = vrsqrt.f32 %v3804_v10  ;;  %v3699_v44 = vadd.f32 %v3698_v57, %v3697_v8  ;;  %v3704_v5 = vadd.f32 %v3703_v34, %v3702_v50 }
 0x721   : > { %3915 = vst.msk [vmem:[%s6909_s26 + $0x10] sm:$0xff] %vm293_vm0, %v3883_v12  ;;  %3916 = vst.msk [vmem:[%s6909_s26 + $0x18] sm:$0xff] %vm293_vm0, %v3884_v39  ;;  %v4725_v52 = vpop.f32.mrb[108].mxu1 }
 0x722   : > { %v5247_v48 = vpop.eup %5246  ;;  %v3700_v54 = vrot.slane %v3699_v44, 1  ;;  %v3705_v20 = vrot.slane %v3704_v5, 4  ;;  %v6940_v1 = vadd.f32 %v6843_v19, %v4725_v52  ;;  %v3526_v51 = vpop.f32.mrb[109].mxu1 }
 0x723   : > { %v3835_v14 = vmul.f32 0.1, %v5247_v48  ;;  %v6943_v15 = vadd.f32 %v6843_v19, %v3526_v51 }
 0x724   : > { %v3701_v41 = vadd.f32 %v3700_v54, %v3699_v44  ;;  %v3706_v25 = vadd.f32 %v3705_v20, %v3704_v5  ;;  %v3638_v47 = vmul.f32 %v6940_v1, %v6940_v1 }
 0x725   : > { %v3853_v7 = vmul.f32 %v3835_v14, %v6873_v31  ;;  %v3854_v24 = vmul.f32 %v3835_v14, %v6870_v32  ;;  %v3637_v49 = vmul.f32 %v6943_v15, %v6943_v15 }
 0x726   : > { %v3805_v46 = vmax.f32 %v3701_v41, 1e-24  ;;  %v3707_v40 = vrot.slane %v3706_v25, 2  ;;  %v3712_v35 = vsel %vm293_vm0, %v3638_v47, 0.0  ;;  %v5284_v41 = vld [vmem:[%s5380_s7 + $0x40] sm:$0xff]  ;;  %v5285_v47 = vld [vmem:[%s5380_s7 + $0x48] sm:$0xff] }
 0x727   : > { %v3885_v58 = vadd.f32 %v5280_v3, %v3853_v7  ;;  %v3886_v53 = vadd.f32 %v5281_v33, %v3854_v24  ;;  %v3711_v45 = vsel %vm293_vm0, %v3637_v49, 0.0 }
 0x728   : > { %5250 = vrsqrt.f32 %v3805_v46  ;;  %v3708_v27 = vadd.f32 %v3707_v40, %v3706_v25  ;;  %v3713_v43 = vadd.f32 %v3712_v35, %v3711_v45 }
 0x729   : > { %3917 = vst.msk [vmem:[%s6909_s26 + $0x20] sm:$0xff] %vm293_vm0, %v3885_v58  ;;  %3918 = vst.msk [vmem:[%s6909_s26 + $0x28] sm:$0xff] %vm293_vm0, %v3886_v53  ;;  %v4728_v32 = vpop.f32.mrb[110].mxu1 }
 0x72a   : > { %v5249_v31 = vpop.eup %5248  ;;  %v3709_v28 = vrot.slane %v3708_v27, 1  ;;  %v3714_v13 = vrot.slane %v3713_v43, 4  ;;  %v6960_v26 = vadd.f32 %v6843_v19, %v4728_v32  ;;  %v3536_v62 = vpop.f32.mrb[111].mxu1 }
 0x72b   : > { %v3836_v0 = vmul.f32 0.1, %v5249_v31  ;;  %v6963_v30 = vadd.f32 %v6843_v19, %v3536_v62 }
 0x72c   : > { %v3710_v60 = vadd.f32 %v3709_v28, %v3708_v27  ;;  %v3715_v18 = vadd.f32 %v3714_v13, %v3713_v43  ;;  %v3640_v6 = vmul.f32 %v6960_v26, %v6960_v26 }
 0x72d   : > { %v3855_v42 = vmul.f32 %v3836_v0, %v6885_v59  ;;  %v3856_v38 = vmul.f32 %v3836_v0, %v6882_v9  ;;  %v3639_v21 = vmul.f32 %v6963_v30, %v6963_v30 }
 0x72e   : > { %v3806_v16 = vmax.f32 %v3710_v60, 1e-24  ;;  %v3716_v61 = vrot.slane %v3715_v18, 2  ;;  %v3721_v11 = vsel %vm293_vm0, %v3640_v6, 0.0  ;;  %v5286_v60 = vld [vmem:[%s5380_s7 + $0x50] sm:$0xff]  ;;  %v5287_v6 = vld [vmem:[%s5380_s7 + $0x58] sm:$0xff] }
 0x72f   : > { %v3887_v8 = vadd.f32 %v5282_v37, %v3855_v42  ;;  %v3888_v23 = vadd.f32 %v5283_v17, %v3856_v38  ;;  %v3720_v2 = vsel %vm293_vm0, %v3639_v21, 0.0 }
 0x730   : > { %5252 = vrsqrt.f32 %v3806_v16  ;;  %v3717_v36 = vadd.f32 %v3716_v61, %v3715_v18  ;;  %v3722_v10 = vadd.f32 %v3721_v11, %v3720_v2 }
 0x731   : > { %3919 = vst.msk [vmem:[%s6909_s26 + $0x30] sm:$0xff] %vm293_vm0, %v3887_v8  ;;  %3920 = vst.msk [vmem:[%s6909_s26 + $0x38] sm:$0xff] %vm293_vm0, %v3888_v23  ;;  %v4731_v9 = vpop.f32.mrb[112].mxu1 }
 0x732   : > { %v5251_v59 = vpop.eup %5250  ;;  %v3718_v57 = vrot.slane %v3717_v36, 1  ;;  %v3723_v34 = vrot.slane %v3722_v10, 4  ;;  %v6980_v22 = vadd.f32 %v6843_v19, %v4731_v9  ;;  %v3546_v12 = vpop.f32.mrb[113].mxu1 }
 0x733   : > { %v3837_v4 = vmul.f32 0.1, %v5251_v59  ;;  %v6983_v39 = vadd.f32 %v6843_v19, %v3546_v12 }
 0x734   : > { %v3719_v50 = vadd.f32 %v3718_v57, %v3717_v36  ;;  %v3724_v44 = vadd.f32 %v3723_v34, %v3722_v10  ;;  %v3642_v5 = vmul.f32 %v6980_v22, %v6980_v22 }
 0x735   : > { %v3857_v52 = vmul.f32 %v3837_v4, %v6897_v29  ;;  %v3858_v48 = vmul.f32 %v3837_v4, %v6894_v56  ;;  %v3641_v54 = vmul.f32 %v6983_v39, %v6983_v39 }
 0x736   : > { %v3807_v20 = vmax.f32 %v3719_v50, 1e-24  ;;  %v3725_v51 = vrot.slane %v3724_v44, 2  ;;  %v3730_v14 = vsel %vm293_vm0, %v3642_v5, 0.0  ;;  %v5288_v50 = vld [vmem:[%s5380_s7 + $0x60] sm:$0xff]  ;;  %v5289_v5 = vld [vmem:[%s5380_s7 + $0x68] sm:$0xff] }
 0x737   : > { %v3889_v25 = vadd.f32 %v5284_v41, %v3857_v52  ;;  %v3890_v7 = vadd.f32 %v5285_v47, %v3858_v48  ;;  %v3729_v24 = vsel %vm293_vm0, %v3641_v54, 0.0 }
 0x738   : > { %5254 = vrsqrt.f32 %v3807_v20  ;;  %v3726_v49 = vadd.f32 %v3725_v51, %v3724_v44  ;;  %v3731_v46 = vadd.f32 %v3730_v14, %v3729_v24 }
 0x739   : > { %3921 = vst.msk [vmem:[%s6909_s26 + $0x40] sm:$0xff] %vm293_vm0, %v3889_v25  ;;  %3922 = vst.msk [vmem:[%s6909_s26 + $0x48] sm:$0xff] %vm293_vm0, %v3890_v7  ;;  %v4734_v56 = vpop.f32.mrb[114].mxu1 }
 0x73a   : > { %v5253_v29 = vpop.eup %5252  ;;  %v3727_v40 = vrot.slane %v3726_v49, 1  ;;  %v3732_v35 = vrot.slane %v3731_v46, 4  ;;  %v7000_v3 = vadd.f32 %v6843_v19, %v4734_v56  ;;  %v3556_v58 = vpop.f32.mrb[115].mxu1 }
 0x73b   : > { %v3838_v33 = vmul.f32 0.1, %v5253_v29  ;;  %v7003_v53 = vadd.f32 %v6843_v19, %v3556_v58 }
 0x73c   : > { %v3728_v45 = vadd.f32 %v3727_v40, %v3726_v49  ;;  %v3733_v27 = vadd.f32 %v3732_v35, %v3731_v46  ;;  %v3644_v43 = vmul.f32 %v7000_v3, %v7000_v3 }
 0x73d   : > { %v3859_v32 = vmul.f32 %v3838_v33, %v6923_v63  ;;  %v3860_v31 = vmul.f32 %v3838_v33, %v6920_v55  ;;  %v3643_v28 = vmul.f32 %v7003_v53, %v7003_v53 }
 0x73e   : > { %v3808_v13 = vmax.f32 %v3728_v45, 1e-24  ;;  %v3734_v62 = vrot.slane %v3733_v27, 2  ;;  %v3739_v0 = vsel %vm293_vm0, %v3644_v43, 0.0  ;;  %v5290_v45 = vld [vmem:[%s5380_s7 + $0x70] sm:$0xff]  ;;  %v5291_v43 = vld [vmem:[%s5380_s7 + $0x78] sm:$0xff] }
 0x73f   : > { %v3891_v18 = vadd.f32 %v5286_v60, %v3859_v32  ;;  %v3892_v42 = vadd.f32 %v5287_v6, %v3860_v31  ;;  %v3738_v38 = vsel %vm293_vm0, %v3643_v28, 0.0 }
 0x740   : > { %5256 = vrsqrt.f32 %v3808_v13  ;;  %v3735_v21 = vadd.f32 %v3734_v62, %v3733_v27  ;;  %v3740_v16 = vadd.f32 %v3739_v0, %v3738_v38 }
 0x741   : > { %3923 = vst.msk [vmem:[%s6909_s26 + $0x50] sm:$0xff] %vm293_vm0, %v3891_v18  ;;  %3924 = vst.msk [vmem:[%s6909_s26 + $0x58] sm:$0xff] %vm293_vm0, %v3892_v42  ;;  %v4737_v55 = vpop.f32.mrb[116].mxu1 }
 0x742   : > { %v5255_v63 = vpop.eup %5254  ;;  %v3736_v61 = vrot.slane %v3735_v21, 1  ;;  %v3741_v11 = vrot.slane %v3740_v16, 4  ;;  %v7020_v37 = vadd.f32 %v6843_v19, %v4737_v55  ;;  %v3566_v8 = vpop.f32.mrb[117].mxu1 }
 0x743   : > { %v3839_v17 = vmul.f32 0.1, %v5255_v63  ;;  %v7023_v23 = vadd.f32 %v6843_v19, %v3566_v8 }
 0x744   : > { %v3737_v2 = vadd.f32 %v3736_v61, %v3735_v21  ;;  %v3742_v36 = vadd.f32 %v3741_v11, %v3740_v16  ;;  %v3646_v10 = vmul.f32 %v7020_v37, %v7020_v37 }
 0x745   : > { %v3861_v9 = vmul.f32 %v3839_v17, %v6943_v15  ;;  %v3862_v59 = vmul.f32 %v3839_v17, %v6940_v1  ;;  %v3645_v57 = vmul.f32 %v7023_v23, %v7023_v23 }
 0x746   : > { %v3809_v34 = vmax.f32 %v3737_v2, 1e-24  ;;  %v3743_v12 = vrot.slane %v3742_v36, 2  ;;  %v3748_v4 = vsel %vm293_vm0, %v3646_v10, 0.0  ;;  %v5292_v2 = vld [vmem:[%s5380_s7 + $0x80] sm:$0xff]  ;;  %v5293_v10 = vld [vmem:[%s5380_s7 + $0x88] sm:$0xff] }
 0x747   : > { %v3893_v44 = vadd.f32 %v5288_v50, %v3861_v9  ;;  %v3894_v52 = vadd.f32 %v5289_v5, %v3862_v59  ;;  %v3747_v48 = vsel %vm293_vm0, %v3645_v57, 0.0 }
 0x748   : > { %5258 = vrsqrt.f32 %v3809_v34  ;;  %v3744_v54 = vadd.f32 %v3743_v12, %v3742_v36  ;;  %v3749_v20 = vadd.f32 %v3748_v4, %v3747_v48 }
 0x749   : > { %3925 = vst.msk [vmem:[%s6909_s26 + $0x60] sm:$0xff] %vm293_vm0, %v3893_v44  ;;  %3926 = vst.msk [vmem:[%s6909_s26 + $0x68] sm:$0xff] %vm293_vm0, %v3894_v52  ;;  %v4740_v1 = vpop.f32.mrb[118].mxu1 }
 0x74a   : > { %v5257_v15 = vpop.eup %5256  ;;  %v3745_v51 = vrot.slane %v3744_v54, 1  ;;  %v3750_v14 = vrot.slane %v3749_v20, 4  ;;  %v7040_v41 = vadd.f32 %v6843_v19, %v4740_v1  ;;  %v3576_v25 = vpop.f32.mrb[119].mxu1 }
 0x74b   : > { %v3840_v47 = vmul.f32 0.1, %v5257_v15  ;;  %v7043_v7 = vadd.f32 %v6843_v19, %v3576_v25 }
 0x74c   : > { %v3746_v24 = vadd.f32 %v3745_v51, %v3744_v54  ;;  %v3751_v49 = vadd.f32 %v3750_v14, %v3749_v20  ;;  %v3648_v46 = vmul.f32 %v7040_v41, %v7040_v41 }
 0x74d   : > { %v3863_v56 = vmul.f32 %v3840_v47, %v6963_v30  ;;  %v3864_v29 = vmul.f32 %v3840_v47, %v6960_v26  ;;  %v3647_v40 = vmul.f32 %v7043_v7, %v7043_v7 }
 0x74e   : > { %v3810_v35 = vmax.f32 %v3746_v24, 1e-24  ;;  %v3752_v58 = vrot.slane %v3751_v49, 2  ;;  %v3757_v33 = vsel %vm293_vm0, %v3648_v46, 0.0  ;;  %v5294_v24 = vld [vmem:[%s5380_s7 + $0x90] sm:$0xff]  ;;  %v5295_v46 = vld [vmem:[%s5380_s7 + $0x98] sm:$0xff] }
 0x74f   : > { %v3895_v27 = vadd.f32 %v5290_v45, %v3863_v56  ;;  %v3896_v32 = vadd.f32 %v5291_v43, %v3864_v29  ;;  %v3756_v31 = vsel %vm293_vm0, %v3647_v40, 0.0 }
 0x750   : > { %5260 = vrsqrt.f32 %v3810_v35  ;;  %v3753_v28 = vadd.f32 %v3752_v58, %v3751_v49  ;;  %v3758_v13 = vadd.f32 %v3757_v33, %v3756_v31 }
 0x751   : > { %3927 = vst.msk [vmem:[%s6909_s26 + $0x70] sm:$0xff] %vm293_vm0, %v3895_v27  ;;  %3928 = vst.msk [vmem:[%s6909_s26 + $0x78] sm:$0xff] %vm293_vm0, %v3896_v32  ;;  %v4743_v26 = vpop.f32.mrb[120].mxu1 }
 0x752   : > { %v5259_v30 = vpop.eup %5258  ;;  %v3754_v62 = vrot.slane %v3753_v28, 1  ;;  %v3759_v0 = vrot.slane %v3758_v13, 4  ;;  %v7060_v60 = vadd.f32 %v6843_v19, %v4743_v26  ;;  %v3586_v18 = vpop.f32.mrb[121].mxu1 }
 0x753   : > { %v3841_v6 = vmul.f32 0.1, %v5259_v30  ;;  %v7063_v42 = vadd.f32 %v6843_v19, %v3586_v18 }
 0x754   : > { %v3755_v38 = vadd.f32 %v3754_v62, %v3753_v28  ;;  %v3760_v21 = vadd.f32 %v3759_v0, %v3758_v13  ;;  %v3650_v16 = vmul.f32 %v7060_v60, %v7060_v60 }
 0x755   : > { %v3865_v55 = vmul.f32 %v3841_v6, %v6983_v39  ;;  %v3866_v63 = vmul.f32 %v3841_v6, %v6980_v22  ;;  %v3649_v61 = vmul.f32 %v7063_v42, %v7063_v42 }
 0x756   : > { %v3811_v11 = vmax.f32 %v3755_v38, 1e-24  ;;  %v3761_v8 = vrot.slane %v3760_v21, 2  ;;  %v3766_v17 = vsel %vm293_vm0, %v3650_v16, 0.0  ;;  %v5296_v38 = vld [vmem:[%s5380_s7 + $0xa0] sm:$0xff]  ;;  %v5297_v16 = vld [vmem:[%s5380_s7 + $0xa8] sm:$0xff] }
 0x757   : > { %v3897_v36 = vadd.f32 %v5292_v2, %v3865_v55  ;;  %v3898_v9 = vadd.f32 %v5293_v10, %v3866_v63  ;;  %v3765_v59 = vsel %vm293_vm0, %v3649_v61, 0.0 }
 0x758   : > { %5262 = vrsqrt.f32 %v3811_v11  ;;  %v3762_v57 = vadd.f32 %v3761_v8, %v3760_v21  ;;  %v3767_v34 = vadd.f32 %v3766_v17, %v3765_v59 }
 0x759   : > { %3929 = vst.msk [vmem:[%s6909_s26 + $0x80] sm:$0xff] %vm293_vm0, %v3897_v36  ;;  %3930 = vst.msk [vmem:[%s6909_s26 + $0x88] sm:$0xff] %vm293_vm0, %v3898_v9  ;;  %v4746_v22 = vpop.f32.mrb[122].mxu1 }
 0x75a   : > { %v5261_v39 = vpop.eup %5260  ;;  %v3763_v12 = vrot.slane %v3762_v57, 1  ;;  %v3768_v4 = vrot.slane %v3767_v34, 4  ;;  %v7080_v50 = vadd.f32 %v6843_v19, %v4746_v22  ;;  %v3596_v44 = vpop.f32.mrb[123].mxu1 }
 0x75b   : > { %v3842_v5 = vmul.f32 0.1, %v5261_v39  ;;  %v7083_v52 = vadd.f32 %v6843_v19, %v3596_v44 }
 0x75c   : > { %v3764_v48 = vadd.f32 %v3763_v12, %v3762_v57  ;;  %v3769_v54 = vadd.f32 %v3768_v4, %v3767_v34  ;;  %v3652_v20 = vmul.f32 %v7080_v50, %v7080_v50 }
 0x75d   : > { %v3867_v1 = vmul.f32 %v3842_v5, %v7003_v53  ;;  %v3868_v15 = vmul.f32 %v3842_v5, %v7000_v3  ;;  %v3651_v51 = vmul.f32 %v7083_v52, %v7083_v52 }
 0x75e   : > { %v3812_v14 = vmax.f32 %v3764_v48, 1e-24  ;;  %v3770_v25 = vrot.slane %v3769_v54, 2  ;;  %v3775_v47 = vsel %vm293_vm0, %v3652_v20, 0.0 }
 0x75f   : > { %v3899_v49 = vadd.f32 %v5294_v24, %v3867_v1  ;;  %v3900_v56 = vadd.f32 %v5295_v46, %v3868_v15  ;;  %v3774_v29 = vsel %vm293_vm0, %v3651_v51, 0.0 }
 0x760   : > { %5264 = vrsqrt.f32 %v3812_v14  ;;  %v3771_v40 = vadd.f32 %v3770_v25, %v3769_v54  ;;  %v3776_v35 = vadd.f32 %v3775_v47, %v3774_v29  ;;  %v5299_v54 = vld [vmem:[%s5380_s7 + $0xb8] sm:$0xff] }
 0x761   : > { %3931 = vst.msk [vmem:[%s6909_s26 + $0x90] sm:$0xff] %vm293_vm0, %v3899_v49  ;;  %3932 = vst.msk [vmem:[%s6909_s26 + $0x98] sm:$0xff] %vm293_vm0, %v3900_v56  ;;  %v4749_v3 = vpop.f32.mrb[124].mxu1 }
 0x762   : > { %v5263_v53 = vpop.eup %5262  ;;  %v3772_v58 = vrot.slane %v3771_v40, 1  ;;  %v3777_v33 = vrot.slane %v3776_v35, 4  ;;  %v7100_v45 = vadd.f32 %v6843_v19, %v4749_v3  ;;  %v3606_v27 = vpop.f32.mrb[125].mxu1  ;;  %v5301_v3 = vld [vmem:[%s5380_s7 + $0xc8] sm:$0xff] }
 0x763   : > { %v3843_v43 = vmul.f32 0.1, %v5263_v53  ;;  %v7103_v32 = vadd.f32 %v6843_v19, %v3606_v27 }
 0x764   : > { %v3773_v31 = vadd.f32 %v3772_v58, %v3771_v40  ;;  %v3778_v28 = vadd.f32 %v3777_v33, %v3776_v35  ;;  %v3654_v13 = vmul.f32 %v7100_v45, %v7100_v45  ;;  %v5300_v40 = vld [vmem:[%s5380_s7 + $0xc0] sm:$0xff] }
 0x765   : > { %v3869_v26 = vmul.f32 %v3843_v43, %v7023_v23  ;;  %v3870_v30 = vmul.f32 %v3843_v43, %v7020_v37  ;;  %v3653_v62 = vmul.f32 %v7103_v32, %v7103_v32 }
 0x766   : > { %v3813_v0 = vmax.f32 %v3773_v31, 1e-24  ;;  %v3779_v18 = vrot.slane %v3778_v28, 2  ;;  %v3784_v6 = vsel %vm293_vm0, %v3654_v13, 0.0  ;;  %v5302_v13 = vld [vmem:[%s5380_s7 + $0xd0] sm:$0xff] }
 0x767   : > { %v3901_v21 = vadd.f32 %v5296_v38, %v3869_v26  ;;  %v3902_v55 = vadd.f32 %v5297_v16, %v3870_v30  ;;  %v3783_v63 = vsel %vm293_vm0, %v3653_v62, 0.0  ;;  %v5303_v30 = vld [vmem:[%s5380_s7 + $0xd8] sm:$0xff] }
 0x768   : > { %5266 = vrsqrt.f32 %v3813_v0  ;;  %v3780_v61 = vadd.f32 %v3779_v18, %v3778_v28  ;;  %v3785_v11 = vadd.f32 %v3784_v6, %v3783_v63  ;;  %v5304_v6 = vld [vmem:[%s5380_s7 + $0xe0] sm:$0xff] }
 0x769   : > { %3933 = vst.msk [vmem:[%s6909_s26 + $0xa0] sm:$0xff] %vm293_vm0, %v3901_v21  ;;  %3934 = vst.msk [vmem:[%s6909_s26 + $0xa8] sm:$0xff] %vm293_vm0, %v3902_v55  ;;  %v4752_v37 = vpop.f32.mrb[126].mxu1  ;;  %v5305_v21 = vld [vmem:[%s5380_s7 + $0xe8] sm:$0xff] }
 0x76a   : > { %v5265_v23 = vpop.eup %5264  ;;  %v3781_v8 = vrot.slane %v3780_v61, 1  ;;  %v3786_v17 = vrot.slane %v3785_v11, 4  ;;  %v7120_v2 = vadd.f32 %v6843_v19, %v4752_v37  ;;  %v3616_v36 = vpop.f32.mrb[127].mxu1  ;;  %v5306_v37 = vld [vmem:[%s5380_s7 + $0xf0] sm:$0xff] }
 0x76b   : > { %v3844_v10 = vmul.f32 0.1, %v5265_v23  ;;  %v7123_v9 = vadd.f32 %v6843_v19, %v3616_v36  ;;  %v5298_v19 = vld [vmem:[%s5380_s7 + $0xb0] sm:$0xff]  ;;  %v5307_v23 = vld [vmem:[%s5380_s7 + $0xf8] sm:$0xff] }
 0x76c   : > { %v3782_v59 = vadd.f32 %v3781_v8, %v3780_v61  ;;  %v3787_v57 = vadd.f32 %v3786_v17, %v3785_v11  ;;  %v3656_v34 = vmul.f32 %v7120_v2, %v7120_v2 }
 0x76d   : > { %v3871_v22 = vmul.f32 %v3844_v10, %v7043_v7  ;;  %v3872_v39 = vmul.f32 %v3844_v10, %v7040_v41  ;;  %v3655_v12 = vmul.f32 %v7123_v9, %v7123_v9 }
 0x76e   : > { %v3814_v4 = vmax.f32 %v3782_v59, 1e-24  ;;  %v3788_v44 = vrot.slane %v3787_v57, 2  ;;  %v3793_v5 = vsel %vm293_vm0, %v3656_v34, 0.0 }
 0x76f   : > { %v3903_v48 = vadd.f32 %v5298_v19, %v3871_v22  ;;  %v3904_v20 = vadd.f32 %v5299_v54, %v3872_v39  ;;  %v3792_v1 = vsel %vm293_vm0, %v3655_v12, 0.0 }
 0x770   : > { %5268 = vrsqrt.f32 %v3814_v4  ;;  %v3789_v15 = vadd.f32 %v3788_v44, %v3787_v57  ;;  %v3794_v7 = vadd.f32 %v3793_v5, %v3792_v1 }
 0x771   : > { %3935 = vst.msk [vmem:[%s6909_s26 + $0xb0] sm:$0xff] %vm293_vm0, %v3903_v48  ;;  %3936 = vst.msk [vmem:[%s6909_s26 + $0xb8] sm:$0xff] %vm293_vm0, %v3904_v20 }
 0x772   : > { %v5267_v41 = vpop.eup %5266  ;;  %v3790_v51 = vrot.slane %v3789_v15, 1  ;;  %v3795_v14 = vrot.slane %v3794_v7, 4 }
 0x773   : > { %v3845_v25 = vmul.f32 0.1, %v5267_v41 }
 0x774   : > { %v3791_v47 = vadd.f32 %v3790_v51, %v3789_v15  ;;  %v3796_v24 = vadd.f32 %v3795_v14, %v3794_v7 }
 0x775   : > { %v3873_v49 = vmul.f32 %v3845_v25, %v7063_v42  ;;  %v3874_v46 = vmul.f32 %v3845_v25, %v7060_v60 }
 0x776   : > { %v3815_v56 = vmax.f32 %v3791_v47, 1e-24  ;;  %v3797_v29 = vrot.slane %v3796_v24, 2 }
 0x777   : > { %v3905_v35 = vadd.f32 %v5300_v40, %v3873_v49  ;;  %v3906_v53 = vadd.f32 %v5301_v3, %v3874_v46 }
 0x778   : > { %5270 = vrsqrt.f32 %v3815_v56  ;;  %v3798_v58 = vadd.f32 %v3797_v29, %v3796_v24 }
 0x779   : > { %3937 = vst.msk [vmem:[%s6909_s26 + $0xc0] sm:$0xff] %vm293_vm0, %v3905_v35  ;;  %3938 = vst.msk [vmem:[%s6909_s26 + $0xc8] sm:$0xff] %vm293_vm0, %v3906_v53 }
 0x77a   : > { %v5269_v33 = vpop.eup %5268  ;;  %v3799_v42 = vrot.slane %v3798_v58, 1 }
 0x77b   : > { %v3846_v27 = vmul.f32 0.1, %v5269_v33 }
 0x77c   : > { %v3800_v60 = vadd.f32 %v3799_v42, %v3798_v58 }
 0x77d   : > { %v3875_v43 = vmul.f32 %v3846_v27, %v7083_v52  ;;  %v3876_v31 = vmul.f32 %v3846_v27, %v7080_v50 }
 0x77e   : > { %v3816_v28 = vmax.f32 %v3800_v60, 1e-24 }
 0x77f   : > { %v3907_v26 = vadd.f32 %v5302_v13, %v3875_v43  ;;  %v3908_v62 = vadd.f32 %v5303_v30, %v3876_v31 }
 0x780   : > { %5272 = vrsqrt.f32 %v3816_v28 }
 0x781   : > { %3939 = vst.msk [vmem:[%s6909_s26 + $0xd0] sm:$0xff] %vm293_vm0, %v3907_v26  ;;  %3940 = vst.msk [vmem:[%s6909_s26 + $0xd8] sm:$0xff] %vm293_vm0, %v3908_v62 }
 0x782   : > { %v5271_v0 = vpop.eup %5270 }
 0x783   : > { %v3847_v18 = vmul.f32 0.1, %v5271_v0 }
 0x785   : > { %v3877_v52 = vmul.f32 %v3847_v18, %v7103_v32  ;;  %v3878_v50 = vmul.f32 %v3847_v18, %v7100_v45 }
 0x787   : > { %v3909_v38 = vadd.f32 %v5304_v6, %v3877_v52  ;;  %v3910_v16 = vadd.f32 %v5305_v21, %v3878_v50 }
 0x789   : > { %3941 = vst.msk [vmem:[%s6909_s26 + $0xe0] sm:$0xff] %vm293_vm0, %v3909_v38  ;;  %3942 = vst.msk [vmem:[%s6909_s26 + $0xe8] sm:$0xff] %vm293_vm0, %v3910_v16 }
 0x78a   : > { %v5273_v55 = vpop.eup %5272 }
 0x78b   : > { %v3848_v63 = vmul.f32 0.1, %v5273_v55 }
 0x78d   : > { %v3879_v61 = vmul.f32 %v3848_v63, %v7123_v9  ;;  %v3880_v11 = vmul.f32 %v3848_v63, %v7120_v2 }
 0x78f   : > { %v3911_v32 = vadd.f32 %v5306_v37, %v3879_v61  ;;  %v3912_v8 = vadd.f32 %v5307_v23, %v3880_v11 }
 0x791   : > { %3943 = vst.msk [vmem:[%s6909_s26 + $0xf0] sm:$0xff] %vm293_vm0, %v3911_v32  ;;  %3944 = vst.msk [vmem:[%s6909_s26 + $0xf8] sm:$0xff] %vm293_vm0, %v3912_v8 }
 0x792 PF: > { %s15_s18 = sadd.s32 1, %s5314_s18  }
 0x793   : > { %p12_p4 = scmp.ge.s32.totalorder %s15_s18, 4  }
 0x795   :  { %14 = sbr.rel (!%p12_p4) target bundleno = 1 (0x1), region = 75 }

</bundles_post_ra>
